<compile_context>
chip_gen: v5e
topology: v5e:2x2
jax: 0.10.0
libtpu: 0.0.40
codegen_flags: <defaults>
</compile_context>

<pallas_src>
import functools

import numpy as np
import jax
import jax.numpy as jnp
from jax import lax
from jax.experimental import pallas as pl
from jax.experimental.pallas import tpu as pltpu


# ------------------------------- fused kernel --------------------------------

def _lenet_kernel(x_ref, cr1_ref, cw1_ref, cr2_ref, cw2_ref, rfcp_ref,
                  wfc1_ref, wfc2_ref, wfc3_ref, bias_ref, o_ref):
    dot = functools.partial(jnp.dot, preferred_element_type=jnp.float32)
    x2d = x_ref[...]                                      # (TB*28, 28)

    # ---- conv1 (1->6, 5x5 valid): per tap-row di, row-select then banded matmul ----
    acc1 = dot(dot(cr1_ref[0], x2d), cw1_ref[0])
    for di in range(1, 5):
        acc1 = acc1 + dot(dot(cr1_ref[di], x2d), cw1_ref[di])
    y1 = jnp.maximum(acc1 + bias_ref[0:1, :], 0.0)        # (TB*24, 256)

    # ---- 2x2/2 max-pool, matmul-free: rows pre-split even|odd (via cr1), columns
    # pre-split even|odd into lane-groups 0|1 (via cw1). ----
    half1 = y1.shape[0] // 2
    y1h = jnp.maximum(y1[:half1], y1[half1:])             # (TB*12, 256)
    p1 = jnp.maximum(y1h[:, 0:72], y1h[:, 128:200])       # (TB*12, 72)  lanes ci*12+w

    # ---- conv2 (6->16, 5x5 valid) ----
    acc2 = dot(dot(cr2_ref[0], p1), cw2_ref[0])
    for di in range(1, 5):
        acc2 = acc2 + dot(dot(cr2_ref[di], p1), cw2_ref[di])
    y2 = jnp.maximum(acc2 + bias_ref[1:2, :], 0.0)        # (TB*8, 256)

    half2 = y2.shape[0] // 2
    y2h = jnp.maximum(y2[:half2], y2[half2:])             # (TB*4, 256)
    p2 = jnp.maximum(y2h[:, 0:64], y2h[:, 128:192])       # (TB*4, 64)   lanes co*4+w

    # ---- fc1 (256 -> 120): regroup rows to [hp*TB + b] once, 4 batched slab matmuls ----
    p2g = dot(rfcp_ref[...], p2)                          # (TB*4, 64)
    tb = p2g.shape[0] // 4
    h = bias_ref[2:3, 0:120]
    for hp in range(4):
        h = h + dot(p2g[hp * tb:(hp + 1) * tb, :], wfc1_ref[hp])
    h = jnp.maximum(h, 0.0)                               # (TB, 120)

    # ---- fc2 (120 -> 84) + ReLU, fc3 (84 -> 10) zero-padded to a lane-dense store ----
    h = jnp.maximum(dot(h, wfc2_ref[...]) + bias_ref[3:4, 0:84], 0.0)    # (TB, 84)
    o_ref[...] = dot(h, wfc3_ref[...]) + bias_ref[4:5, 0:128]            # (TB, 128)


# ------------------------ one-time static weight re-layout ---------------------

def prepack_params(params, batch_tile=8):
    """Re-layout weights into matmul-ready f32 slabs.  Call ONCE; reuse across calls."""
    tb = int(batch_tile)
    f32 = np.float32
    conv1_w = np.asarray(params["conv1_w"], f32)   # (6,1,5,5)
    conv1_b = np.asarray(params["conv1_b"], f32)
    conv2_w = np.asarray(params["conv2_w"], f32)   # (16,6,5,5)
    conv2_b = np.asarray(params["conv2_b"], f32)
    fc1_w = np.asarray(params["fc1_w"], f32)       # (120,256)
    fc1_b = np.asarray(params["fc1_b"], f32)
    fc2_w = np.asarray(params["fc2_w"], f32)       # (84,120)
    fc2_b = np.asarray(params["fc2_b"], f32)
    fc3_w = np.asarray(params["fc3_w"], f32)       # (10,84)
    fc3_b = np.asarray(params["fc3_b"], f32)

    # Output lane layouts: even output columns in lane-group 0, odd in lane-group 1,
    # so the column half of the 2x2 pool is a static slice + max.
    def lane1(c, w):   # conv1 output (c in [0,6), w in [0,24)) -> lane in [0,256)
        return (w % 2) * 128 + c * 12 + w // 2

    def lane2(co, w):  # conv2 output (co in [0,16), w in [0,8)) -> lane in [0,256)
        return (w % 2) * 128 + co * 4 + w // 2

    # conv1 row-select per tap-row di: out row = (h%2)*(tb*12) + b*12 + h//2 (even rows
    # in the top half for the row-pool), source row = b*28 + h + di.
    cr1 = np.zeros((5, tb * 24, tb * 28), f32)
    for di in range(5):
        for b in range(tb):
            for h in range(24):
                r = (h % 2) * (tb * 12) + b * 12 + h // 2
                cr1[di, r, b * 28 + h + di] = 1.0

    # conv1 banded weights: cw1[di, w_in, lane1(c,w)] = conv1_w[c,0,di,w_in-w].
    cw1 = np.zeros((5, 28, 256), f32)
    for di in range(5):
        for c in range(6):
            for w in range(24):
                for dj in range(5):
                    cw1[di, w + dj, lane1(c, w)] = conv1_w[c, 0, di, dj]

    # conv2 row-select: p1 rows are b*12 + h; out row = (h%2)*(tb*4) + b*4 + h//2.
    cr2 = np.zeros((5, tb * 8, tb * 12), f32)
    for di in range(5):
        for b in range(tb):
            for h in range(8):
                r = (h % 2) * (tb * 4) + b * 4 + h // 2
                cr2[di, r, b * 12 + h + di] = 1.0

    # conv2 banded weights: input lanes ci*12 + w_in, output lanes lane2(co, w).
    cw2 = np.zeros((5, 72, 256), f32)
    for di in range(5):
        for co in range(16):
            for ci in range(6):
                for w in range(8):
                    for dj in range(5):
                        cw2[di, ci * 12 + w + dj, lane2(co, w)] = conv2_w[co, ci, di, dj]

    # fc1 row regrouping: p2 rows b*4 + hp  ->  p2g rows hp*tb + b.
    rfcp = np.zeros((tb * 4, tb * 4), f32)
    for b in range(tb):
        for hp in range(4):
            rfcp[hp * tb + b, b * 4 + hp] = 1.0

    # fc1 weights in PyTorch NCHW-flatten order: wfc1[hp, c*4+w, n] = fc1_w[n, c*16+hp*4+w].
    wfc1 = (fc1_w.reshape(120, 16, 4, 4)       # (n, c, h, w)
            .transpose(2, 1, 3, 0)             # (h, c, w, n)
            .reshape(4, 64, 120).astype(f32))

    wfc2 = np.ascontiguousarray(fc2_w.T)                       # (120, 84)
    wfc3 = np.zeros((84, 128), f32)
    wfc3[:, :10] = fc3_w.T

    bias = np.zeros((5, 256), f32)
    for c in range(6):
        for w in range(24):
            bias[0, lane1(c, w)] = conv1_b[c]
    for co in range(16):
        for w in range(8):
            bias[1, lane2(co, w)] = conv2_b[co]
    bias[2, :120] = fc1_b
    bias[3, :84] = fc2_b
    bias[4, :10] = fc3_b

    return tuple(jnp.asarray(a) for a in
                 (cr1, cw1, cr2, cw2, rfcp, wfc1, wfc2, wfc3, bias))


# ---------------------------------- forward -----------------------------------

def _const_spec(a):  # full-array block, VMEM-resident across the whole grid
    return pl.BlockSpec(a.shape, lambda i, nd=a.ndim: (0,) * nd)


@jax.jit
def convnet_forward(x, packed):
    """x: anything reshapeable to (-1, 1, 28, 28) -> (B, 10) logits."""
    cr1 = packed[0]
    tb = cr1.shape[1] // 24                     # batch tile baked into the constants
    x = x.reshape(-1, 28, 28).astype(jnp.float32)
    B = x.shape[0]
    Bp = ((B + tb - 1) // tb) * tb
    if Bp != B:                                 # pad batch to a multiple of the tile
        x = jnp.concatenate([x, jnp.zeros((Bp - B, 28, 28), jnp.float32)], axis=0)
    x2d = x.reshape(Bp * 28, 28)                # batch packed along sublanes

    out = pl.pallas_call(
        _lenet_kernel,
        out_shape=jax.ShapeDtypeStruct((Bp, 128), jnp.float32),
        grid=(Bp // tb,),
        in_specs=[pl.BlockSpec((tb * 28, 28), lambda i: (i, 0))]
                 + [_const_spec(a) for a in packed],
        out_specs=pl.BlockSpec((tb, 128), lambda i: (i, 0)),
        compiler_params=pltpu.CompilerParams(
            dimension_semantics=("parallel",)),
    )(x2d, *packed)
    return out[:B, :10]


# ------------------------------ reference & init ------------------------------

@jax.jit
def convnet_ref(x, params):
    """Pure-JAX reference matching the PyTorch module."""
    x = x.reshape(-1, 1, 28, 28).astype(jnp.float32)
    dn = ("NCHW", "OIHW", "NCHW")
    y = lax.conv_general_dilated(x, params["conv1_w"], (1, 1), "VALID",
                                 dimension_numbers=dn)
    y = jnp.maximum(y + params["conv1_b"][None, :, None, None], 0.0)
    y = lax.reduce_window(y, -jnp.inf, lax.max, (1, 1, 2, 2), (1, 1, 2, 2), "VALID")
    y = lax.conv_general_dilated(y, params["conv2_w"], (1, 1), "VALID",
                                 dimension_numbers=dn)
    y = jnp.maximum(y + params["conv2_b"][None, :, None, None], 0.0)
    y = lax.reduce_window(y, -jnp.inf, lax.max, (1, 1, 2, 2), (1, 1, 2, 2), "VALID")
    f = y.reshape(y.shape[0], 16 * 4 * 4)
    h = jnp.maximum(f @ params["fc1_w"].T + params["fc1_b"], 0.0)
    h = jnp.maximum(h @ params["fc2_w"].T + params["fc2_b"], 0.0)
    return h @ params["fc3_w"].T + params["fc3_b"]


def init_params(key):
    """Deterministic PyTorch-style uniform(-1/sqrt(fan_in), 1/sqrt(fan_in))."""
    ks = jax.random.split(key, 10)

    def u(k, shape, fan_in):
        bound = 1.0 / jnp.sqrt(float(fan_in))
        return jax.random.uniform(k, shape, jnp.float32, -bound, bound)

    return {
        "conv1_w": u(ks[0], (6, 1, 5, 5), 1 * 5 * 5),
        "conv1_b": u(ks[1], (6,), 1 * 5 * 5),
        "conv2_w": u(ks[2], (16, 6, 5, 5), 6 * 5 * 5),
        "conv2_b": u(ks[3], (16,), 6 * 5 * 5),
        "fc1_w": u(ks[4], (120, 256), 256),
        "fc1_b": u(ks[5], (120,), 256),
        "fc2_w": u(ks[6], (84, 120), 120),
        "fc2_b": u(ks[7], (84,), 120),
        "fc3_w": u(ks[8], (10, 84), 84),
        "fc3_b": u(ks[9], (10,), 84),
    }


if __name__ == "__main__":
    key = jax.random.PRNGKey(0)
    pkey, xkey = jax.random.split(key)
    params = init_params(pkey)

    # One-time static re-layout OUTSIDE the per-call jit (perf-review item).
    packed = prepack_params(params, batch_tile=8)

    # B=10: exercises batch padding (10 -> 16) and yields a 2-step "parallel" grid.
    B = 10
    x = jax.random.normal(xkey, (B, 784), dtype=jnp.float32)

    out = jax.block_until_ready(convnet_forward(x, packed))
    ref = jax.block_until_ready(convnet_ref(x, params))

    assert out.shape == (B, 10) and out.dtype == jnp.float32
    err = float(jnp.max(jnp.abs(out - ref)))
    assert err < 5e-2, f"mismatch vs pure-JAX reference: {err}"
    print("KERNEL_OK")
</pallas_src>

<mosaic_0001>
module attributes {stable_mosaic.version = 11 : i64} {
  func.func @_lenet_kernel(%arg0: i32, %arg1: memref<224x28xf32, #tpu.memory_space<vmem>>, %arg2: memref<5x192x224xf32, #tpu.memory_space<vmem>>, %arg3: memref<5x28x256xf32, #tpu.memory_space<vmem>>, %arg4: memref<5x64x96xf32, #tpu.memory_space<vmem>>, %arg5: memref<5x72x256xf32, #tpu.memory_space<vmem>>, %arg6: memref<32x32xf32, #tpu.memory_space<vmem>>, %arg7: memref<4x64x120xf32, #tpu.memory_space<vmem>>, %arg8: memref<120x84xf32, #tpu.memory_space<vmem>>, %arg9: memref<84x128xf32, #tpu.memory_space<vmem>>, %arg10: memref<5x256xf32, #tpu.memory_space<vmem>>, %arg11: memref<8x128xf32, #tpu.memory_space<vmem>>) attributes {dimension_semantics = [#tpu.dimension_semantics<parallel>], iteration_bounds = array<i64: 2>, scalar_prefetch = 0 : i64, scratch_operands = 0 : i64, tpu.core_type = #tpu.core_type<tc>, window_params = [{transform_indices = @transform_0, window_bounds = array<i64: 224, 28>}, {pipeline_mode = #tpu.pipeline_mode<synchronous>, transform_indices = @transform_1, window_bounds = array<i64: 5, 192, 224>}, {pipeline_mode = #tpu.pipeline_mode<synchronous>, transform_indices = @transform_2, window_bounds = array<i64: 5, 28, 256>}, {pipeline_mode = #tpu.pipeline_mode<synchronous>, transform_indices = @transform_3, window_bounds = array<i64: 5, 64, 96>}, {pipeline_mode = #tpu.pipeline_mode<synchronous>, transform_indices = @transform_4, window_bounds = array<i64: 5, 72, 256>}, {pipeline_mode = #tpu.pipeline_mode<synchronous>, transform_indices = @transform_5, window_bounds = array<i64: 32, 32>}, {pipeline_mode = #tpu.pipeline_mode<synchronous>, transform_indices = @transform_6, window_bounds = array<i64: 4, 64, 120>}, {pipeline_mode = #tpu.pipeline_mode<synchronous>, transform_indices = @transform_7, window_bounds = array<i64: 120, 84>}, {pipeline_mode = #tpu.pipeline_mode<synchronous>, transform_indices = @transform_8, window_bounds = array<i64: 84, 128>}, {pipeline_mode = #tpu.pipeline_mode<synchronous>, transform_indices = @transform_9, window_bounds = array<i64: 5, 256>}, {transform_indices = @transform_10, window_bounds = array<i64: 8, 128>}]} {
    %c0 = arith.constant 0 : index
    %c0_0 = arith.constant 0 : index
    %0 = vector.load %arg1[%c0, %c0_0] : memref<224x28xf32, #tpu.memory_space<vmem>>, vector<224x28xf32>
    %c0_1 = arith.constant 0 : index
    %c0_2 = arith.constant 0 : index
    %c0_3 = arith.constant 0 : index
    %1 = vector.load %arg2[%c0_1, %c0_2, %c0_3] : memref<5x192x224xf32, #tpu.memory_space<vmem>>, vector<1x192x224xf32>
    %2 = vector.shape_cast %1 : vector<1x192x224xf32> to vector<192x224xf32>
    %cst = arith.constant dense<0.000000e+00> : vector<192x28xf32>
    %3 = tpu.matmul %2, %0, %cst {dimension_numbers = #tpu.dot_dimension_numbers<[1], [0], [0], [1], [0, 0, 1, 1], [], []>} : vector<192x224xf32>, vector<224x28xf32>, vector<192x28xf32> -> vector<192x28xf32>
    %c0_4 = arith.constant 0 : index
    %c0_5 = arith.constant 0 : index
    %c0_6 = arith.constant 0 : index
    %4 = vector.load %arg3[%c0_4, %c0_5, %c0_6] : memref<5x28x256xf32, #tpu.memory_space<vmem>>, vector<1x28x256xf32>
    %5 = vector.shape_cast %4 : vector<1x28x256xf32> to vector<28x256xf32>
    %cst_7 = arith.constant dense<0.000000e+00> : vector<192x256xf32>
    %6 = tpu.matmul %3, %5, %cst_7 {dimension_numbers = #tpu.dot_dimension_numbers<[1], [0], [0], [1], [0, 0, 1, 1], [], []>} : vector<192x28xf32>, vector<28x256xf32>, vector<192x256xf32> -> vector<192x256xf32>
    %c1 = arith.constant 1 : index
    %c0_8 = arith.constant 0 : index
    %c0_9 = arith.constant 0 : index
    %7 = vector.load %arg2[%c1, %c0_8, %c0_9] : memref<5x192x224xf32, #tpu.memory_space<vmem>>, vector<1x192x224xf32>
    %8 = vector.shape_cast %7 : vector<1x192x224xf32> to vector<192x224xf32>
    %cst_10 = arith.constant dense<0.000000e+00> : vector<192x28xf32>
    %9 = tpu.matmul %8, %0, %cst_10 {dimension_numbers = #tpu.dot_dimension_numbers<[1], [0], [0], [1], [0, 0, 1, 1], [], []>} : vector<192x224xf32>, vector<224x28xf32>, vector<192x28xf32> -> vector<192x28xf32>
    %c1_11 = arith.constant 1 : index
    %c0_12 = arith.constant 0 : index
    %c0_13 = arith.constant 0 : index
    %10 = vector.load %arg3[%c1_11, %c0_12, %c0_13] : memref<5x28x256xf32, #tpu.memory_space<vmem>>, vector<1x28x256xf32>
    %11 = vector.shape_cast %10 : vector<1x28x256xf32> to vector<28x256xf32>
    %cst_14 = arith.constant dense<0.000000e+00> : vector<192x256xf32>
    %12 = tpu.matmul %9, %11, %cst_14 {dimension_numbers = #tpu.dot_dimension_numbers<[1], [0], [0], [1], [0, 0, 1, 1], [], []>} : vector<192x28xf32>, vector<28x256xf32>, vector<192x256xf32> -> vector<192x256xf32>
    %13 = arith.addf %6, %12 : vector<192x256xf32>
    %c2 = arith.constant 2 : index
    %c0_15 = arith.constant 0 : index
    %c0_16 = arith.constant 0 : index
    %14 = vector.load %arg2[%c2, %c0_15, %c0_16] : memref<5x192x224xf32, #tpu.memory_space<vmem>>, vector<1x192x224xf32>
    %15 = vector.shape_cast %14 : vector<1x192x224xf32> to vector<192x224xf32>
    %cst_17 = arith.constant dense<0.000000e+00> : vector<192x28xf32>
    %16 = tpu.matmul %15, %0, %cst_17 {dimension_numbers = #tpu.dot_dimension_numbers<[1], [0], [0], [1], [0, 0, 1, 1], [], []>} : vector<192x224xf32>, vector<224x28xf32>, vector<192x28xf32> -> vector<192x28xf32>
    %c2_18 = arith.constant 2 : index
    %c0_19 = arith.constant 0 : index
    %c0_20 = arith.constant 0 : index
    %17 = vector.load %arg3[%c2_18, %c0_19, %c0_20] : memref<5x28x256xf32, #tpu.memory_space<vmem>>, vector<1x28x256xf32>
    %18 = vector.shape_cast %17 : vector<1x28x256xf32> to vector<28x256xf32>
    %cst_21 = arith.constant dense<0.000000e+00> : vector<192x256xf32>
    %19 = tpu.matmul %16, %18, %cst_21 {dimension_numbers = #tpu.dot_dimension_numbers<[1], [0], [0], [1], [0, 0, 1, 1], [], []>} : vector<192x28xf32>, vector<28x256xf32>, vector<192x256xf32> -> vector<192x256xf32>
    %20 = arith.addf %13, %19 : vector<192x256xf32>
    %c3 = arith.constant 3 : index
    %c0_22 = arith.constant 0 : index
    %c0_23 = arith.constant 0 : index
    %21 = vector.load %arg2[%c3, %c0_22, %c0_23] : memref<5x192x224xf32, #tpu.memory_space<vmem>>, vector<1x192x224xf32>
    %22 = vector.shape_cast %21 : vector<1x192x224xf32> to vector<192x224xf32>
    %cst_24 = arith.constant dense<0.000000e+00> : vector<192x28xf32>
    %23 = tpu.matmul %22, %0, %cst_24 {dimension_numbers = #tpu.dot_dimension_numbers<[1], [0], [0], [1], [0, 0, 1, 1], [], []>} : vector<192x224xf32>, vector<224x28xf32>, vector<192x28xf32> -> vector<192x28xf32>
    %c3_25 = arith.constant 3 : index
    %c0_26 = arith.constant 0 : index
    %c0_27 = arith.constant 0 : index
    %24 = vector.load %arg3[%c3_25, %c0_26, %c0_27] : memref<5x28x256xf32, #tpu.memory_space<vmem>>, vector<1x28x256xf32>
    %25 = vector.shape_cast %24 : vector<1x28x256xf32> to vector<28x256xf32>
    %cst_28 = arith.constant dense<0.000000e+00> : vector<192x256xf32>
    %26 = tpu.matmul %23, %25, %cst_28 {dimension_numbers = #tpu.dot_dimension_numbers<[1], [0], [0], [1], [0, 0, 1, 1], [], []>} : vector<192x28xf32>, vector<28x256xf32>, vector<192x256xf32> -> vector<192x256xf32>
    %27 = arith.addf %20, %26 : vector<192x256xf32>
    %c4 = arith.constant 4 : index
    %c0_29 = arith.constant 0 : index
    %c0_30 = arith.constant 0 : index
    %28 = vector.load %arg2[%c4, %c0_29, %c0_30] : memref<5x192x224xf32, #tpu.memory_space<vmem>>, vector<1x192x224xf32>
    %29 = vector.shape_cast %28 : vector<1x192x224xf32> to vector<192x224xf32>
    %cst_31 = arith.constant dense<0.000000e+00> : vector<192x28xf32>
    %30 = tpu.matmul %29, %0, %cst_31 {dimension_numbers = #tpu.dot_dimension_numbers<[1], [0], [0], [1], [0, 0, 1, 1], [], []>} : vector<192x224xf32>, vector<224x28xf32>, vector<192x28xf32> -> vector<192x28xf32>
    %c4_32 = arith.constant 4 : index
    %c0_33 = arith.constant 0 : index
    %c0_34 = arith.constant 0 : index
    %31 = vector.load %arg3[%c4_32, %c0_33, %c0_34] : memref<5x28x256xf32, #tpu.memory_space<vmem>>, vector<1x28x256xf32>
    %32 = vector.shape_cast %31 : vector<1x28x256xf32> to vector<28x256xf32>
    %cst_35 = arith.constant dense<0.000000e+00> : vector<192x256xf32>
    %33 = tpu.matmul %30, %32, %cst_35 {dimension_numbers = #tpu.dot_dimension_numbers<[1], [0], [0], [1], [0, 0, 1, 1], [], []>} : vector<192x28xf32>, vector<28x256xf32>, vector<192x256xf32> -> vector<192x256xf32>
    %34 = arith.addf %27, %33 : vector<192x256xf32>
    %c0_36 = arith.constant 0 : index
    %c0_37 = arith.constant 0 : index
    %35 = vector.load %arg10[%c0_36, %c0_37] : memref<5x256xf32, #tpu.memory_space<vmem>>, vector<1x256xf32>
    %36 = vector.broadcast %35 : vector<1x256xf32> to vector<192x256xf32>
    %37 = arith.addf %34, %36 : vector<192x256xf32>
    %cst_38 = arith.constant 0.000000e+00 : f32
    %38 = vector.broadcast %cst_38 : f32 to vector<192x256xf32>
    %39 = arith.maximumf %37, %38 : vector<192x256xf32>
    %40 = vector.extract_strided_slice %39 {offsets = [0, 0], sizes = [96, 256], strides = [1, 1]} : vector<192x256xf32> to vector<96x256xf32>
    %41 = vector.extract_strided_slice %39 {offsets = [96, 0], sizes = [96, 256], strides = [1, 1]} : vector<192x256xf32> to vector<96x256xf32>
    %42 = arith.maximumf %40, %41 : vector<96x256xf32>
    %43 = vector.extract_strided_slice %42 {offsets = [0, 0], sizes = [96, 72], strides = [1, 1]} : vector<96x256xf32> to vector<96x72xf32>
    %44 = vector.extract_strided_slice %42 {offsets = [0, 128], sizes = [96, 72], strides = [1, 1]} : vector<96x256xf32> to vector<96x72xf32>
    %45 = arith.maximumf %43, %44 : vector<96x72xf32>
    %c0_39 = arith.constant 0 : index
    %c0_40 = arith.constant 0 : index
    %c0_41 = arith.constant 0 : index
    %46 = vector.load %arg4[%c0_39, %c0_40, %c0_41] : memref<5x64x96xf32, #tpu.memory_space<vmem>>, vector<1x64x96xf32>
    %47 = vector.shape_cast %46 : vector<1x64x96xf32> to vector<64x96xf32>
    %cst_42 = arith.constant dense<0.000000e+00> : vector<64x72xf32>
    %48 = tpu.matmul %47, %45, %cst_42 {dimension_numbers = #tpu.dot_dimension_numbers<[1], [0], [0], [1], [0, 0, 1, 1], [], []>} : vector<64x96xf32>, vector<96x72xf32>, vector<64x72xf32> -> vector<64x72xf32>
    %c0_43 = arith.constant 0 : index
    %c0_44 = arith.constant 0 : index
    %c0_45 = arith.constant 0 : index
    %49 = vector.load %arg5[%c0_43, %c0_44, %c0_45] : memref<5x72x256xf32, #tpu.memory_space<vmem>>, vector<1x72x256xf32>
    %50 = vector.shape_cast %49 : vector<1x72x256xf32> to vector<72x256xf32>
    %cst_46 = arith.constant dense<0.000000e+00> : vector<64x256xf32>
    %51 = tpu.matmul %48, %50, %cst_46 {dimension_numbers = #tpu.dot_dimension_numbers<[1], [0], [0], [1], [0, 0, 1, 1], [], []>} : vector<64x72xf32>, vector<72x256xf32>, vector<64x256xf32> -> vector<64x256xf32>
    %c1_47 = arith.constant 1 : index
    %c0_48 = arith.constant 0 : index
    %c0_49 = arith.constant 0 : index
    %52 = vector.load %arg4[%c1_47, %c0_48, %c0_49] : memref<5x64x96xf32, #tpu.memory_space<vmem>>, vector<1x64x96xf32>
    %53 = vector.shape_cast %52 : vector<1x64x96xf32> to vector<64x96xf32>
    %cst_50 = arith.constant dense<0.000000e+00> : vector<64x72xf32>
    %54 = tpu.matmul %53, %45, %cst_50 {dimension_numbers = #tpu.dot_dimension_numbers<[1], [0], [0], [1], [0, 0, 1, 1], [], []>} : vector<64x96xf32>, vector<96x72xf32>, vector<64x72xf32> -> vector<64x72xf32>
    %c1_51 = arith.constant 1 : index
    %c0_52 = arith.constant 0 : index
    %c0_53 = arith.constant 0 : index
    %55 = vector.load %arg5[%c1_51, %c0_52, %c0_53] : memref<5x72x256xf32, #tpu.memory_space<vmem>>, vector<1x72x256xf32>
    %56 = vector.shape_cast %55 : vector<1x72x256xf32> to vector<72x256xf32>
    %cst_54 = arith.constant dense<0.000000e+00> : vector<64x256xf32>
    %57 = tpu.matmul %54, %56, %cst_54 {dimension_numbers = #tpu.dot_dimension_numbers<[1], [0], [0], [1], [0, 0, 1, 1], [], []>} : vector<64x72xf32>, vector<72x256xf32>, vector<64x256xf32> -> vector<64x256xf32>
    %58 = arith.addf %51, %57 : vector<64x256xf32>
    %c2_55 = arith.constant 2 : index
    %c0_56 = arith.constant 0 : index
    %c0_57 = arith.constant 0 : index
    %59 = vector.load %arg4[%c2_55, %c0_56, %c0_57] : memref<5x64x96xf32, #tpu.memory_space<vmem>>, vector<1x64x96xf32>
    %60 = vector.shape_cast %59 : vector<1x64x96xf32> to vector<64x96xf32>
    %cst_58 = arith.constant dense<0.000000e+00> : vector<64x72xf32>
    %61 = tpu.matmul %60, %45, %cst_58 {dimension_numbers = #tpu.dot_dimension_numbers<[1], [0], [0], [1], [0, 0, 1, 1], [], []>} : vector<64x96xf32>, vector<96x72xf32>, vector<64x72xf32> -> vector<64x72xf32>
    %c2_59 = arith.constant 2 : index
    %c0_60 = arith.constant 0 : index
    %c0_61 = arith.constant 0 : index
    %62 = vector.load %arg5[%c2_59, %c0_60, %c0_61] : memref<5x72x256xf32, #tpu.memory_space<vmem>>, vector<1x72x256xf32>
    %63 = vector.shape_cast %62 : vector<1x72x256xf32> to vector<72x256xf32>
    %cst_62 = arith.constant dense<0.000000e+00> : vector<64x256xf32>
    %64 = tpu.matmul %61, %63, %cst_62 {dimension_numbers = #tpu.dot_dimension_numbers<[1], [0], [0], [1], [0, 0, 1, 1], [], []>} : vector<64x72xf32>, vector<72x256xf32>, vector<64x256xf32> -> vector<64x256xf32>
    %65 = arith.addf %58, %64 : vector<64x256xf32>
    %c3_63 = arith.constant 3 : index
    %c0_64 = arith.constant 0 : index
    %c0_65 = arith.constant 0 : index
    %66 = vector.load %arg4[%c3_63, %c0_64, %c0_65] : memref<5x64x96xf32, #tpu.memory_space<vmem>>, vector<1x64x96xf32>
    %67 = vector.shape_cast %66 : vector<1x64x96xf32> to vector<64x96xf32>
    %cst_66 = arith.constant dense<0.000000e+00> : vector<64x72xf32>
    %68 = tpu.matmul %67, %45, %cst_66 {dimension_numbers = #tpu.dot_dimension_numbers<[1], [0], [0], [1], [0, 0, 1, 1], [], []>} : vector<64x96xf32>, vector<96x72xf32>, vector<64x72xf32> -> vector<64x72xf32>
    %c3_67 = arith.constant 3 : index
    %c0_68 = arith.constant 0 : index
    %c0_69 = arith.constant 0 : index
    %69 = vector.load %arg5[%c3_67, %c0_68, %c0_69] : memref<5x72x256xf32, #tpu.memory_space<vmem>>, vector<1x72x256xf32>
    %70 = vector.shape_cast %69 : vector<1x72x256xf32> to vector<72x256xf32>
    %cst_70 = arith.constant dense<0.000000e+00> : vector<64x256xf32>
    %71 = tpu.matmul %68, %70, %cst_70 {dimension_numbers = #tpu.dot_dimension_numbers<[1], [0], [0], [1], [0, 0, 1, 1], [], []>} : vector<64x72xf32>, vector<72x256xf32>, vector<64x256xf32> -> vector<64x256xf32>
    %72 = arith.addf %65, %71 : vector<64x256xf32>
    %c4_71 = arith.constant 4 : index
    %c0_72 = arith.constant 0 : index
    %c0_73 = arith.constant 0 : index
    %73 = vector.load %arg4[%c4_71, %c0_72, %c0_73] : memref<5x64x96xf32, #tpu.memory_space<vmem>>, vector<1x64x96xf32>
    %74 = vector.shape_cast %73 : vector<1x64x96xf32> to vector<64x96xf32>
    %cst_74 = arith.constant dense<0.000000e+00> : vector<64x72xf32>
    %75 = tpu.matmul %74, %45, %cst_74 {dimension_numbers = #tpu.dot_dimension_numbers<[1], [0], [0], [1], [0, 0, 1, 1], [], []>} : vector<64x96xf32>, vector<96x72xf32>, vector<64x72xf32> -> vector<64x72xf32>
    %c4_75 = arith.constant 4 : index
    %c0_76 = arith.constant 0 : index
    %c0_77 = arith.constant 0 : index
    %76 = vector.load %arg5[%c4_75, %c0_76, %c0_77] : memref<5x72x256xf32, #tpu.memory_space<vmem>>, vector<1x72x256xf32>
    %77 = vector.shape_cast %76 : vector<1x72x256xf32> to vector<72x256xf32>
    %cst_78 = arith.constant dense<0.000000e+00> : vector<64x256xf32>
    %78 = tpu.matmul %75, %77, %cst_78 {dimension_numbers = #tpu.dot_dimension_numbers<[1], [0], [0], [1], [0, 0, 1, 1], [], []>} : vector<64x72xf32>, vector<72x256xf32>, vector<64x256xf32> -> vector<64x256xf32>
    %79 = arith.addf %72, %78 : vector<64x256xf32>
    %c1_79 = arith.constant 1 : index
    %c0_80 = arith.constant 0 : index
    %80 = vector.load %arg10[%c1_79, %c0_80] : memref<5x256xf32, #tpu.memory_space<vmem>>, vector<1x256xf32>
    %81 = vector.broadcast %80 : vector<1x256xf32> to vector<64x256xf32>
    %82 = arith.addf %79, %81 : vector<64x256xf32>
    %cst_81 = arith.constant 0.000000e+00 : f32
    %83 = vector.broadcast %cst_81 : f32 to vector<64x256xf32>
    %84 = arith.maximumf %82, %83 : vector<64x256xf32>
    %85 = vector.extract_strided_slice %84 {offsets = [0, 0], sizes = [32, 256], strides = [1, 1]} : vector<64x256xf32> to vector<32x256xf32>
    %86 = vector.extract_strided_slice %84 {offsets = [32, 0], sizes = [32, 256], strides = [1, 1]} : vector<64x256xf32> to vector<32x256xf32>
    %87 = arith.maximumf %85, %86 : vector<32x256xf32>
    %88 = vector.extract_strided_slice %87 {offsets = [0, 0], sizes = [32, 64], strides = [1, 1]} : vector<32x256xf32> to vector<32x64xf32>
    %89 = vector.extract_strided_slice %87 {offsets = [0, 128], sizes = [32, 64], strides = [1, 1]} : vector<32x256xf32> to vector<32x64xf32>
    %90 = arith.maximumf %88, %89 : vector<32x64xf32>
    %c0_82 = arith.constant 0 : index
    %c0_83 = arith.constant 0 : index
    %91 = vector.load %arg6[%c0_82, %c0_83] : memref<32x32xf32, #tpu.memory_space<vmem>>, vector<32x32xf32>
    %cst_84 = arith.constant dense<0.000000e+00> : vector<32x64xf32>
    %92 = tpu.matmul %91, %90, %cst_84 {dimension_numbers = #tpu.dot_dimension_numbers<[1], [0], [0], [1], [0, 0, 1, 1], [], []>} : vector<32x32xf32>, vector<32x64xf32>, vector<32x64xf32> -> vector<32x64xf32>
    %c2_85 = arith.constant 2 : index
    %c0_86 = arith.constant 0 : index
    %93 = vector.load %arg10[%c2_85, %c0_86] : memref<5x256xf32, #tpu.memory_space<vmem>>, vector<1x120xf32>
    %94 = vector.extract_strided_slice %92 {offsets = [0, 0], sizes = [8, 64], strides = [1, 1]} : vector<32x64xf32> to vector<8x64xf32>
    %c0_87 = arith.constant 0 : index
    %c0_88 = arith.constant 0 : index
    %c0_89 = arith.constant 0 : index
    %95 = vector.load %arg7[%c0_87, %c0_88, %c0_89] : memref<4x64x120xf32, #tpu.memory_space<vmem>>, vector<1x64x120xf32>
    %96 = vector.shape_cast %95 : vector<1x64x120xf32> to vector<64x120xf32>
    %cst_90 = arith.constant dense<0.000000e+00> : vector<8x120xf32>
    %97 = tpu.matmul %94, %96, %cst_90 {dimension_numbers = #tpu.dot_dimension_numbers<[1], [0], [0], [1], [0, 0, 1, 1], [], []>} : vector<8x64xf32>, vector<64x120xf32>, vector<8x120xf32> -> vector<8x120xf32>
    %98 = vector.broadcast %93 : vector<1x120xf32> to vector<8x120xf32>
    %99 = arith.addf %98, %97 : vector<8x120xf32>
    %100 = vector.extract_strided_slice %92 {offsets = [8, 0], sizes = [8, 64], strides = [1, 1]} : vector<32x64xf32> to vector<8x64xf32>
    %c1_91 = arith.constant 1 : index
    %c0_92 = arith.constant 0 : index
    %c0_93 = arith.constant 0 : index
    %101 = vector.load %arg7[%c1_91, %c0_92, %c0_93] : memref<4x64x120xf32, #tpu.memory_space<vmem>>, vector<1x64x120xf32>
    %102 = vector.shape_cast %101 : vector<1x64x120xf32> to vector<64x120xf32>
    %cst_94 = arith.constant dense<0.000000e+00> : vector<8x120xf32>
    %103 = tpu.matmul %100, %102, %cst_94 {dimension_numbers = #tpu.dot_dimension_numbers<[1], [0], [0], [1], [0, 0, 1, 1], [], []>} : vector<8x64xf32>, vector<64x120xf32>, vector<8x120xf32> -> vector<8x120xf32>
    %104 = arith.addf %99, %103 : vector<8x120xf32>
    %105 = vector.extract_strided_slice %92 {offsets = [16, 0], sizes = [8, 64], strides = [1, 1]} : vector<32x64xf32> to vector<8x64xf32>
    %c2_95 = arith.constant 2 : index
    %c0_96 = arith.constant 0 : index
    %c0_97 = arith.constant 0 : index
    %106 = vector.load %arg7[%c2_95, %c0_96, %c0_97] : memref<4x64x120xf32, #tpu.memory_space<vmem>>, vector<1x64x120xf32>
    %107 = vector.shape_cast %106 : vector<1x64x120xf32> to vector<64x120xf32>
    %cst_98 = arith.constant dense<0.000000e+00> : vector<8x120xf32>
    %108 = tpu.matmul %105, %107, %cst_98 {dimension_numbers = #tpu.dot_dimension_numbers<[1], [0], [0], [1], [0, 0, 1, 1], [], []>} : vector<8x64xf32>, vector<64x120xf32>, vector<8x120xf32> -> vector<8x120xf32>
    %109 = arith.addf %104, %108 : vector<8x120xf32>
    %110 = vector.extract_strided_slice %92 {offsets = [24, 0], sizes = [8, 64], strides = [1, 1]} : vector<32x64xf32> to vector<8x64xf32>
    %c3_99 = arith.constant 3 : index
    %c0_100 = arith.constant 0 : index
    %c0_101 = arith.constant 0 : index
    %111 = vector.load %arg7[%c3_99, %c0_100, %c0_101] : memref<4x64x120xf32, #tpu.memory_space<vmem>>, vector<1x64x120xf32>
    %112 = vector.shape_cast %111 : vector<1x64x120xf32> to vector<64x120xf32>
    %cst_102 = arith.constant dense<0.000000e+00> : vector<8x120xf32>
    %113 = tpu.matmul %110, %112, %cst_102 {dimension_numbers = #tpu.dot_dimension_numbers<[1], [0], [0], [1], [0, 0, 1, 1], [], []>} : vector<8x64xf32>, vector<64x120xf32>, vector<8x120xf32> -> vector<8x120xf32>
    %114 = arith.addf %109, %113 : vector<8x120xf32>
    %cst_103 = arith.constant 0.000000e+00 : f32
    %115 = vector.broadcast %cst_103 : f32 to vector<8x120xf32>
    %116 = arith.maximumf %114, %115 : vector<8x120xf32>
    %c0_104 = arith.constant 0 : index
    %c0_105 = arith.constant 0 : index
    %117 = vector.load %arg8[%c0_104, %c0_105] : memref<120x84xf32, #tpu.memory_space<vmem>>, vector<120x84xf32>
    %cst_106 = arith.constant dense<0.000000e+00> : vector<8x84xf32>
    %118 = tpu.matmul %116, %117, %cst_106 {dimension_numbers = #tpu.dot_dimension_numbers<[1], [0], [0], [1], [0, 0, 1, 1], [], []>} : vector<8x120xf32>, vector<120x84xf32>, vector<8x84xf32> -> vector<8x84xf32>
    %c3_107 = arith.constant 3 : index
    %c0_108 = arith.constant 0 : index
    %119 = vector.load %arg10[%c3_107, %c0_108] : memref<5x256xf32, #tpu.memory_space<vmem>>, vector<1x84xf32>
    %120 = vector.broadcast %119 : vector<1x84xf32> to vector<8x84xf32>
    %121 = arith.addf %118, %120 : vector<8x84xf32>
    %cst_109 = arith.constant 0.000000e+00 : f32
    %122 = vector.broadcast %cst_109 : f32 to vector<8x84xf32>
    %123 = arith.maximumf %121, %122 : vector<8x84xf32>
    %c0_110 = arith.constant 0 : index
    %c0_111 = arith.constant 0 : index
    %124 = vector.load %arg9[%c0_110, %c0_111] : memref<84x128xf32, #tpu.memory_space<vmem>>, vector<84x128xf32>
    %cst_112 = arith.constant dense<0.000000e+00> : vector<8x128xf32>
    %125 = tpu.matmul %123, %124, %cst_112 {dimension_numbers = #tpu.dot_dimension_numbers<[1], [0], [0], [1], [0, 0, 1, 1], [], []>} : vector<8x84xf32>, vector<84x128xf32>, vector<8x128xf32> -> vector<8x128xf32>
    %c4_113 = arith.constant 4 : index
    %c0_114 = arith.constant 0 : index
    %126 = vector.load %arg10[%c4_113, %c0_114] : memref<5x256xf32, #tpu.memory_space<vmem>>, vector<1x128xf32>
    %127 = vector.broadcast %126 : vector<1x128xf32> to vector<8x128xf32>
    %128 = arith.addf %125, %127 : vector<8x128xf32>
    %c0_115 = arith.constant 0 : index
    %c0_116 = arith.constant 0 : index
    %129 = vector.load %arg11[%c0_115, %c0_116] : memref<8x128xf32, #tpu.memory_space<vmem>>, vector<8x128xf32>
    tpu.vector_store %arg11[%c0_115, %c0_116], %128 {strides = array<i32>} : memref<8x128xf32, #tpu.memory_space<vmem>>, vector<8x128xf32>,
    return
  }
  func.func @transform_0(%arg0: i32) -> (i32, i32) {
    %c0_i32 = arith.constant 0 : i32
    %c0_i32_0 = arith.constant 0 : i32
    return %arg0, %c0_i32 : i32, i32
  }
  func.func @transform_1(%arg0: i32) -> (i32, i32, i32) {
    %c0_i32 = arith.constant 0 : i32
    %c0_i32_0 = arith.constant 0 : i32
    %c0_i32_1 = arith.constant 0 : i32
    %c0_i32_2 = arith.constant 0 : i32
    return %c0_i32, %c0_i32_0, %c0_i32_1 : i32, i32, i32
  }
  func.func @transform_2(%arg0: i32) -> (i32, i32, i32) {
    %c0_i32 = arith.constant 0 : i32
    %c0_i32_0 = arith.constant 0 : i32
    %c0_i32_1 = arith.constant 0 : i32
    %c0_i32_2 = arith.constant 0 : i32
    return %c0_i32, %c0_i32_0, %c0_i32_1 : i32, i32, i32
  }
  func.func @transform_3(%arg0: i32) -> (i32, i32, i32) {
    %c0_i32 = arith.constant 0 : i32
    %c0_i32_0 = arith.constant 0 : i32
    %c0_i32_1 = arith.constant 0 : i32
    %c0_i32_2 = arith.constant 0 : i32
    return %c0_i32, %c0_i32_0, %c0_i32_1 : i32, i32, i32
  }
  func.func @transform_4(%arg0: i32) -> (i32, i32, i32) {
    %c0_i32 = arith.constant 0 : i32
    %c0_i32_0 = arith.constant 0 : i32
    %c0_i32_1 = arith.constant 0 : i32
    %c0_i32_2 = arith.constant 0 : i32
    return %c0_i32, %c0_i32_0, %c0_i32_1 : i32, i32, i32
  }
  func.func @transform_5(%arg0: i32) -> (i32, i32) {
    %c0_i32 = arith.constant 0 : i32
    %c0_i32_0 = arith.constant 0 : i32
    %c0_i32_1 = arith.constant 0 : i32
    return %c0_i32, %c0_i32_0 : i32, i32
  }
  func.func @transform_6(%arg0: i32) -> (i32, i32, i32) {
    %c0_i32 = arith.constant 0 : i32
    %c0_i32_0 = arith.constant 0 : i32
    %c0_i32_1 = arith.constant 0 : i32
    %c0_i32_2 = arith.constant 0 : i32
    return %c0_i32, %c0_i32_0, %c0_i32_1 : i32, i32, i32
  }
  func.func @transform_7(%arg0: i32) -> (i32, i32) {
    %c0_i32 = arith.constant 0 : i32
    %c0_i32_0 = arith.constant 0 : i32
    %c0_i32_1 = arith.constant 0 : i32
    return %c0_i32, %c0_i32_0 : i32, i32
  }
  func.func @transform_8(%arg0: i32) -> (i32, i32) {
    %c0_i32 = arith.constant 0 : i32
    %c0_i32_0 = arith.constant 0 : i32
    %c0_i32_1 = arith.constant 0 : i32
    return %c0_i32, %c0_i32_0 : i32, i32
  }
  func.func @transform_9(%arg0: i32) -> (i32, i32) {
    %c0_i32 = arith.constant 0 : i32
    %c0_i32_0 = arith.constant 0 : i32
    %c0_i32_1 = arith.constant 0 : i32
    return %c0_i32, %c0_i32_0 : i32, i32
  }
  func.func @transform_10(%arg0: i32) -> (i32, i32) {
    %c0_i32 = arith.constant 0 : i32
    %c0_i32_0 = arith.constant 0 : i32
    return %arg0, %c0_i32 : i32, i32
  }
}

</mosaic_0001>

<bundles_post_ra>
// kernel: convnet_forward.1
= control target key start
LH: loop header
LB: loop body
LE: loop exit
PB: predicated region body
PF: predicated region fallthrough
CT: control target
= control target key end

     0   :  { %s9567_s0 = inlined_call_operand.vmem [shape: f32[448,28], index: 0, kind: input, shape index: {}]   ;;  %s9568_s1 = inlined_call_operand.vmem [shape: f32[5,192,224], index: 1, kind: input, shape index: {}]   ;;  %s9569_s2 = inlined_call_operand.vmem [shape: f32[5,28,256], index: 2, kind: input, shape index: {}]   ;;  %s9570_s3 = inlined_call_operand.vmem [shape: f32[5,64,96], index: 3, kind: input, shape index: {}]   ;;  %s9571_s4 = inlined_call_operand.vmem [shape: f32[5,72,256], index: 4, kind: input, shape index: {}]   ;;  %s9572_s5 = inlined_call_operand.hbm [shape: f32[32,32], index: 5, kind: input, shape index: {}]   ;;  %s9573_s6 = inlined_call_operand.hbm [shape: f32[4,64,120], index: 6, kind: input, shape index: {}]   ;;  %s9574_s7 = inlined_call_operand.vmem [shape: f32[120,84], index: 7, kind: input, shape index: {}]   ;;  %s9575_s8 = inlined_call_operand.vmem [shape: f32[84,128], index: 8, kind: input, shape index: {}]   ;;  %s9576_s9 = inlined_call_operand.hbm [shape: f32[5,256], index: 9, kind: input, shape index: {}]   ;;  %s9577_s10 = inlined_call_operand.hbm [shape: f32[16,128], index: 10, kind: output, shape index: {}]  }
   0x1   :  { %9580 = sst [smem:[#allocation123_spill]] %s9572_s5 }
   0x2   :  { %9581 = sst [smem:[#allocation124_spill]] %s9573_s6 }
   0x3   :  { %15 = vsyncpa [#allocation3], 0 }
   0x4   :  { %16 = vsyncpa [#allocation6], 0 }
   0x5   :  { %17 = vsyncpa [#allocation4], 0 }
   0x6   :  { %19 = vsyncpa [#allocation4 + $0x1], 0  ;;  %s6182_s13 = smov 0   ;;  %s6184_s14 = smov 0  }
   0x7   :  { %s6186_s15 = smov 0   ;;  %s6188_s16 = smov 0  }
   0x8 LB: > { %9582 = sst [smem:[#allocation12_spill]] %s6116_s15  ;;  %s6203_s17 = sadd.s32 4294967295, %s6120_s16   ;;  %s6120_s16 = sphi %s6188_s16, %s9828_s16   ;;  %s6116_s15 = sphi %s6186_s15, %s9825_s15   ;;  %s6112_s14 = sphi %s6184_s14, %s9827_s14   ;;  %s6108_s13 = sphi %s6182_s13, %s9826_s13  }
   0x9   : > { %s4999_s18 = sadd.s32 4294967294, %s6120_s16   ;;  %s6207_s19 = sadd.s32 1, %s6120_s16  }
   0xa   : > { %s247_s20 = sadd.s32 1, %s6116_s15  ;;  %s244_s21 = ssub.s32 %s6120_s16, %s6207_s19 }
   0xb   : > { %p257_p0 = scmp.ne.s32.totalorder %s6116_s15, %s6112_s14  ;;  %p245_p1 = scmp.eq.s32.totalorder %s244_s21, 0 }
   0xc   : > { %p258_p2 = scmp.eq.s32.totalorder %s6203_s17, 1  ;;  %p263_p3 = scmp.ne.s32.totalorder %s6112_s14, %s6108_s13 }
   0xd   : > { %p264_p4 = scmp.eq.s32.totalorder %s4999_s18, 1  ;;  %p5000_p7 = scmp.ge.s32.totalorder %s6120_s16, 1 }
   0xe   : > { %s6218_s22 = scalar_select %p245_p1, %s6116_s15, %s247_s20  }
   0xf   : > { %p6220_p5 = por %p258_p2, %p257_p0  ;;  %p6224_p6 = por %p264_p4, %p263_p3 }
  0x10   : > { %9583 = sst [smem:[#allocation13_spill]] %s6218_s22  ;;  %p271_p8 = scmp.lt.s32.totalorder %s6120_s16, 3 }
  0x11   : > { %p5888_p9 = scmp.eq.s32.totalorder %s6203_s17, 0  ;;  %s9587_s6 = sld [smem:[#allocation124_spill]] }
  0x12   : > { %p6231_p10 = pnand %p5000_p7, %p271_p8  ;;  %s9588_s5 = sld [smem:[#allocation123_spill]] }
  0x13   : > { %s6122_s18 = smov [#allocation5]   ;;  %s6123_s21 = smov 128  }
  0x14   : > { %p5874_p11 = pneg %p6231_p10  ;;  %s310_s20 = sshll.u32 %s6122_s18, 4  ;;  %s311_s20 = int_to_ptr.vmem [resolvable:$true] %s310_s20 }
  0x15   : > { %s6124_s26 = smov 8   ;;  %s6125_s27 = smov [#allocation2]  }
  0x16   : > { %p6245_p12 = pnand %p5888_p9, %p5874_p11  ;;  %s6126_s22 = smov [#allocation7]  }
  0x17   : > { %s308_s28 = sshll.u32 %s9587_s6, 4  ;;  %s296_s6 = sshll.u32 %s6125_s27, 4  ;;  %s309_s28 = int_to_ptr.hbm [resolvable:$true] %s308_s28  ;;  %s297_s6 = int_to_ptr.vmem [resolvable:$true] %s296_s6 }
  0x18   : > { %s294_s11 = sshll.u32 %s9588_s5, 4  ;;  %s329_s5 = sshll.u32 %s9576_s9, 4  ;;  %s295_s11 = int_to_ptr.hbm [resolvable:$true] %s294_s11  ;;  %s330_s5 = int_to_ptr.hbm [resolvable:$true] %s329_s5 }
  0x19   : > { %5880 = dma.hbm_to_vmem [thread:$0]  (!%p6245_p12), %s309_s28, 4096, %s311_s20, [#allocation6], %s6123_s21, %s6123_s21, %s6124_s26  }
  0x1a   : > { %5877 = dma.hbm_to_vmem [thread:$0]  (!%p6245_p12), %s295_s11, 512, %s297_s6, [#allocation3], %s6123_s21, %s6123_s21, %s6124_s26  }
  0x1b   : > { %s331_s15 = sshll.u32 %s6126_s22, 4  ;;  %353 = sbr.rel (%p6231_p10) target bundleno = 2723 (0xaa3), region = 60  ;;  %s332_s15 = int_to_ptr.vmem [resolvable:$true] %s331_s15 }
  0x1c   : > { %5883 = dma.hbm_to_vmem [thread:$0]  (!%p6245_p12), %s330_s5, 256, %s332_s15, [#allocation6]  }
  0x20   : > { %6095 = dma.done.wait (%p5888_p9), [#allocation3], 512  }
  0x21   : > { %6097 = vsyncadd (%p5888_p9), [#allocation3], 4294966784 }
  0x22   : > { %6099 = dma.done.wait (%p5888_p9), [#allocation6], 4352  }
  0x23   : > { %6101 = vsyncadd (%p5888_p9), [#allocation6], 4294962944  ;;  %s402_s6 = smul.u32 28, %s6203_s17  ;;  %v437_v24 = vld [vmem:[%s9568_s1 + $0x8] sm:$0xff]  ;;  %vm484_vm0 = vcmask 785408   ;;  %v436_v29 = vld [vmem:[%s9568_s1] sm:$0xff] }
  0x24   : > { %v439_v30 = vld [vmem:[%s9568_s1 + $0x18] sm:$0xff]  ;;  %v5037_v31 = vld [vmem:[%s9568_s1 + $0x190] sm:$0xff]  ;;  %v441_v33 = vld [vmem:[%s9568_s1 + $0x28] sm:$0xff]  ;;  %vm1124_vm1 = vcmask 1043456   ;;  %vm1051_vm2 = vcmask 228352   ;;  %vm3723_vm3 = vcmask 588800  }
  0x25   : > { %p403_p13 = scmp.lt.s32.totalorder %s402_s6, 55  ;;  %v438_v32 = vld [vmem:[%s9568_s1 + $0x10] sm:$0xff]  ;;  %v5039_v34 = vld [vmem:[%s9568_s1 + $0x1a0] sm:$0xff]  ;;  %v443_v36 = vld [vmem:[%s9568_s1 + $0x38] sm:$0xff]  ;;  %vm4636_vm4 = vcmask 261120   ;;  %vm4687_vm5 = vcmask 523264  }
  0x26   : > { %v440_v35 = vld [vmem:[%s9568_s1 + $0x20] sm:$0xff]  ;;  %v5041_v37 = vld [vmem:[%s9568_s1 + $0x1b0] sm:$0xff]  ;;  %v445_v39 = vld [vmem:[%s9568_s1 + $0x48] sm:$0xff]  ;;  %vm4828_vm6 = vcmask 982016   ;;  %vm4865_vm7 = vcmask 687104   ;;  %s399_s20 = sand.u32 1, %s6112_s14  }
  0x27   : > { %s9830_s6 = smov (!%p403_p13, %s402_s6), 55  ;;  %v442_v38 = vld [vmem:[%s9568_s1 + $0x30] sm:$0xff]  ;;  %v5043_v40 = vld [vmem:[%s9568_s1 + $0x1c0] sm:$0xff]  ;;  %v447_v42 = vld [vmem:[%s9568_s1 + $0x58] sm:$0xff]  ;;  %s5009_s21 = sshll.u32 %s399_s20, 3 }
  0x28   : > { %s5010_s5 = sshll.u32 %s9830_s6, 3  ;;  %v444_v41 = vld [vmem:[%s9568_s1 + $0x40] sm:$0xff]  ;;  %v5045_v43 = vld [vmem:[%s9568_s1 + $0x1d0] sm:$0xff]  ;;  %v449_v45 = vld [vmem:[%s9568_s1 + $0x68] sm:$0xff]  ;;  %s5841_s26 = sshll.u32 %s6203_s17, 3 }
  0x29   : > { %s6272_s25 = scalar_lea.vmem %s9567_s0, %s5010_s5  ;;  %v446_v44 = vld [vmem:[%s9568_s1 + $0x50] sm:$0xff]  ;;  %v5047_v46 = vld [vmem:[%s9568_s1 + $0x1e0] sm:$0xff]  ;;  %v451_v48 = vld [vmem:[%s9568_s1 + $0x78] sm:$0xff]  ;;  %s4904_s30 = scalar_lea.hbm %s9577_s10, %s5841_s26 }
  0x2a   : > { %v6275_v0 = vld [vmem:[%s6272_s25 + $0x78] sm:$0xff]  ;;  %v6281_v2 = vld [vmem:[%s6272_s25 + $0x70] sm:$0xff]  ;;  %v6290_v4 = vld [vmem:[%s6272_s25 + $0x68] sm:$0xff]  ;;  %s4908_s5 = sshll.u32 %s4904_s30, 4  ;;  %s4894_s15 = scalar_lea.sflag [#allocation4], %s399_s20  ;;  %s4909_s5 = int_to_ptr.hbm [resolvable:$true] %s4908_s5 }
  0x2b   : > { %v6278_v1 = vld [vmem:[%s6272_s25 + $0xd8] sm:$0xff]  ;;  %557 = vmatpush.msra.mxu0 %v6275_v0  ;;  %v6286_v3 = vld [vmem:[%s6272_s25 + $0xd0] sm:$0xff]  ;;  %5844 = vmatpush.msra.mxu2 %v6275_v0  ;;  %v6293_v5 = vld [vmem:[%s6272_s25 + $0xc8] sm:$0xff]  ;;  %s6064_s22 = sshra.s32 %s4909_s5, 4  ;;  %s6070_s12 = scalar_lea.hbm %s9577_s10, 16  ;;  %s6065_s22 = int_to_ptr.hbm [resolvable:$true] %s6064_s22 }
  0x2c   : > { %650 = vmatpush.msra.mxu1 %v6278_v1  ;;  %957 = vmatpush.msra.mxu3 %v6278_v1  ;;  %v6300_v6 = vld [vmem:[%s6272_s25 + $0x60] sm:$0xff]  ;;  %v6310_v8 = vld [vmem:[%s6272_s25 + $0x58] sm:$0xff]  ;;  %v6320_v10 = vld [vmem:[%s6272_s25 + $0x50] sm:$0xff]  ;;  %s6066_s28 = scalar_lea.hbm %s6065_s22, 8  ;;  %p6071_p3 = scmp.lt.s32.totalorder %s6065_s22, %s9577_s10 }
  0x2d   : > { %558 = vmatpush.msra.mxu0 %v6281_v2  ;;  %5845 = vmatpush.msra.mxu2 %v6281_v2  ;;  %v6303_v7 = vld [vmem:[%s6272_s25 + $0xc0] sm:$0xff]  ;;  %v6313_v9 = vld [vmem:[%s6272_s25 + $0xb8] sm:$0xff]  ;;  %v6323_v11 = vld [vmem:[%s6272_s25 + $0xb0] sm:$0xff]  ;;  %p6067_p0 = scmp.ne.s32.totalorder %s6065_s22, %s6066_s28  ;;  %p6072_p4 = scmp.lt.s32.totalorder %s6070_s12, %s6066_s28 }
  0x2e   : > { %651 = vmatpush.msra.mxu1 %v6286_v3  ;;  %958 = vmatpush.msra.mxu3 %v6286_v3  ;;  %v6330_v12 = vld [vmem:[%s6272_s25 + $0x48] sm:$0xff]  ;;  %v6340_v14 = vld [vmem:[%s6272_s25 + $0x40] sm:$0xff]  ;;  %v6350_v16 = vld [vmem:[%s6272_s25 + $0x38] sm:$0xff] }
  0x2f   : > { %559 = vmatpush.msra.mxu0 %v6290_v4  ;;  %5846 = vmatpush.msra.mxu2 %v6290_v4  ;;  %v6333_v13 = vld [vmem:[%s6272_s25 + $0xa8] sm:$0xff]  ;;  %v6343_v15 = vld [vmem:[%s6272_s25 + $0xa0] sm:$0xff]  ;;  %v6353_v17 = vld [vmem:[%s6272_s25 + $0x98] sm:$0xff]  ;;  %p6068_p1 = pnand %p6067_p0, %p6220_p5  ;;  %p6073_p7 = por %p6072_p4, %p6071_p3 }
  0x30   : > { %652 = vmatpush.msra.mxu1 %v6293_v5  ;;  %959 = vmatpush.msra.mxu3 %v6293_v5  ;;  %v6360_v18 = vld [vmem:[%s6272_s25 + $0x30] sm:$0xff]  ;;  %v6370_v20 = vld [vmem:[%s6272_s25 + $0x28] sm:$0xff]  ;;  %v6380_v22 = vld [vmem:[%s6272_s25 + $0x20] sm:$0xff] }
  0x31   : > { %560 = vmatpush.msra.mxu0 %v6300_v6  ;;  %5847 = vmatpush.msra.mxu2 %v6300_v6  ;;  %v6363_v19 = vld [vmem:[%s6272_s25 + $0x90] sm:$0xff]  ;;  %v6373_v21 = vld [vmem:[%s6272_s25 + $0x88] sm:$0xff]  ;;  %v6383_v23 = vld [vmem:[%s6272_s25 + $0x80] sm:$0xff]  ;;  %p6069_p2 = pneg %p6068_p1 }
  0x32   : > { %653 = vmatpush.msra.mxu1 %v6303_v7  ;;  %960 = vmatpush.msra.mxu3 %v6303_v7  ;;  %v6393_v25 = vld [vmem:[%s6272_s25 + $0x18] sm:$0xff]  ;;  %v6401_v26 = vld [vmem:[%s6272_s25 + $0x10] sm:$0xff]  ;;  %v6407_v27 = vld [vmem:[%s6272_s25 + $0x8] sm:$0xff] }
  0x33   : > { %561 = vmatpush.msra.mxu0 %v6310_v8  ;;  %5848 = vmatpush.msra.mxu2 %v6310_v8  ;;  %v6413_v28 = vld [vmem:[%s6272_s25] sm:$0xff]  ;;  %v5049_v49 = vld [vmem:[%s9568_s1 + $0x1f0] sm:$0xff]  ;;  %v453_v51 = vld [vmem:[%s9568_s1 + $0x88] sm:$0xff]  ;;  %p6074_p8 = pnand %p6073_p7, %p6069_p2 }
  0x34   : > { %654 = vmatpush.msra.mxu1 %v6313_v9  ;;  %961 = vmatpush.msra.mxu3 %v6313_v9  ;;  %v448_v47 = vld [vmem:[%s9568_s1 + $0x60] sm:$0xff]  ;;  %v450_v50 = vld [vmem:[%s9568_s1 + $0x70] sm:$0xff]  ;;  %v455_v54 = vld [vmem:[%s9568_s1 + $0x98] sm:$0xff] }
  0x35   : > { %562 = vmatpush.msra.mxu0 %v6320_v10  ;;  %5849 = vmatpush.msra.mxu2 %v6320_v10  ;;  %v5051_v52 = vld [vmem:[%s9568_s1 + $0x200] sm:$0xff]  ;;  %v5053_v55 = vld [vmem:[%s9568_s1 + $0x210] sm:$0xff]  ;;  %v457_v57 = vld [vmem:[%s9568_s1 + $0xa8] sm:$0xff] }
  0x36   : > { %655 = vmatpush.msra.mxu1 %v6323_v11  ;;  %962 = vmatpush.msra.mxu3 %v6323_v11  ;;  %v452_v53 = vld [vmem:[%s9568_s1 + $0x80] sm:$0xff]  ;;  %v454_v56 = vld [vmem:[%s9568_s1 + $0x90] sm:$0xff]  ;;  %v459_v60 = vld [vmem:[%s9568_s1 + $0xb8] sm:$0xff] }
  0x37   : > { %563 = vmatpush.msra.mxu0 %v6330_v12  ;;  %5850 = vmatpush.msra.mxu2 %v6330_v12  ;;  %v5055_v58 = vld [vmem:[%s9568_s1 + $0x220] sm:$0xff]  ;;  %v5057_v61 = vld [vmem:[%s9568_s1 + $0x230] sm:$0xff]  ;;  %v461_v63 = vld [vmem:[%s9568_s1 + $0xc8] sm:$0xff] }
  0x38   : > { %656 = vmatpush.msra.mxu1 %v6333_v13  ;;  %963 = vmatpush.msra.mxu3 %v6333_v13  ;;  %v456_v59 = vld [vmem:[%s9568_s1 + $0xa0] sm:$0xff]  ;;  %v458_v62 = vld [vmem:[%s9568_s1 + $0xb0] sm:$0xff] }
  0x39   : > { %564 = vmatpush.msra.mxu0 %v6340_v14  ;;  %5851 = vmatpush.msra.mxu2 %v6340_v14 }
  0x3a   : > { %657 = vmatpush.msra.mxu1 %v6343_v15  ;;  %964 = vmatpush.msra.mxu3 %v6343_v15 }
  0x3b   : > { %565 = vmatpush.msra.mxu0 %v6350_v16  ;;  %5852 = vmatpush.msra.mxu2 %v6350_v16 }
  0x3c   : > { %658 = vmatpush.msra.mxu1 %v6353_v17  ;;  %965 = vmatpush.msra.mxu3 %v6353_v17 }
  0x3d   : > { %566 = vmatpush.msra.mxu0 %v6360_v18  ;;  %5853 = vmatpush.msra.mxu2 %v6360_v18 }
  0x3e   : > { %659 = vmatpush.msra.mxu1 %v6363_v19  ;;  %966 = vmatpush.msra.mxu3 %v6363_v19 }
  0x3f   : > { %567 = vmatpush.msra.mxu0 %v6370_v20  ;;  %5854 = vmatpush.msra.mxu2 %v6370_v20 }
  0x40   : > { %660 = vmatpush.msra.mxu1 %v6373_v21  ;;  %967 = vmatpush.msra.mxu3 %v6373_v21 }
  0x41   : > { %568 = vmatpush.msra.mxu0 %v6380_v22  ;;  %5855 = vmatpush.msra.mxu2 %v6380_v22 }
  0x42   : > { %661 = vmatpush.msra.mxu1 %v6383_v23  ;;  %968 = vmatpush.msra.mxu3 %v6383_v23 }
  0x43   : > { %5011 = vmatmul.msk.f32.vlgmr.msra.gmra.mxu1 %vm484_vm0, %v437_v24  ;;  %569 = vmatpush.msra.mxu0 %v6393_v25  ;;  %v5059_v24 = vld [vmem:[%s9568_s1 + $0x240] sm:$0xff] }
  0x44   : > { %5856 = vmatpush.msra.mxu2 %v6393_v25  ;;  %864 = vmatpush.msrb.mxu1 %v6275_v0 }
  0x45   : > { %570 = vmatpush.msra.mxu0 %v6401_v26 }
  0x46   : > { %5857 = vmatpush.msra.mxu2 %v6401_v26  ;;  %865 = vmatpush.msrb.mxu1 %v6281_v2 }
  0x47   : > { %571 = vmatpush.msra.mxu0 %v6407_v27 }
  0x48   : > { %5858 = vmatpush.msra.mxu2 %v6407_v27  ;;  %866 = vmatpush.msrb.mxu1 %v6290_v4 }
  0x49   : > { %572 = vmatpush.msra.mxu0 %v6413_v28 }
  0x4a   : > { %5859 = vmatpush.msra.mxu2 %v6413_v28  ;;  %573 = vmatmul.f32.vlgmr.msra.gmra.mxu0 %v436_v29  ;;  %v5036_v29 = vld [vmem:[%s9568_s1 + $0x188] sm:$0xff] }
  0x4b   : > { %5012 = vmatmul.msk.f32.gmra.mxu1 %vm484_vm0, %v439_v30  ;;  %883 = vmatmul.f32.vlgmr.msra.gmra.mxu2 %v5037_v31  ;;  %v460_v30 = vld [vmem:[%s9568_s1 + $0xc0] sm:$0xff]  ;;  %v463_v31 = vld [vmem:[%s9568_s1 + $0xd8] sm:$0xff] }
  0x4c   : > { %867 = vmatpush.msrb.mxu1 %v6300_v6  ;;  %5083 = vmatmul.msk.f32.vlgmr.msra.gmra.mxu3 %vm484_vm0, %v5036_v29  ;;  %v740_v29 = vld [vmem:[%s9569_s2 + $0x28] sm:$0xff] }
  0x4e   : > { %868 = vmatpush.msrb.mxu1 %v6310_v8 }
  0x50   : > { %869 = vmatpush.msrb.mxu1 %v6320_v10 }
  0x52   : > { %576 = vmatmul.f32.gmra.mxu0 %v438_v32  ;;  %870 = vmatpush.msrb.mxu1 %v6330_v12  ;;  %v5061_v32 = vld [vmem:[%s9568_s1 + $0x250] sm:$0xff] }
  0x53   : > { %5013 = vmatmul.msk.f32.gmra.mxu1 %vm484_vm0, %v441_v33  ;;  %886 = vmatmul.f32.gmra.mxu2 %v5039_v34  ;;  %v5038_v33 = vld [vmem:[%s9568_s1 + $0x198] sm:$0xff]  ;;  %v462_v34 = vld [vmem:[%s9568_s1 + $0xd0] sm:$0xff] }
  0x54   : > { %871 = vmatpush.msrb.mxu1 %v6340_v14  ;;  %5084 = vmatmul.msk.f32.gmra.mxu3 %vm484_vm0, %v5038_v33 }
  0x56   : > { %872 = vmatpush.msrb.mxu1 %v6350_v16 }
  0x58   : > { %873 = vmatpush.msrb.mxu1 %v6360_v18 }
  0x5a   : > { %579 = vmatmul.f32.gmra.mxu0 %v440_v35  ;;  %874 = vmatpush.msrb.mxu1 %v6370_v20  ;;  %v465_v35 = vld [vmem:[%s9568_s1 + $0xe8] sm:$0xff] }
  0x5b   : > { %5014 = vmatmul.msk.f32.gmra.mxu1 %vm484_vm0, %v443_v36  ;;  %889 = vmatmul.f32.gmra.mxu2 %v5041_v37  ;;  %v5063_v36 = vld [vmem:[%s9568_s1 + $0x260] sm:$0xff]  ;;  %v5040_v37 = vld [vmem:[%s9568_s1 + $0x1a8] sm:$0xff] }
  0x5c   : > { %875 = vmatpush.msrb.mxu1 %v6380_v22  ;;  %5085 = vmatmul.msk.f32.gmra.mxu3 %vm484_vm0, %v5040_v37  ;;  %v5052_v37 = vld [vmem:[%s9568_s1 + $0x208] sm:$0xff] }
  0x5e   : > { %876 = vmatpush.msrb.mxu1 %v6393_v25 }
  0x60   : > { %877 = vmatpush.msrb.mxu1 %v6401_v26 }
  0x62   : > { %582 = vmatmul.f32.gmra.mxu0 %v442_v38  ;;  %878 = vmatpush.msrb.mxu1 %v6407_v27  ;;  %v464_v38 = vld [vmem:[%s9568_s1 + $0xe0] sm:$0xff] }
  0x63   : > { %5015 = vmatmul.msk.f32.gmra.mxu1 %vm484_vm0, %v445_v39  ;;  %892 = vmatmul.f32.gmra.mxu2 %v5043_v40  ;;  %v467_v39 = vld [vmem:[%s9568_s1 + $0xf8] sm:$0xff]  ;;  %v5065_v40 = vld [vmem:[%s9568_s1 + $0x270] sm:$0xff] }
  0x64   : > { %879 = vmatpush.msrb.mxu1 %v6413_v28 }
  0x6a   : > { %585 = vmatmul.f32.gmra.mxu0 %v444_v41  ;;  %v5042_v41 = vld [vmem:[%s9568_s1 + $0x1b8] sm:$0xff] }
  0x6b   : > { %5016 = vmatmul.msk.f32.gmra.mxu1 %vm484_vm0, %v447_v42  ;;  %895 = vmatmul.f32.gmra.mxu2 %v5045_v43  ;;  %v466_v43 = vld [vmem:[%s9568_s1 + $0xf0] sm:$0xff] }
  0x6c   : > { %5086 = vmatmul.msk.f32.gmra.mxu3 %vm484_vm0, %v5042_v41  ;;  %v476_v41 = vld [vmem:[%s9568_s1 + $0x140] sm:$0xff] }
  0x72   : > { %588 = vmatmul.f32.gmra.mxu0 %v446_v44  ;;  %v469_v44 = vld [vmem:[%s9568_s1 + $0x108] sm:$0xff] }
  0x73   : > { %5017 = vmatmul.msk.f32.gmra.mxu1 %vm484_vm0, %v449_v45  ;;  %898 = vmatmul.f32.gmra.mxu2 %v5047_v46  ;;  %v5067_v45 = vld [vmem:[%s9568_s1 + $0x280] sm:$0xff]  ;;  %v5044_v46 = vld [vmem:[%s9568_s1 + $0x1c8] sm:$0xff] }
  0x74   : > { %5087 = vmatmul.msk.f32.gmra.mxu3 %vm484_vm0, %v5044_v46  ;;  %v5077_v46 = vld [vmem:[%s9568_s1 + $0x2d0] sm:$0xff] }
  0x7a   : > { %591 = vmatmul.f32.gmra.mxu0 %v448_v47  ;;  %v468_v47 = vld [vmem:[%s9568_s1 + $0x100] sm:$0xff] }
  0x7b   : > { %5018 = vmatmul.msk.f32.gmra.mxu1 %vm484_vm0, %v451_v48  ;;  %901 = vmatmul.f32.gmra.mxu2 %v5049_v49  ;;  %v471_v49 = vld [vmem:[%s9568_s1 + $0x118] sm:$0xff] }
  0x82   : > { %594 = vmatmul.f32.gmra.mxu0 %v450_v50  ;;  %v5069_v50 = vld [vmem:[%s9568_s1 + $0x290] sm:$0xff] }
  0x83   : > { %5019 = vmatmul.msk.f32.gmra.mxu1 %vm484_vm0, %v453_v51  ;;  %904 = vmatmul.f32.gmra.mxu2 %v5051_v52  ;;  %v5046_v51 = vld [vmem:[%s9568_s1 + $0x1d8] sm:$0xff]  ;;  %v470_v52 = vld [vmem:[%s9568_s1 + $0x110] sm:$0xff] }
  0x84   : > { %5088 = vmatmul.msk.f32.gmra.mxu3 %vm484_vm0, %v5046_v51 }
  0x8a   : > { %597 = vmatmul.f32.gmra.mxu0 %v452_v53 }
  0x8b   : > { %5020 = vmatmul.msk.f32.gmra.mxu1 %vm484_vm0, %v455_v54  ;;  %907 = vmatmul.f32.gmra.mxu2 %v5053_v55  ;;  %v473_v54 = vld [vmem:[%s9568_s1 + $0x128] sm:$0xff]  ;;  %v5071_v55 = vld [vmem:[%s9568_s1 + $0x2a0] sm:$0xff] }
  0x92   : > { %600 = vmatmul.f32.gmra.mxu0 %v454_v56 }
  0x93   : > { %5021 = vmatmul.msk.f32.gmra.mxu1 %vm484_vm0, %v457_v57  ;;  %910 = vmatmul.f32.gmra.mxu2 %v5055_v58  ;;  %v5048_v57 = vld [vmem:[%s9568_s1 + $0x1e8] sm:$0xff]  ;;  %v472_v58 = vld [vmem:[%s9568_s1 + $0x120] sm:$0xff] }
  0x94   : > { %5089 = vmatmul.msk.f32.gmra.mxu3 %vm484_vm0, %v5048_v57  ;;  %v5079_v57 = vld [vmem:[%s9568_s1 + $0x2e0] sm:$0xff] }
  0x9a   : > { %603 = vmatmul.f32.gmra.mxu0 %v456_v59 }
  0x9b   : > { %5022 = vmatmul.msk.f32.gmra.mxu1 %vm484_vm0, %v459_v60  ;;  %913 = vmatmul.f32.gmra.mxu2 %v5057_v61  ;;  %v475_v60 = vld [vmem:[%s9568_s1 + $0x138] sm:$0xff]  ;;  %v5073_v61 = vld [vmem:[%s9568_s1 + $0x2b0] sm:$0xff] }
  0xa2   : > { %606 = vmatmul.f32.gmra.mxu0 %v458_v62  ;;  %v5050_v62 = vld [vmem:[%s9568_s1 + $0x1f8] sm:$0xff] }
  0xa3   : > { %5023 = vmatmul.msk.f32.gmra.mxu1 %vm484_vm0, %v461_v63  ;;  %916 = vmatmul.f32.gmra.mxu2 %v5059_v24  ;;  %v742_v24 = vld [vmem:[%s9569_s2 + $0x38] sm:$0xf] }
  0xa4   : > { %5090 = vmatmul.msk.f32.gmra.mxu3 %vm484_vm0, %v5050_v62  ;;  %5190 = vmatpush.msk.msrb.mxu2 %vm1124_vm1, %v742_v24  ;;  %v483_v24 = vld [vmem:[%s9568_s1 + $0x178] sm:$0xff] }
  0xa6   : > { %1489 = vmatpush.msrb.mxu2 %v740_v29  ;;  %v5081_v29 = vld [vmem:[%s9568_s1 + $0x2f0] sm:$0xff] }
  0xaa   : > { %609 = vmatmul.f32.gmra.mxu0 %v460_v30  ;;  %v474_v30 = vld [vmem:[%s9568_s1 + $0x130] sm:$0xff] }
  0xab   : > { %5024 = vmatmul.msk.f32.gmra.mxu1 %vm484_vm0, %v463_v31  ;;  %919 = vmatmul.f32.gmra.mxu2 %v5061_v32  ;;  %v738_v31 = vld [vmem:[%s9569_s2 + $0x18] sm:$0xff] }
  0xac   : > { %1490 = vmatpush.msrb.mxu2 %v738_v31  ;;  %5091 = vmatmul.msk.f32.gmra.mxu3 %vm484_vm0, %v5052_v37  ;;  %v5058_v31 = vld [vmem:[%s9568_s1 + $0x238] sm:$0xff]  ;;  %v5035_v37 = vld [vmem:[%s9568_s1 + $0x180] sm:$0xff] }
  0xb2   : > { %612 = vmatmul.f32.gmra.mxu0 %v462_v34  ;;  %v477_v34 = vld [vmem:[%s9568_s1 + $0x148] sm:$0xff] }
  0xb3   : > { %5025 = vmatmul.msk.f32.gmra.mxu1 %vm484_vm0, %v465_v35  ;;  %922 = vmatmul.f32.gmra.mxu2 %v5063_v36  ;;  %v5075_v35 = vld [vmem:[%s9568_s1 + $0x2c0] sm:$0xff]  ;;  %v736_v36 = vld [vmem:[%s9569_s2 + $0x8] sm:$0xff] }
  0xb4   : > { %1491 = vmatpush.msrb.mxu2 %v736_v36 }
  0xba   : > { %615 = vmatmul.f32.gmra.mxu0 %v464_v38  ;;  %v741_v38 = vld [vmem:[%s9569_s2 + $0x30] sm:$0xf] }
  0xbb   : > { %5026 = vmatmul.msk.f32.gmra.mxu1 %vm484_vm0, %v467_v39  ;;  %925 = vmatmul.f32.gmra.mxu2 %v5065_v40  ;;  %v739_v40 = vld [vmem:[%s9569_s2 + $0x20] sm:$0xff] }
  0xbc   : > { %5165 = vmatpush.msk.msrb.mxu0 %vm1124_vm1, %v741_v38 }
  0xbe   : > { %1400 = vmatpush.msrb.mxu0 %v739_v40  ;;  %v5060_v40 = vld [vmem:[%s9568_s1 + $0x248] sm:$0xff] }
  0xc0   : > { %v6600_v42 = vpop.f32.mrf.mxu1 }
  0xc2   : > { %618 = vmatmul.f32.gmra.mxu0 %v466_v43  ;;  %v737_v43 = vld [vmem:[%s9569_s2 + $0x10] sm:$0xff] }
  0xc3   : > { %5027 = vmatmul.msk.f32.gmra.mxu1 %vm484_vm0, %v469_v44  ;;  %928 = vmatmul.f32.gmra.mxu2 %v5067_v45  ;;  %v479_v45 = vld [vmem:[%s9568_s1 + $0x158] sm:$0xff] }
  0xc4   : > { %1401 = vmatpush.msrb.mxu0 %v737_v43 }
  0xc7   : > { %v6643_v56 = vpop.f32.mrf.mxu0 }
  0xc8   : > { %v6619_v48 = vpop.f32.mrf.mxu1  ;;  %v664_v38 = vadd.f32 %v6600_v42, %v6643_v56  ;;  %v5062_v42 = vld [vmem:[%s9568_s1 + $0x258] sm:$0xff] }
  0xca   : > { %621 = vmatmul.f32.gmra.mxu0 %v468_v47  ;;  %v735_v47 = vld [vmem:[%s9569_s2] sm:$0xff] }
  0xcb   : > { %5028 = vmatmul.msk.f32.gmra.mxu1 %vm484_vm0, %v471_v49  ;;  %931 = vmatmul.f32.gmra.mxu2 %v5069_v50  ;;  %v5054_v49 = vld [vmem:[%s9568_s1 + $0x218] sm:$0xff] }
  0xcc   : > { %1402 = vmatpush.msrb.mxu0 %v735_v47  ;;  %5092 = vmatmul.msk.f32.gmra.mxu3 %vm484_vm0, %v5054_v49 }
  0xce   : > { %v6681_v32 = vpop.f32.mrf.mxu2 }
  0xcf   : > { %v6664_v63 = vpop.f32.mrf.mxu0 }
  0xd0   : > { %v6635_v53 = vpop.f32.mrf.mxu1 }
  0xd2   : > { %624 = vmatmul.f32.gmra.mxu0 %v470_v52  ;;  %v478_v52 = vld [vmem:[%s9568_s1 + $0x150] sm:$0xff] }
  0xd3   : > { %5029 = vmatmul.msk.f32.gmra.mxu1 %vm484_vm0, %v473_v54  ;;  %934 = vmatmul.f32.gmra.mxu2 %v5071_v55  ;;  %v481_v55 = vld [vmem:[%s9568_s1 + $0x168] sm:$0xff] }
  0xd6   : > { %v6726_v50 = vpop.f32.mrf.mxu2 }
  0xd7   : > { %v580_v39 = vpop.f32.mrf.mxu0 }
  0xd8   : > { %v6653_v59 = vpop.f32.mrf.mxu1  ;;  %v670_v49 = vadd.f32 %v6635_v53, %v580_v39  ;;  %v5066_v53 = vld [vmem:[%s9568_s1 + $0x278] sm:$0xff] }
  0xda   : > { %627 = vmatmul.f32.gmra.mxu0 %v472_v58  ;;  %v5056_v58 = vld [vmem:[%s9568_s1 + $0x228] sm:$0xff] }
  0xdb   : > { %5030 = vmatmul.msk.f32.gmra.mxu1 %vm484_vm0, %v475_v60  ;;  %937 = vmatmul.f32.gmra.mxu2 %v5073_v61  ;;  %v480_v61 = vld [vmem:[%s9568_s1 + $0x160] sm:$0xff] }
  0xdc   : > { %5093 = vmatmul.msk.f32.gmra.mxu3 %vm484_vm0, %v5056_v58 }
  0xde   : > { %v6745_v60 = vpop.f32.mrf.mxu2 }
  0xdf   : > { %v583_v51 = vpop.f32.mrf.mxu0 }
  0xe0   : > { %v6683_v33 = vpop.f32.mrf.mxu1 }
  0xe2   : > { %630 = vmatmul.f32.gmra.mxu0 %v474_v30 }
  0xe3   : > { %5031 = vmatmul.msk.f32.gmra.mxu1 %vm484_vm0, %v477_v34  ;;  %940 = vmatmul.f32.gmra.mxu2 %v5075_v35  ;;  %v482_v35 = vld [vmem:[%s9568_s1 + $0x170] sm:$0xff] }
  0xe4   : > { %5094 = vmatmul.msk.f32.gmra.mxu3 %vm484_vm0, %v5058_v31 }
  0xe6   : > { %v6764_v34 = vpop.f32.mrf.mxu2 }
  0xe7   : > { %v586_v30 = vpop.f32.mrf.mxu0 }
  0xe8   : > { %v6712_v44 = vpop.f32.mrf.mxu1 }
  0xea   : > { %633 = vmatmul.f32.gmra.mxu0 %v476_v41 }
  0xeb   : > { %5032 = vmatmul.msk.f32.gmra.mxu1 %vm484_vm0, %v479_v45  ;;  %943 = vmatmul.f32.gmra.mxu2 %v5077_v46  ;;  %v667_v46 = vadd.f32 %v6619_v48, %v6664_v63 }
  0xec   : > { %5095 = vmatmul.msk.f32.gmra.mxu3 %vm484_vm0, %v5060_v40 }
  0xee   : > { %v6781_v43 = vpop.f32.mrf.mxu2 }
  0xef   : > { %v589_v41 = vpop.f32.mrf.mxu0 }
  0xf0   : > { %v6733_v54 = vpop.f32.mrf.mxu1 }
  0xf2   : > { %636 = vmatmul.f32.gmra.mxu0 %v478_v52  ;;  %v5064_v52 = vld [vmem:[%s9568_s1 + $0x268] sm:$0xff] }
  0xf3   : > { %5033 = vmatmul.msk.f32.gmra.mxu1 %vm484_vm0, %v481_v55  ;;  %946 = vmatmul.f32.gmra.mxu2 %v5079_v57  ;;  %v673_v57 = vadd.f32 %v6653_v59, %v583_v51  ;;  %v5068_v59 = vld [vmem:[%s9568_s1 + $0x288] sm:$0xff] }
  0xf4   : > { %5096 = vmatmul.msk.f32.gmra.mxu3 %vm484_vm0, %v5062_v42 }
  0xf6   : > { %v6799_v48 = vpop.f32.mrf.mxu2 }
  0xf7   : > { %v592_v56 = vpop.f32.mrf.mxu0 }
  0xf8   : > { %v6751_v62 = vpop.f32.mrf.mxu1 }
  0xfa   : > { %639 = vmatmul.f32.gmra.mxu0 %v480_v61  ;;  %v676_v61 = vadd.f32 %v6683_v33, %v586_v30  ;;  %v5070_v33 = vld [vmem:[%s9568_s1 + $0x298] sm:$0xff] }
  0xfb   : > { %5034 = vmatmul.msk.f32.gmra.mxu1 %vm484_vm0, %v483_v24  ;;  %949 = vmatmul.f32.gmra.mxu2 %v5081_v29  ;;  %v6826_v29 = vpop.f32.mrf.mxu3 }
  0xfc   : > { %5097 = vmatmul.msk.f32.gmra.mxu3 %vm484_vm0, %v5064_v52 }
  0xfe   : > { %v6812_v39 = vpop.f32.mrf.mxu2 }
  0xff   : > { %v595_v63 = vpop.f32.mrf.mxu0 }
 0x100   : > { %v6769_v36 = vpop.f32.mrf.mxu1  ;;  %v685_v52 = vadd.f32 %v6751_v62, %v595_v63  ;;  %v5076_v62 = vld [vmem:[%s9568_s1 + $0x2c8] sm:$0xff] }
 0x102   : > { %642 = vmatmul.f32.gmra.mxu0 %v482_v35  ;;  %v679_v35 = vadd.f32 %v6712_v44, %v589_v41  ;;  %v5072_v44 = vld [vmem:[%s9568_s1 + $0x2a8] sm:$0xff] }
 0x103   : > { %880 = vmatmul.f32.vlgmr.msrb.gmra.mxu1 %v5035_v37  ;;  %5191 = vmatmul.msk.f32.vlgmr.msrb.gmra.mxu2 %vm1051_vm2, %v664_v38  ;;  %v6837_v37 = vpop.f32.mrf.mxu3 }
 0x104   : > { %5098 = vmatmul.msk.f32.gmra.mxu3 %vm484_vm0, %v5066_v53 }
 0x106   : > { %v6824_v51 = vpop.f32.mrf.mxu2 }
 0x107   : > { %v598_v24 = vpop.f32.mrf.mxu0 }
 0x108   : > { %v6783_v45 = vpop.f32.mrf.mxu1 }
 0x10a   : > { %5166 = vmatmul.msk.f32.vlgmr.msrb.gmra.mxu0 %vm1051_vm2, %v664_v38 }
 0x10b   : > { %5192 = vmatmul.msk.f32.gmra.mxu2 %vm1051_vm2, %v667_v46  ;;  %v6850_v42 = vpop.f32.mrf.mxu3 }
 0x10c   : > { %5099 = vmatmul.msk.f32.gmra.mxu3 %vm484_vm0, %v5068_v59  ;;  %v688_v59 = vadd.f32 %v6769_v36, %v598_v24  ;;  %v5078_v36 = vld [vmem:[%s9568_s1 + $0x2d8] sm:$0xff] }
 0x10d   : > { %v5114_v24 = vld [vmem:[%s9569_s2 + $0x78] sm:$0xf] }
 0x10e   : > { %v6839_v38 = vpop.f32.mrf.mxu2  ;;  %5140 = vmatpush.msk.msrb.mxu3 %vm1124_vm1, %v5114_v24 }
 0x10f   : > { %v601_v30 = vpop.f32.mrf.mxu0 }
 0x110   : > { %v6793_v47 = vpop.f32.mrf.mxu1 }
 0x112   : > { %5167 = vmatmul.msk.f32.gmra.mxu0 %vm1051_vm2, %v667_v46  ;;  %v682_v46 = vadd.f32 %v6733_v54, %v592_v56  ;;  %v5074_v54 = vld [vmem:[%s9568_s1 + $0x2b8] sm:$0xff] }
 0x113   : > { %5193 = vmatmul.msk.f32.gmra.mxu2 %vm1051_vm2, %v670_v49  ;;  %v6863_v53 = vpop.f32.mrf.mxu3 }
 0x114   : > { %5100 = vmatmul.msk.f32.gmra.mxu3 %vm484_vm0, %v5070_v33 }
 0x116   : > { %v6858_v56 = vpop.f32.mrf.mxu2 }
 0x117   : > { %v604_v41 = vpop.f32.mrf.mxu0  ;;  %9590 = vst [vmem:[#allocation14_spill] sm:$0xff] %v6858_v56 }
 0x118   : > { %v6804_v55 = vpop.f32.mrf.mxu1 }
 0x11a   : > { %5168 = vmatmul.msk.f32.gmra.mxu0 %vm1051_vm2, %v670_v49 }
 0x11b   : > { %5194 = vmatmul.msk.f32.gmra.mxu2 %vm1051_vm2, %v673_v57 }
 0x11c   : > { %5101 = vmatmul.msk.f32.gmra.mxu3 %vm484_vm0, %v5072_v44 }
 0x11e   : > { %v6873_v63 = vpop.f32.mrf.mxu2 }
 0x11f   : > { %9591 = vst [vmem:[#allocation15_spill] sm:$0xff] %v6873_v63 }
 0x120   : > { %v6815_v58 = vpop.f32.mrf.mxu1 }
 0x122   : > { %5169 = vmatmul.msk.f32.gmra.mxu0 %vm1051_vm2, %v673_v57  ;;  %v607_v57 = vpop.f32.mrf.mxu0 }
 0x123   : > { %5195 = vmatmul.msk.f32.gmra.mxu2 %vm1051_vm2, %v676_v61  ;;  %v697_v63 = vadd.f32 %v6804_v55, %v607_v57  ;;  %v5111_v55 = vld [vmem:[%s9569_s2 + $0x60] sm:$0xff]  ;;  %v5112_v57 = vld [vmem:[%s9569_s2 + $0x68] sm:$0xff] }
 0x124   : > { %5102 = vmatmul.msk.f32.gmra.mxu3 %vm484_vm0, %v5074_v54  ;;  %v694_v54 = vadd.f32 %v6793_v47, %v604_v41  ;;  %v5082_v47 = vld [vmem:[%s9568_s1 + $0x2f8] sm:$0xff]  ;;  %v5113_v41 = vld [vmem:[%s9569_s2 + $0x70] sm:$0xf] }
 0x125   : > { %5115 = vmatpush.msk.msra.mxu1 %vm1124_vm1, %v5113_v41  ;;  %1233 = vmatpush.msrb.mxu3 %v5112_v57  ;;  %v5108_v57 = vld [vmem:[%s9569_s2 + $0x48] sm:$0xff] }
 0x127   : > { %1144 = vmatpush.msra.mxu1 %v5111_v55  ;;  %v5107_v55 = vld [vmem:[%s9569_s2 + $0x40] sm:$0xff] }
 0x128   : > { %v6828_v31 = vpop.f32.mrf.mxu1 }
 0x12a   : > { %5170 = vmatmul.msk.f32.gmra.mxu0 %vm1051_vm2, %v676_v61  ;;  %v610_v44 = vpop.f32.mrf.mxu0 }
 0x12b   : > { %5196 = vmatmul.msk.f32.gmra.mxu2 %vm1051_vm2, %v679_v35 }
 0x12c   : > { %5103 = vmatmul.msk.f32.gmra.mxu3 %vm484_vm0, %v5076_v62 }
 0x130   : > { %v6841_v40 = vpop.f32.mrf.mxu1 }
 0x132   : > { %5171 = vmatmul.msk.f32.gmra.mxu0 %vm1051_vm2, %v679_v35  ;;  %v6876_v35 = vpop.f32.mrf.mxu3  ;;  %v613_v62 = vpop.f32.mrf.mxu0 }
 0x133   : > { %5197 = vmatmul.msk.f32.gmra.mxu2 %vm1051_vm2, %v682_v46 }
 0x134   : > { %5104 = vmatmul.msk.f32.gmra.mxu3 %vm484_vm0, %v5078_v36 }
 0x138   : > { %v6852_v49 = vpop.f32.mrf.mxu1 }
 0x13a   : > { %5172 = vmatmul.msk.f32.gmra.mxu0 %vm1051_vm2, %v682_v46  ;;  %v691_v46 = vadd.f32 %v6783_v45, %v601_v30  ;;  %v6893_v45 = vpop.f32.mrf.mxu3 }
 0x13b   : > { %5198 = vmatmul.msk.f32.gmra.mxu2 %vm1051_vm2, %v685_v52 }
 0x140   : > { %v6865_v61 = vpop.f32.mrf.mxu1 }
 0x142   : > { %5173 = vmatmul.msk.f32.gmra.mxu0 %vm1051_vm2, %v685_v52  ;;  %v6891_v52 = vpop.f32.mrf.mxu2  ;;  %v6904_v36 = vpop.f32.mrf.mxu3 }
 0x143   : > { %5199 = vmatmul.msk.f32.gmra.mxu2 %vm1051_vm2, %v688_v59  ;;  %9592 = vst [vmem:[#allocation16_spill] sm:$0xff] %v6891_v52 }
 0x148   : > { %v6878_v33 = vpop.f32.mrf.mxu1 }
 0x14a   : > { %5174 = vmatmul.msk.f32.gmra.mxu0 %vm1051_vm2, %v688_v59  ;;  %v5080_v59 = vld [vmem:[%s9568_s1 + $0x2e8] sm:$0xff]  ;;  %v6906_v24 = vpop.f32.mrf.mxu2 }
 0x14b   : > { %5200 = vmatmul.msk.f32.gmra.mxu2 %vm1051_vm2, %v691_v46  ;;  %5105 = vmatmul.msk.f32.gmra.mxu3 %vm484_vm0, %v5080_v59  ;;  %9593 = vst [vmem:[#allocation17_spill] sm:$0xff] %v6906_v24  ;;  %v5109_v59 = vld [vmem:[%s9569_s2 + $0x50] sm:$0xff]  ;;  %v700_v24 = vadd.f32 %v6815_v58, %v610_v44 }
 0x14c   : > { %1145 = vmatpush.msra.mxu1 %v5109_v59 }
 0x14e   : > { %1146 = vmatpush.msra.mxu1 %v5107_v55 }
 0x150   : > { %v6895_v30 = vpop.f32.mrf.mxu1  ;;  %1686 = vmatpush.msrb.mxu1 %v6275_v0 }
 0x152   : > { %5175 = vmatmul.msk.f32.gmra.mxu0 %vm1051_vm2, %v691_v46  ;;  %v616_v46 = vpop.f32.mrf.mxu0  ;;  %v6944_v56 = vpop.f32.mrf.mxu2  ;;  %1687 = vmatpush.msrb.mxu1 %v6281_v2 }
 0x153   : > { %5201 = vmatmul.msk.f32.gmra.mxu2 %vm1051_vm2, %v694_v54  ;;  %5106 = vmatmul.msk.f32.gmra.mxu3 %vm484_vm0, %v5082_v47  ;;  %v5110_v47 = vld [vmem:[%s9569_s2 + $0x58] sm:$0xff]  ;;  %9594 = vst [vmem:[#allocation18_spill] sm:$0xff] %v6944_v56 }
 0x154   : > { %1234 = vmatpush.msrb.mxu3 %v5110_v47  ;;  %1688 = vmatpush.msrb.mxu1 %v6290_v4 }
 0x156   : > { %1235 = vmatpush.msrb.mxu3 %v5108_v57  ;;  %1689 = vmatpush.msrb.mxu1 %v6300_v6 }
 0x158   : > { %v6908_v52 = vpop.f32.mrf.mxu1  ;;  %1779 = vmatpush.msra.mxu3 %v6278_v1  ;;  %1690 = vmatpush.msrb.mxu1 %v6310_v8 }
 0x15a   : > { %5176 = vmatmul.msk.f32.gmra.mxu0 %vm1051_vm2, %v694_v54  ;;  %v6927_v54 = vpop.f32.mrf.mxu3  ;;  %1780 = vmatpush.msra.mxu3 %v6286_v3  ;;  %v619_v58 = vpop.f32.mrf.mxu0 }
 0x15b   : > { %5202 = vmatmul.msk.f32.gmra.mxu2 %vm1051_vm2, %v697_v63  ;;  %v6963_v47 = vpop.f32.mrf.mxu2  ;;  %1691 = vmatpush.msrb.mxu1 %v6320_v10 }
 0x15c   : > { %1781 = vmatpush.msra.mxu3 %v6293_v5  ;;  %9595 = vst [vmem:[#allocation19_spill] sm:$0xff] %v6963_v47 }
 0x15d   : > { %1692 = vmatpush.msrb.mxu1 %v6330_v12 }
 0x15e   : > { %1782 = vmatpush.msra.mxu3 %v6303_v7 }
 0x15f   : > { %1693 = vmatpush.msrb.mxu1 %v6340_v14 }
 0x160   : > { %v6935_v41 = vpop.f32.mrf.mxu1  ;;  %1783 = vmatpush.msra.mxu3 %v6313_v9 }
 0x161   : > { %1694 = vmatpush.msrb.mxu1 %v6350_v16 }
 0x162   : > { %5177 = vmatmul.msk.f32.gmra.mxu0 %vm1051_vm2, %v697_v63  ;;  %v6952_v44 = vpop.f32.mrf.mxu3  ;;  %v703_v63 = vadd.f32 %v6828_v31, %v613_v62  ;;  %1784 = vmatpush.msra.mxu3 %v6323_v11  ;;  %v706_v62 = vadd.f32 %v6841_v40, %v616_v46  ;;  %v709_v46 = vadd.f32 %v6852_v49, %v619_v58 }
 0x163   : > { %5203 = vmatmul.msk.f32.gmra.mxu2 %vm1051_vm2, %v700_v24  ;;  %v6982_v57 = vpop.f32.mrf.mxu2  ;;  %1695 = vmatpush.msrb.mxu1 %v6360_v18 }
 0x164   : > { %1785 = vmatpush.msra.mxu3 %v6333_v13  ;;  %9596 = vst [vmem:[#allocation20_spill] sm:$0xff] %v6982_v57 }
 0x165   : > { %1696 = vmatpush.msrb.mxu1 %v6370_v20 }
 0x166   : > { %1786 = vmatpush.msra.mxu3 %v6343_v15 }
 0x167   : > { %1697 = vmatpush.msrb.mxu1 %v6380_v22 }
 0x168   : > { %v6954_v59 = vpop.f32.mrf.mxu1  ;;  %1787 = vmatpush.msra.mxu3 %v6353_v17 }
 0x169   : > { %1698 = vmatpush.msrb.mxu1 %v6393_v25 }
 0x16a   : > { %5178 = vmatmul.msk.f32.gmra.mxu0 %vm1051_vm2, %v700_v24  ;;  %v6971_v31 = vpop.f32.mrf.mxu3  ;;  %v622_v24 = vpop.f32.mrf.mxu0  ;;  %1788 = vmatpush.msra.mxu3 %v6363_v19 }
 0x16b   : > { %5204 = vmatmul.msk.f32.gmra.mxu2 %vm1051_vm2, %v703_v63  ;;  %1699 = vmatpush.msrb.mxu1 %v6401_v26  ;;  %v6999_v57 = vpop.f32.mrf.mxu2 }
 0x16c   : > { %1789 = vmatpush.msra.mxu3 %v6373_v21  ;;  %9597 = vst [vmem:[#allocation21_spill] sm:$0xff] %v6999_v57 }
 0x16d   : > { %1700 = vmatpush.msrb.mxu1 %v6407_v27 }
 0x16e   : > { %1790 = vmatpush.msra.mxu3 %v6383_v23 }
 0x16f   : > { %1701 = vmatpush.msrb.mxu1 %v6413_v28 }
 0x170   : > { %v6969_v55 = vpop.f32.mrf.mxu1 }
 0x172   : > { %5179 = vmatmul.msk.f32.gmra.mxu0 %vm1051_vm2, %v703_v63  ;;  %v6992_v63 = vpop.f32.mrf.mxu3  ;;  %v625_v47 = vpop.f32.mrf.mxu0 }
 0x173   : > { %5205 = vmatmul.msk.f32.gmra.mxu2 %vm1051_vm2, %v706_v62 }
 0x178   : > { %v6986_v40 = vpop.f32.mrf.mxu1 }
 0x17a   : > { %5180 = vmatmul.msk.f32.gmra.mxu0 %vm1051_vm2, %v706_v62  ;;  %v712_v62 = vadd.f32 %v6865_v61, %v622_v24  ;;  %v7009_v56 = vpop.f32.mrf.mxu3  ;;  %v628_v57 = vpop.f32.mrf.mxu0  ;;  %v715_v61 = vadd.f32 %v6878_v33, %v625_v47 }
 0x17b   : > { %5206 = vmatmul.msk.f32.gmra.mxu2 %vm1051_vm2, %v709_v46  ;;  %v7020_v24 = vpop.f32.mrf.mxu2 }
 0x180   : > { %v881_v49 = vpop.f32.mrf.mxu1 }
 0x181   : > { %v971_v58 = vadd.f32 %v6826_v29, %v881_v49  ;;  %v974_v29 = vadd.f32 %v6837_v37, %v6681_v32  ;;  %v995_v32 = vadd.f32 %v6952_v44, %v6824_v51  ;;  %v9604_v44 = vld [vmem:[#allocation20_spill] sm:$0xff] }
 0x182   : > { %5181 = vmatmul.msk.f32.gmra.mxu0 %vm1051_vm2, %v709_v46 }
 0x183   : > { %5116 = vmatmul.msk.f32.vlgmr.msra.gmra.mxu1 %vm1051_vm2, %v971_v58  ;;  %5141 = vmatmul.msk.f32.vlgmr.msrb.gmra.mxu3 %vm1051_vm2, %v971_v58 }
 0x184   : > { %5207 = vmatmul.msk.f32.gmra.mxu2 %vm1051_vm2, %v712_v62  ;;  %2298 = vmatpush.msra.mxu1 %v6275_v0  ;;  %v7029_v0 = vpop.f32.mrf.mxu3 }
 0x185   : > { %2391 = vmatpush.msrb.mxu3 %v6278_v1  ;;  %v631_v1 = vpop.f32.mrf.mxu0 }
 0x186   : > { %2299 = vmatpush.msra.mxu1 %v6281_v2  ;;  %v977_v2 = vadd.f32 %v6850_v42, %v6726_v50  ;;  %v998_v50 = vadd.f32 %v6971_v31, %v6839_v38  ;;  %v9600_v38 = vld [vmem:[#allocation16_spill] sm:$0xff]  ;;  %v9605_v31 = vld [vmem:[#allocation21_spill] sm:$0xff] }
 0x187   : > { %2392 = vmatpush.msrb.mxu3 %v6286_v3  ;;  %v718_v3 = vadd.f32 %v6895_v30, %v628_v57  ;;  %v1007_v42 = vadd.f32 %v7029_v0, %v9600_v38  ;;  %v9603_v30 = vld [vmem:[#allocation19_spill] sm:$0xff]  ;;  %v5948_v38 = vld [vmem:[%s6272_s25 + $0x38] sm:$0xff] }
 0x188   : > { %2300 = vmatpush.msra.mxu1 %v6290_v4  ;;  %v7042_v4 = vpop.f32.mrf.mxu2 }
 0x189   : > { %2393 = vmatpush.msrb.mxu3 %v6293_v5 }
 0x18a   : > { %5182 = vmatmul.msk.f32.gmra.mxu0 %vm1051_vm2, %v712_v62  ;;  %2301 = vmatpush.msra.mxu1 %v6300_v6  ;;  %v980_v6 = vadd.f32 %v6863_v53, %v6745_v60 }
 0x18b   : > { %5117 = vmatmul.msk.f32.gmra.mxu1 %vm1051_vm2, %v974_v29  ;;  %5142 = vmatmul.msk.f32.gmra.mxu3 %vm1051_vm2, %v974_v29 }
 0x18c   : > { %5208 = vmatmul.msk.f32.gmra.mxu2 %vm1051_vm2, %v715_v61  ;;  %2302 = vmatpush.msra.mxu1 %v6310_v8  ;;  %v7049_v5 = vpop.f32.mrf.mxu3  ;;  %v721_v8 = vadd.f32 %v6908_v52, %v631_v1 }
 0x18d   : > { %2394 = vmatpush.msrb.mxu3 %v6303_v7  ;;  %v634_v7 = vpop.f32.mrf.mxu0 }
 0x18e   : > { %2303 = vmatpush.msra.mxu1 %v6320_v10  ;;  %v983_v10 = vadd.f32 %v6876_v35, %v6764_v34  ;;  %v9598_v34 = vld [vmem:[#allocation14_spill] sm:$0xff]  ;;  %v9601_v35 = vld [vmem:[#allocation17_spill] sm:$0xff] }
 0x18f   : > { %2395 = vmatpush.msrb.mxu3 %v6313_v9  ;;  %v1010_v33 = vadd.f32 %v7049_v5, %v9601_v35  ;;  %v5950_v35 = vld [vmem:[%s6272_s25 + $0x30] sm:$0xff] }
 0x190   : > { %2304 = vmatpush.msra.mxu1 %v6330_v12  ;;  %v7063_v9 = vpop.f32.mrf.mxu2 }
 0x191   : > { %2396 = vmatpush.msrb.mxu3 %v6323_v11  ;;  %v724_v11 = vadd.f32 %v6935_v41, %v634_v7 }
 0x192   : > { %5183 = vmatmul.msk.f32.gmra.mxu0 %vm1051_vm2, %v715_v61  ;;  %2305 = vmatpush.msra.mxu1 %v6340_v14 }
 0x193   : > { %5118 = vmatmul.msk.f32.gmra.mxu1 %vm1051_vm2, %v977_v2  ;;  %5143 = vmatmul.msk.f32.gmra.mxu3 %vm1051_vm2, %v977_v2 }
 0x194   : > { %5209 = vmatmul.msk.f32.gmra.mxu2 %vm1051_vm2, %v718_v3  ;;  %2397 = vmatpush.msrb.mxu3 %v6333_v13  ;;  %v1012_v12 = vpop.f32.mrf.mxu3 }
 0x195   : > { %2306 = vmatpush.msra.mxu1 %v6350_v16  ;;  %v637_v13 = vpop.f32.mrf.mxu0 }
 0x196   : > { %2398 = vmatpush.msrb.mxu3 %v6343_v15  ;;  %v986_v15 = vadd.f32 %v6893_v45, %v6781_v43  ;;  %v727_v16 = vadd.f32 %v6954_v59, %v637_v13  ;;  %v1001_v43 = vadd.f32 %v6992_v63, %v9598_v34  ;;  %v5932_v13 = vld [vmem:[%s6272_s25 + $0x78] sm:$0xff]  ;;  %v5220_v34 = vld [vmem:[%s9568_s1 + $0x328] sm:$0xff] }
 0x197   : > { %2307 = vmatpush.msra.mxu1 %v6360_v18 }
 0x198   : > { %2399 = vmatpush.msrb.mxu3 %v6353_v17  ;;  %v7077_v14 = vpop.f32.mrf.mxu2 }
 0x199   : > { %2308 = vmatpush.msra.mxu1 %v6370_v20 }
 0x19a   : > { %5184 = vmatmul.msk.f32.gmra.mxu0 %vm1051_vm2, %v718_v3  ;;  %2400 = vmatpush.msrb.mxu3 %v6363_v19  ;;  %v989_v19 = vadd.f32 %v6904_v36, %v6799_v48 }
 0x19b   : > { %5119 = vmatmul.msk.f32.gmra.mxu1 %vm1051_vm2, %v980_v6  ;;  %5144 = vmatmul.msk.f32.gmra.mxu3 %vm1051_vm2, %v980_v6 }
 0x19c   : > { %5210 = vmatmul.msk.f32.gmra.mxu2 %vm1051_vm2, %v721_v8  ;;  %2309 = vmatpush.msra.mxu1 %v6380_v22  ;;  %v1015_v17 = vpop.f32.mrf.mxu3 }
 0x19d   : > { %2401 = vmatpush.msrb.mxu3 %v6373_v21  ;;  %v640_v18 = vpop.f32.mrf.mxu0  ;;  %v1016_v36 = vadd.f32 %v1015_v17, %v9603_v30  ;;  %v5935_v17 = vld [vmem:[%s6272_s25 + $0xd0] sm:$0xff] }
 0x19e   : > { %2310 = vmatpush.msra.mxu1 %v6393_v25  ;;  %v730_v21 = vadd.f32 %v6969_v55, %v640_v18  ;;  %v992_v25 = vadd.f32 %v6927_v54, %v6812_v39  ;;  %v9599_v39 = vld [vmem:[#allocation15_spill] sm:$0xff]  ;;  %v5221_v30 = vld [vmem:[%s9568_s1 + $0x330] sm:$0xff] }
 0x19f   : > { %2402 = vmatpush.msrb.mxu3 %v6383_v23  ;;  %v1004_v51 = vadd.f32 %v7009_v56, %v9599_v39  ;;  %v9602_v56 = vld [vmem:[#allocation18_spill] sm:$0xff]  ;;  %v5945_v39 = vld [vmem:[%s6272_s25 + $0xa8] sm:$0xff] }
 0x1a0   : > { %2311 = vmatpush.msra.mxu1 %v6401_v26  ;;  %v7088_v20 = vpop.f32.mrf.mxu2  ;;  %v1013_v52 = vadd.f32 %v1012_v12, %v9602_v56  ;;  %v5215_v12 = vld [vmem:[%s9568_s1 + $0x300] sm:$0xff] }
 0x1a2   : > { %5185 = vmatmul.msk.f32.gmra.mxu0 %vm1051_vm2, %v721_v8  ;;  %2312 = vmatpush.msra.mxu1 %v6407_v27 }
 0x1a3   : > { %5120 = vmatmul.msk.f32.gmra.mxu1 %vm1051_vm2, %v983_v10  ;;  %5145 = vmatmul.msk.f32.gmra.mxu3 %vm1051_vm2, %v983_v10 }
 0x1a4   : > { %5211 = vmatmul.msk.f32.gmra.mxu2 %vm1051_vm2, %v724_v11  ;;  %2313 = vmatpush.msra.mxu1 %v6413_v28  ;;  %v1018_v22 = vpop.f32.mrf.mxu3 }
 0x1a5   : > { %v643_v23 = vpop.f32.mrf.mxu0  ;;  %v1019_v59 = vadd.f32 %v1018_v22, %v9604_v44  ;;  %v5937_v22 = vld [vmem:[%s6272_s25 + $0xc8] sm:$0xff]  ;;  %v5954_v44 = vld [vmem:[%s6272_s25 + $0x20] sm:$0xff] }
 0x1a6   : > { %v733_v26 = vadd.f32 %v6986_v40, %v643_v23  ;;  %v5938_v23 = vld [vmem:[%s6272_s25 + $0x60] sm:$0xff] }
 0x1a8   : > { %v7101_v27 = vpop.f32.mrf.mxu2 }
 0x1aa   : > { %5186 = vmatmul.msk.f32.gmra.mxu0 %vm1051_vm2, %v724_v11  ;;  %v5216_v11 = vld [vmem:[%s9568_s1 + $0x308] sm:$0xff] }
 0x1ab   : > { %5121 = vmatmul.msk.f32.gmra.mxu1 %vm1051_vm2, %v986_v15  ;;  %5146 = vmatmul.msk.f32.gmra.mxu3 %vm1051_vm2, %v986_v15 }
 0x1ac   : > { %5212 = vmatmul.msk.f32.gmra.mxu2 %vm1051_vm2, %v727_v16  ;;  %v1021_v28 = vpop.f32.mrf.mxu3 }
 0x1ad   : > { %v1022_v57 = vadd.f32 %v1021_v28, %v9605_v31  ;;  %v7244_v56 = vpop.f32.mrf.mxu0  ;;  %v5956_v31 = vld [vmem:[%s6272_s25 + $0x18] sm:$0xff] }
 0x1b2   : > { %5187 = vmatmul.msk.f32.gmra.mxu0 %vm1051_vm2, %v727_v16  ;;  %v5934_v16 = vld [vmem:[%s6272_s25 + $0x70] sm:$0xff] }
 0x1b3   : > { %5122 = vmatmul.msk.f32.gmra.mxu1 %vm1051_vm2, %v989_v19  ;;  %5147 = vmatmul.msk.f32.gmra.mxu3 %vm1051_vm2, %v989_v19  ;;  %v5218_v19 = vld [vmem:[%s9568_s1 + $0x318] sm:$0xff] }
 0x1b4   : > { %5213 = vmatmul.msk.f32.gmra.mxu2 %vm1051_vm2, %v730_v21  ;;  %v1024_v60 = vpop.f32.mrf.mxu3 }
 0x1b5   : > { %v1025_v63 = vadd.f32 %v1024_v60, %v7020_v24 }
 0x1ba   : > { %5188 = vmatmul.msk.f32.gmra.mxu0 %vm1051_vm2, %v730_v21  ;;  %v5936_v21 = vld [vmem:[%s6272_s25 + $0x68] sm:$0xff] }
 0x1bb   : > { %5123 = vmatmul.msk.f32.gmra.mxu1 %vm1051_vm2, %v992_v25  ;;  %5148 = vmatmul.msk.f32.gmra.mxu3 %vm1051_vm2, %v992_v25  ;;  %v5939_v25 = vld [vmem:[%s6272_s25 + $0xc0] sm:$0xff] }
 0x1bc   : > { %5214 = vmatmul.msk.f32.gmra.mxu2 %vm1051_vm2, %v733_v26  ;;  %v1027_v48 = vpop.f32.mrf.mxu3 }
 0x1bd   : > { %v1028_v62 = vadd.f32 %v1027_v48, %v7042_v4  ;;  %v5944_v48 = vld [vmem:[%s6272_s25 + $0x48] sm:$0xff] }
 0x1c2   : > { %5189 = vmatmul.msk.f32.gmra.mxu0 %vm1051_vm2, %v733_v26  ;;  %v5940_v26 = vld [vmem:[%s6272_s25 + $0x58] sm:$0xff] }
 0x1c3   : > { %5124 = vmatmul.msk.f32.gmra.mxu1 %vm1051_vm2, %v995_v32  ;;  %5149 = vmatmul.msk.f32.gmra.mxu3 %vm1051_vm2, %v995_v32  ;;  %v5942_v32 = vld [vmem:[%s6272_s25 + $0x50] sm:$0xff] }
 0x1c4   : > { %v1030_v37 = vpop.f32.mrf.mxu3 }
 0x1c5   : > { %v1031_v24 = vadd.f32 %v1030_v37, %v7063_v9  ;;  %v5947_v37 = vld [vmem:[%s6272_s25 + $0xa0] sm:$0xff] }
 0x1cb   : > { %5125 = vmatmul.msk.f32.gmra.mxu1 %vm1051_vm2, %v998_v50  ;;  %5150 = vmatmul.msk.f32.gmra.mxu3 %vm1051_vm2, %v998_v50  ;;  %v5943_v50 = vld [vmem:[%s6272_s25 + $0xb0] sm:$0xff] }
 0x1cc   : > { %v1033_v53 = vpop.f32.mrf.mxu3 }
 0x1cd   : > { %v1034_v2 = vadd.f32 %v1033_v53, %v7077_v14  ;;  %v5933_v14 = vld [vmem:[%s6272_s25 + $0xd8] sm:$0xff] }
 0x1d3   : > { %5126 = vmatmul.msk.f32.gmra.mxu1 %vm1051_vm2, %v1001_v43  ;;  %5151 = vmatmul.msk.f32.gmra.mxu3 %vm1051_vm2, %v1001_v43  ;;  %v5219_v43 = vld [vmem:[%s9568_s1 + $0x320] sm:$0xff] }
 0x1d4   : > { %v1036_v45 = vpop.f32.mrf.mxu3 }
 0x1d5   : > { %v1037_v5 = vadd.f32 %v1036_v45, %v7088_v20  ;;  %v5217_v20 = vld [vmem:[%s9568_s1 + $0x310] sm:$0xff]  ;;  %v5222_v45 = vld [vmem:[%s9568_s1 + $0x338] sm:$0xff] }
 0x1db   : > { %5127 = vmatmul.msk.f32.gmra.mxu1 %vm1051_vm2, %v1004_v51  ;;  %5152 = vmatmul.msk.f32.gmra.mxu3 %vm1051_vm2, %v1004_v51  ;;  %v5946_v51 = vld [vmem:[%s6272_s25 + $0x40] sm:$0xff] }
 0x1dc   : > { %v1039_v54 = vpop.f32.mrf.mxu3 }
 0x1dd   : > { %v1040_v8 = vadd.f32 %v1039_v54, %v7101_v27  ;;  %v5941_v27 = vld [vmem:[%s6272_s25 + $0xb8] sm:$0xff]  ;;  %v5953_v54 = vld [vmem:[%s6272_s25 + $0x88] sm:$0xff] }
 0x1e3   : > { %5128 = vmatmul.msk.f32.gmra.mxu1 %vm1051_vm2, %v1007_v42  ;;  %5153 = vmatmul.msk.f32.gmra.mxu3 %vm1051_vm2, %v1007_v42  ;;  %v5949_v42 = vld [vmem:[%s6272_s25 + $0x98] sm:$0xff] }
 0x1eb   : > { %5129 = vmatmul.msk.f32.gmra.mxu1 %vm1051_vm2, %v1010_v33  ;;  %5154 = vmatmul.msk.f32.gmra.mxu3 %vm1051_vm2, %v1010_v33  ;;  %v5951_v33 = vld [vmem:[%s6272_s25 + $0x90] sm:$0xff] }
 0x1f3   : > { %5130 = vmatmul.msk.f32.gmra.mxu1 %vm1051_vm2, %v1013_v52  ;;  %5155 = vmatmul.msk.f32.gmra.mxu3 %vm1051_vm2, %v1013_v52 }
 0x1fb   : > { %5131 = vmatmul.msk.f32.gmra.mxu1 %vm1051_vm2, %v1016_v36  ;;  %5156 = vmatmul.msk.f32.gmra.mxu3 %vm1051_vm2, %v1016_v36  ;;  %v5952_v36 = vld [vmem:[%s6272_s25 + $0x28] sm:$0xff] }
 0x200   : > { %v7135_v41 = vpop.f32.mrf.mxu1 }
 0x203   : > { %5132 = vmatmul.msk.f32.gmra.mxu1 %vm1051_vm2, %v1019_v59  ;;  %5157 = vmatmul.msk.f32.gmra.mxu3 %vm1051_vm2, %v1019_v59  ;;  %v5955_v59 = vld [vmem:[%s6272_s25 + $0x80] sm:$0xff] }
 0x206   : > { %v7140_v47 = vpop.f32.mrf.mxu3 }
 0x208   : > { %v7142_v55 = vpop.f32.mrf.mxu1 }
 0x20b   : > { %5133 = vmatmul.msk.f32.gmra.mxu1 %vm1051_vm2, %v1022_v57  ;;  %5158 = vmatmul.msk.f32.gmra.mxu3 %vm1051_vm2, %v1022_v57  ;;  %v7260_v57 = vpop.f32.mrf.mxu2 }
 0x20e   : > { %v7147_v40 = vpop.f32.mrf.mxu3 }
 0x210   : > { %v7149_v46 = vpop.f32.mrf.mxu1 }
 0x211   : > { %9606 = vst [vmem:[#allocation14_spill] sm:$0xff] %v7149_v46 }
 0x213   : > { %5134 = vmatmul.msk.f32.gmra.mxu1 %vm1051_vm2, %v1025_v63  ;;  %5159 = vmatmul.msk.f32.gmra.mxu3 %vm1051_vm2, %v1025_v63 }
 0x216   : > { %v7154_v49 = vpop.f32.mrf.mxu3 }
 0x218   : > { %v7156_v58 = vpop.f32.mrf.mxu1 }
 0x219   : > { %9607 = vst [vmem:[#allocation15_spill] sm:$0xff] %v7156_v58  ;;  %v5363_v58 = vld [vmem:[%s9568_s1 + $0x510] sm:$0xff] }
 0x21b   : > { %5135 = vmatmul.msk.f32.gmra.mxu1 %vm1051_vm2, %v1028_v62  ;;  %5160 = vmatmul.msk.f32.gmra.mxu3 %vm1051_vm2, %v1028_v62  ;;  %v5957_v62 = vld [vmem:[%s6272_s25 + $0x10] sm:$0xff] }
 0x21e   : > { %v7161_v29 = vpop.f32.mrf.mxu3 }
 0x220   : > { %v7163_v61 = vpop.f32.mrf.mxu1 }
 0x221   : > { %9608 = vst [vmem:[#allocation16_spill] sm:$0xff] %v7163_v61  ;;  %v5357_v61 = vld [vmem:[%s9568_s1 + $0x4e0] sm:$0xff] }
 0x223   : > { %5136 = vmatmul.msk.f32.gmra.mxu1 %vm1051_vm2, %v1031_v24  ;;  %5161 = vmatmul.msk.f32.gmra.mxu3 %vm1051_vm2, %v1031_v24 }
 0x226   : > { %v7168_v0 = vpop.f32.mrf.mxu3 }
 0x228   : > { %v7170_v1 = vpop.f32.mrf.mxu1 }
 0x229   : > { %9609 = vst [vmem:[#allocation17_spill] sm:$0xff] %v7170_v1  ;;  %v5353_v1 = vld [vmem:[%s9568_s1 + $0x4c0] sm:$0xff] }
 0x22b   : > { %5137 = vmatmul.msk.f32.gmra.mxu1 %vm1051_vm2, %v1034_v2  ;;  %5162 = vmatmul.msk.f32.gmra.mxu3 %vm1051_vm2, %v1034_v2  ;;  %v5224_v2 = vld [vmem:[%s9568_s1 + $0x348] sm:$0xff] }
 0x22e   : > { %v7175_v3 = vpop.f32.mrf.mxu3 }
 0x230   : > { %v7177_v4 = vpop.f32.mrf.mxu1 }
 0x231   : > { %9610 = vst [vmem:[#allocation18_spill] sm:$0xff] %v7177_v4  ;;  %v5347_v4 = vld [vmem:[%s9568_s1 + $0x490] sm:$0xff] }
 0x233   : > { %5138 = vmatmul.msk.f32.gmra.mxu1 %vm1051_vm2, %v1037_v5  ;;  %5163 = vmatmul.msk.f32.gmra.mxu3 %vm1051_vm2, %v1037_v5  ;;  %v5223_v5 = vld [vmem:[%s9568_s1 + $0x340] sm:$0xff] }
 0x236   : > { %v7182_v6 = vpop.f32.mrf.mxu3 }
 0x238   : > { %v7184_v7 = vpop.f32.mrf.mxu1 }
 0x239   : > { %9611 = vst [vmem:[#allocation19_spill] sm:$0xff] %v7184_v7  ;;  %v5261_v7 = vld [vmem:[%s9568_s1 + $0x470] sm:$0xff] }
 0x23b   : > { %5139 = vmatmul.msk.f32.gmra.mxu1 %vm1051_vm2, %v1040_v8  ;;  %5164 = vmatmul.msk.f32.gmra.mxu3 %vm1051_vm2, %v1040_v8  ;;  %v5958_v8 = vld [vmem:[%s6272_s25 + $0x8] sm:$0xff] }
 0x23e   : > { %v7189_v9 = vpop.f32.mrf.mxu3 }
 0x240   : > { %v7191_v10 = vpop.f32.mrf.mxu1 }
 0x241   : > { %9612 = vst [vmem:[#allocation20_spill] sm:$0xff] %v7191_v10  ;;  %v5255_v10 = vld [vmem:[%s9568_s1 + $0x440] sm:$0xff] }
 0x243   : > { %5263 = vmatmul.msk.f32.vlgmr.msra.gmra.mxu3 %vm484_vm0, %v5216_v11  ;;  %1702 = vmatmul.f32.vlgmr.msrb.gmra.mxu1 %v5215_v12  ;;  %v7274_v11 = vpop.f32.mrf.mxu0  ;;  %v5959_v12 = vld [vmem:[%s6272_s25] sm:$0xff]  ;;  %s401_s25 = scalar_lea.vmem [#allocation8], %s5009_s21 }
 0x244   : > { %2910 = vmatpush.msrb.mxu1 %v5932_v13  ;;  %3003 = vmatpush.msra.mxu3 %v5933_v14  ;;  %v7280_v14 = vpop.f32.mrf.mxu2  ;;  %s4906_s6 = sshll.u32 %s401_s25, 4  ;;  %s4907_s6 = int_to_ptr.vmem [resolvable:$true] %s4906_s6 }
 0x246   : > { %v7202_v15 = vpop.f32.mrf.mxu3  ;;  %2911 = vmatpush.msrb.mxu1 %v5934_v16  ;;  %3004 = vmatpush.msra.mxu3 %v5935_v17  ;;  %v5226_v17 = vld [vmem:[%s9568_s1 + $0x358] sm:$0xff] }
 0x248   : > { %v7206_v18 = vpop.f32.mrf.mxu1  ;;  %2912 = vmatpush.msrb.mxu1 %v5936_v21  ;;  %3005 = vmatpush.msra.mxu3 %v5937_v22 }
 0x249   : > { %9613 = vst [vmem:[#allocation21_spill] sm:$0xff] %v7206_v18  ;;  %v5251_v18 = vld [vmem:[%s9568_s1 + $0x420] sm:$0xff] }
 0x24a   : > { %2913 = vmatpush.msrb.mxu1 %v5938_v23  ;;  %3006 = vmatpush.msra.mxu3 %v5939_v25  ;;  %v5228_v23 = vld [vmem:[%s9568_s1 + $0x368] sm:$0xff]  ;;  %v5227_v25 = vld [vmem:[%s9568_s1 + $0x360] sm:$0xff] }
 0x24b   : > { %5264 = vmatmul.msk.f32.gmra.mxu3 %vm484_vm0, %v5218_v19  ;;  %1705 = vmatmul.f32.gmra.mxu1 %v5217_v20  ;;  %v5225_v19 = vld [vmem:[%s9568_s1 + $0x350] sm:$0xff]  ;;  %v7291_v20 = vpop.f32.mrf.mxu0 }
 0x24c   : > { %2914 = vmatpush.msrb.mxu1 %v5940_v26  ;;  %3007 = vmatpush.msra.mxu3 %v5941_v27  ;;  %9618 = vst [vmem:[#allocation26_spill] sm:$0xff] %v7291_v20  ;;  %v7303_v26 = vpop.f32.mrf.mxu2  ;;  %v5366_v20 = vld [vmem:[%s9568_s1 + $0x528] sm:$0xff] }
 0x24e   : > { %v7221_v28 = vpop.f32.mrf.mxu3  ;;  %2915 = vmatpush.msrb.mxu1 %v5942_v32  ;;  %3008 = vmatpush.msra.mxu3 %v5943_v50 }
 0x250   : > { %v7225_v60 = vpop.f32.mrf.mxu1  ;;  %2916 = vmatpush.msrb.mxu1 %v5944_v48  ;;  %3009 = vmatpush.msra.mxu3 %v5945_v39 }
 0x251   : > { %9614 = vst [vmem:[#allocation22_spill] sm:$0xff] %v7225_v60  ;;  %v5249_v60 = vld [vmem:[%s9568_s1 + $0x410] sm:$0xff] }
 0x252   : > { %2917 = vmatpush.msrb.mxu1 %v5946_v51  ;;  %3010 = vmatpush.msra.mxu3 %v5947_v37 }
 0x253   : > { %5265 = vmatmul.msk.f32.gmra.mxu3 %vm484_vm0, %v5220_v34  ;;  %1708 = vmatmul.f32.gmra.mxu1 %v5219_v43  ;;  %v7306_v27 = vpop.f32.mrf.mxu0  ;;  %v5230_v34 = vld [vmem:[%s9568_s1 + $0x378] sm:$0xff]  ;;  %v5229_v43 = vld [vmem:[%s9568_s1 + $0x370] sm:$0xff] }
 0x254   : > { %2918 = vmatpush.msrb.mxu1 %v5948_v38  ;;  %3011 = vmatpush.msra.mxu3 %v5949_v42  ;;  %9620 = vst [vmem:[#allocation28_spill] sm:$0xff] %v7306_v27  ;;  %v7319_v48 = vpop.f32.mrf.mxu2  ;;  %v5232_v38 = vld [vmem:[%s9568_s1 + $0x388] sm:$0xff]  ;;  %v5231_v42 = vld [vmem:[%s9568_s1 + $0x380] sm:$0xff] }
 0x255   : > { %v5361_v27 = vld [vmem:[%s9568_s1 + $0x500] sm:$0xff] }
 0x256   : > { %v7240_v53 = vpop.f32.mrf.mxu3  ;;  %2919 = vmatpush.msrb.mxu1 %v5950_v35  ;;  %3012 = vmatpush.msra.mxu3 %v5951_v33 }
 0x258   : > { %v7246_v52 = vpop.f32.mrf.mxu1  ;;  %2920 = vmatpush.msrb.mxu1 %v5952_v36  ;;  %3013 = vmatpush.msra.mxu3 %v5953_v54  ;;  %v5233_v36 = vld [vmem:[%s9568_s1 + $0x390] sm:$0xff] }
 0x259   : > { %9615 = vst [vmem:[#allocation23_spill] sm:$0xff] %v7246_v52  ;;  %v5250_v52 = vld [vmem:[%s9568_s1 + $0x418] sm:$0xff] }
 0x25a   : > { %2921 = vmatpush.msrb.mxu1 %v5954_v44  ;;  %3014 = vmatpush.msra.mxu3 %v5955_v59 }
 0x25b   : > { %5266 = vmatmul.msk.f32.gmra.mxu3 %vm484_vm0, %v5222_v45  ;;  %1711 = vmatmul.f32.gmra.mxu1 %v5221_v30  ;;  %v7323_v51 = vpop.f32.mrf.mxu0  ;;  %v5234_v30 = vld [vmem:[%s9568_s1 + $0x398] sm:$0xff] }
 0x25c   : > { %2922 = vmatpush.msrb.mxu1 %v5956_v31  ;;  %9622 = vst [vmem:[#allocation30_spill] sm:$0xff] %v7323_v51  ;;  %v7334_v35 = vpop.f32.mrf.mxu2 }
 0x25e   : > { %v7262_v63 = vpop.f32.mrf.mxu3  ;;  %2923 = vmatpush.msrb.mxu1 %v5957_v62  ;;  %v5236_v62 = vld [vmem:[%s9568_s1 + $0x3a8] sm:$0xff] }
 0x260   : > { %v7265_v24 = vpop.f32.mrf.mxu1  ;;  %2924 = vmatpush.msrb.mxu1 %v5958_v8 }
 0x261   : > { %9616 = vst [vmem:[#allocation24_spill] sm:$0xff] %v7265_v24 }
 0x262   : > { %2925 = vmatpush.msrb.mxu1 %v5959_v12 }
 0x263   : > { %5267 = vmatmul.msk.f32.gmra.mxu3 %vm484_vm0, %v5224_v2  ;;  %1714 = vmatmul.f32.gmra.mxu1 %v5223_v5  ;;  %v7346_v54 = vpop.f32.mrf.mxu0  ;;  %v5235_v2 = vld [vmem:[%s9568_s1 + $0x3a0] sm:$0xff]  ;;  %v5294_v5 = vld [vmem:[%s9569_s2 + $0xb8] sm:$0xf] }
 0x264   : > { %9625 = vst [vmem:[#allocation33_spill] sm:$0xff] %v7346_v54  ;;  %v7351_v59 = vpop.f32.mrf.mxu2  ;;  %5320 = vmatpush.msk.msra.mxu2 %vm1124_vm1, %v5294_v5  ;;  %v5351_v54 = vld [vmem:[%s9568_s1 + $0x4b0] sm:$0xff] }
 0x266   : > { %v7278_v13 = vpop.f32.mrf.mxu3 }
 0x268   : > { %v7282_v16 = vpop.f32.mrf.mxu1 }
 0x269   : > { %9617 = vst [vmem:[#allocation25_spill] sm:$0xff] %v7282_v16 }
 0x26b   : > { %5268 = vmatmul.msk.f32.gmra.mxu3 %vm484_vm0, %v5226_v17  ;;  %1717 = vmatmul.f32.gmra.mxu1 %v5225_v19  ;;  %v7366_v8 = vpop.f32.mrf.mxu0  ;;  %v5238_v19 = vld [vmem:[%s9568_s1 + $0x3b8] sm:$0xff] }
 0x26c   : > { %9627 = vst [vmem:[#allocation35_spill] sm:$0xff] %v7366_v8 }
 0x26e   : > { %v7293_v21 = vpop.f32.mrf.mxu3 }
 0x270   : > { %v7295_v22 = vpop.f32.mrf.mxu1 }
 0x271   : > { %9619 = vst [vmem:[#allocation27_spill] sm:$0xff] %v7295_v22  ;;  %v5247_v22 = vld [vmem:[%s9568_s1 + $0x400] sm:$0xff] }
 0x273   : > { %5269 = vmatmul.msk.f32.gmra.mxu3 %vm484_vm0, %v5228_v23  ;;  %1720 = vmatmul.f32.gmra.mxu1 %v5227_v25  ;;  %v5237_v23 = vld [vmem:[%s9568_s1 + $0x3b0] sm:$0xff] }
 0x274   : > { %v5293_v25 = vld [vmem:[%s9569_s2 + $0xb0] sm:$0xf] }
 0x275   : > { %5295 = vmatpush.msk.msra.mxu0 %vm1124_vm1, %v5293_v25  ;;  %v5290_v25 = vld [vmem:[%s9569_s2 + $0x98] sm:$0xff] }
 0x276   : > { %v7308_v32 = vpop.f32.mrf.mxu3 }
 0x278   : > { %v7310_v50 = vpop.f32.mrf.mxu1 }
 0x279   : > { %9621 = vst [vmem:[#allocation29_spill] sm:$0xff] %v7310_v50 }
 0x27b   : > { %5270 = vmatmul.msk.f32.gmra.mxu3 %vm484_vm0, %v5230_v34  ;;  %1723 = vmatmul.f32.gmra.mxu1 %v5229_v43  ;;  %v7381_v34 = vpop.f32.mrf.mxu2  ;;  %v7385_v43 = vpop.f32.mrf.mxu0 }
 0x27c   : > { %9629 = vst [vmem:[#allocation37_spill] sm:$0xff] %v7385_v43  ;;  %v5259_v43 = vld [vmem:[%s9568_s1 + $0x460] sm:$0xff] }
 0x27e   : > { %v7321_v39 = vpop.f32.mrf.mxu3 }
 0x280   : > { %v7325_v37 = vpop.f32.mrf.mxu1 }
 0x281   : > { %9623 = vst [vmem:[#allocation31_spill] sm:$0xff] %v7325_v37 }
 0x283   : > { %5271 = vmatmul.msk.f32.gmra.mxu3 %vm484_vm0, %v5232_v38  ;;  %1726 = vmatmul.f32.gmra.mxu1 %v5231_v42  ;;  %v7404_v5 = vpop.f32.mrf.mxu2 }
 0x286   : > { %v7336_v33 = vpop.f32.mrf.mxu3 }
 0x288   : > { %v7338_v45 = vpop.f32.mrf.mxu1 }
 0x289   : > { %9624 = vst [vmem:[#allocation32_spill] sm:$0xff] %v7338_v45  ;;  %v5243_v45 = vld [vmem:[%s9568_s1 + $0x3e0] sm:$0xff] }
 0x28b   : > { %5272 = vmatmul.msk.f32.gmra.mxu3 %vm484_vm0, %v5234_v30  ;;  %1729 = vmatmul.f32.gmra.mxu1 %v5233_v36  ;;  %v5240_v30 = vld [vmem:[%s9568_s1 + $0x3c8] sm:$0xff]  ;;  %v5239_v36 = vld [vmem:[%s9568_s1 + $0x3c0] sm:$0xff] }
 0x28e   : > { %v7349_v44 = vpop.f32.mrf.mxu3 }
 0x290   : > { %v7353_v31 = vpop.f32.mrf.mxu1 }
 0x291   : > { %9626 = vst [vmem:[#allocation34_spill] sm:$0xff] %v7353_v31 }
 0x293   : > { %5273 = vmatmul.msk.f32.gmra.mxu3 %vm484_vm0, %v5236_v62  ;;  %1732 = vmatmul.f32.gmra.mxu1 %v5235_v2  ;;  %v5291_v62 = vld [vmem:[%s9569_s2 + $0xa0] sm:$0xff]  ;;  %v5292_v2 = vld [vmem:[%s9569_s2 + $0xa8] sm:$0xff] }
 0x294   : > { %1964 = vmatpush.msra.mxu0 %v5291_v62  ;;  %2053 = vmatpush.msra.mxu2 %v5292_v2  ;;  %v7420_v62 = vpop.f32.mrf.mxu0 }
 0x295   : > { %9631 = vst [vmem:[#allocation39_spill] sm:$0xff] %v7420_v62 }
 0x296   : > { %v7368_v12 = vpop.f32.mrf.mxu3  ;;  %2054 = vmatpush.msra.mxu2 %v5290_v25  ;;  %v7431_v25 = vpop.f32.mrf.mxu2 }
 0x298   : > { %v7370_v17 = vpop.f32.mrf.mxu1 }
 0x299   : > { %9628 = vst [vmem:[#allocation36_spill] sm:$0xff] %v7370_v17 }
 0x29b   : > { %5274 = vmatmul.msk.f32.gmra.mxu3 %vm484_vm0, %v5238_v19  ;;  %1735 = vmatmul.f32.gmra.mxu1 %v5237_v23  ;;  %v5289_v23 = vld [vmem:[%s9569_s2 + $0x90] sm:$0xff] }
 0x29c   : > { %1965 = vmatpush.msra.mxu0 %v5289_v23  ;;  %v5241_v23 = vld [vmem:[%s9568_s1 + $0x3d0] sm:$0xff]  ;;  %v7443_v37 = vpop.f32.mrf.mxu0 }
 0x29d   : > { %9634 = vst [vmem:[#allocation42_spill] sm:$0xff] %v7443_v37 }
 0x29e   : > { %v7387_v38 = vpop.f32.mrf.mxu3 }
 0x2a0   : > { %v7389_v42 = vpop.f32.mrf.mxu1 }
 0x2a1   : > { %9630 = vst [vmem:[#allocation38_spill] sm:$0xff] %v7389_v42  ;;  %v5242_v42 = vld [vmem:[%s9568_s1 + $0x3d8] sm:$0xff] }
 0x2a3   : > { %5275 = vmatmul.msk.f32.gmra.mxu3 %vm484_vm0, %v5240_v30  ;;  %1738 = vmatmul.f32.gmra.mxu1 %v5239_v36  ;;  %v5287_v30 = vld [vmem:[%s9569_s2 + $0x80] sm:$0xff]  ;;  %v5288_v36 = vld [vmem:[%s9569_s2 + $0x88] sm:$0xff] }
 0x2a4   : > { %1966 = vmatpush.msra.mxu0 %v5287_v30  ;;  %2055 = vmatpush.msra.mxu2 %v5288_v36  ;;  %v7448_v30 = vpop.f32.mrf.mxu2  ;;  %v7459_v50 = vpop.f32.mrf.mxu0 }
 0x2a5   : > { %9636 = vst [vmem:[#allocation44_spill] sm:$0xff] %v7459_v50 }
 0x2a6   : > { %v7406_v19 = vpop.f32.mrf.mxu3 }
 0x2a8   : > { %v7422_v2 = vpop.f32.mrf.mxu1 }
 0x2a9   : > { %9632 = vst [vmem:[#allocation40_spill] sm:$0xff] %v7422_v2  ;;  %v5244_v2 = vld [vmem:[%s9568_s1 + $0x3e8] sm:$0xff] }
 0x2ab   : > { %5276 = vmatmul.msk.f32.gmra.mxu3 %vm484_vm0, %v5242_v42  ;;  %1741 = vmatmul.f32.gmra.mxu1 %v5241_v23  ;;  %v5246_v23 = vld [vmem:[%s9568_s1 + $0x3f8] sm:$0xff] }
 0x2ac   : > { %v7469_v16 = vpop.f32.mrf.mxu2 }
 0x2ae   : > { %v7433_v17 = vpop.f32.mrf.mxu3 }
 0x2b0   : > { %v7435_v31 = vpop.f32.mrf.mxu1 }
 0x2b1   : > { %9633 = vst [vmem:[#allocation41_spill] sm:$0xff] %v7435_v31  ;;  %v5245_v31 = vld [vmem:[%s9568_s1 + $0x3f0] sm:$0xff] }
 0x2b3   : > { %5277 = vmatmul.msk.f32.gmra.mxu3 %vm484_vm0, %v5244_v2  ;;  %1744 = vmatmul.f32.gmra.mxu1 %v5243_v45  ;;  %v5248_v2 = vld [vmem:[%s9568_s1 + $0x408] sm:$0xff] }
 0x2b6   : > { %v7446_v42 = vpop.f32.mrf.mxu3 }
 0x2b8   : > { %v7450_v36 = vpop.f32.mrf.mxu1 }
 0x2b9   : > { %9635 = vst [vmem:[#allocation43_spill] sm:$0xff] %v7450_v36 }
 0x2bb   : > { %5278 = vmatmul.msk.f32.gmra.mxu3 %vm484_vm0, %v5246_v23  ;;  %1747 = vmatmul.f32.gmra.mxu1 %v5245_v31  ;;  %v7472_v23 = vpop.f32.mrf.mxu0 }
 0x2bc   : > { %9637 = vst [vmem:[#allocation45_spill] sm:$0xff] %v7472_v23  ;;  %v5252_v23 = vld [vmem:[%s9568_s1 + $0x428] sm:$0xff] }
 0x2be   : > { %v7461_v45 = vpop.f32.mrf.mxu3 }
 0x2c0   : > { %v1703_v36 = vpop.f32.mrf.mxu1 }
 0x2c3   : > { %5279 = vmatmul.msk.f32.gmra.mxu3 %vm484_vm0, %v5248_v2  ;;  %1750 = vmatmul.f32.gmra.mxu1 %v5247_v22  ;;  %v7483_v22 = vpop.f32.mrf.mxu2 }
 0x2c6   : > { %v1792_v31 = vpop.f32.mrf.mxu3 }
 0x2c7   : > { %v1793_v24 = vadd.f32 %v1792_v31, %v1703_v36  ;;  %v7485_v31 = vpop.f32.mrf.mxu0 }
 0x2c8   : > { %v1706_v50 = vpop.f32.mrf.mxu1  ;;  %9638 = vst [vmem:[#allocation46_spill] sm:$0xff] %v7485_v31  ;;  %v5253_v31 = vld [vmem:[%s9568_s1 + $0x430] sm:$0xff] }
 0x2c9   : > { %5296 = vmatmul.msk.f32.vlgmr.msra.gmra.mxu0 %vm1051_vm2, %v1793_v24  ;;  %5321 = vmatmul.msk.f32.vlgmr.msra.gmra.mxu2 %vm1051_vm2, %v1793_v24 }
 0x2cb   : > { %5280 = vmatmul.msk.f32.gmra.mxu3 %vm484_vm0, %v5250_v52  ;;  %1753 = vmatmul.f32.gmra.mxu1 %v5249_v60  ;;  %v7496_v60 = vpop.f32.mrf.mxu2 }
 0x2ce   : > { %v1795_v2 = vpop.f32.mrf.mxu3 }
 0x2cf   : > { %v1796_v36 = vadd.f32 %v1795_v2, %v1706_v50  ;;  %v5254_v50 = vld [vmem:[%s9568_s1 + $0x438] sm:$0xff] }
 0x2d0   : > { %v1709_v37 = vpop.f32.mrf.mxu1 }
 0x2d1   : > { %5297 = vmatmul.msk.f32.gmra.mxu0 %vm1051_vm2, %v1796_v36  ;;  %5322 = vmatmul.msk.f32.gmra.mxu2 %vm1051_vm2, %v1796_v36  ;;  %v7506_v36 = vpop.f32.mrf.mxu0 }
 0x2d2   : > { %9639 = vst [vmem:[#allocation47_spill] sm:$0xff] %v7506_v36  ;;  %v5257_v36 = vld [vmem:[%s9568_s1 + $0x450] sm:$0xff] }
 0x2d3   : > { %5281 = vmatmul.msk.f32.gmra.mxu3 %vm484_vm0, %v5252_v23  ;;  %1756 = vmatmul.f32.gmra.mxu1 %v5251_v18  ;;  %v7509_v23 = vpop.f32.mrf.mxu2 }
 0x2d6   : > { %v1798_v52 = vpop.f32.mrf.mxu3 }
 0x2d7   : > { %v1799_v24 = vadd.f32 %v1798_v52, %v1709_v37  ;;  %v5256_v52 = vld [vmem:[%s9568_s1 + $0x448] sm:$0xff] }
 0x2d8   : > { %v1712_v2 = vpop.f32.mrf.mxu1 }
 0x2d9   : > { %5298 = vmatmul.msk.f32.gmra.mxu0 %vm1051_vm2, %v1799_v24  ;;  %5323 = vmatmul.msk.f32.gmra.mxu2 %vm1051_vm2, %v1799_v24 }
 0x2db   : > { %5282 = vmatmul.msk.f32.gmra.mxu3 %vm484_vm0, %v5254_v50  ;;  %1759 = vmatmul.f32.gmra.mxu1 %v5253_v31  ;;  %v7520_v31 = vpop.f32.mrf.mxu0 }
 0x2dc   : > { %9640 = vst [vmem:[#allocation48_spill] sm:$0xff] %v7520_v31 }
 0x2de   : > { %v1801_v18 = vpop.f32.mrf.mxu3 }
 0x2df   : > { %v1802_v37 = vadd.f32 %v1801_v18, %v1712_v2  ;;  %v5258_v2 = vld [vmem:[%s9568_s1 + $0x458] sm:$0xff] }
 0x2e0   : > { %v1715_v62 = vpop.f32.mrf.mxu1 }
 0x2e1   : > { %5299 = vmatmul.msk.f32.gmra.mxu0 %vm1051_vm2, %v1802_v37  ;;  %5324 = vmatmul.msk.f32.gmra.mxu2 %vm1051_vm2, %v1802_v37  ;;  %v7530_v37 = vpop.f32.mrf.mxu2 }
 0x2e3   : > { %5283 = vmatmul.msk.f32.gmra.mxu3 %vm484_vm0, %v5256_v52  ;;  %1762 = vmatmul.f32.gmra.mxu1 %v5255_v10  ;;  %v7533_v10 = vpop.f32.mrf.mxu0 }
 0x2e4   : > { %9641 = vst [vmem:[#allocation49_spill] sm:$0xff] %v7533_v10 }
 0x2e6   : > { %v1804_v24 = vpop.f32.mrf.mxu3 }
 0x2e7   : > { %v1805_v50 = vadd.f32 %v1804_v24, %v1715_v62  ;;  %v5260_v24 = vld [vmem:[%s9568_s1 + $0x468] sm:$0xff] }
 0x2e8   : > { %v1718_v18 = vpop.f32.mrf.mxu1 }
 0x2e9   : > { %5300 = vmatmul.msk.f32.gmra.mxu0 %vm1051_vm2, %v1805_v50  ;;  %5325 = vmatmul.msk.f32.gmra.mxu2 %vm1051_vm2, %v1805_v50 }
 0x2eb   : > { %5284 = vmatmul.msk.f32.gmra.mxu3 %vm484_vm0, %v5258_v2  ;;  %1765 = vmatmul.f32.gmra.mxu1 %v5257_v36  ;;  %v7544_v36 = vpop.f32.mrf.mxu2 }
 0x2ee   : > { %v1807_v62 = vpop.f32.mrf.mxu3 }
 0x2ef   : > { %v1808_v52 = vadd.f32 %v1807_v62, %v1718_v18  ;;  %v7546_v18 = vpop.f32.mrf.mxu0  ;;  %v5262_v62 = vld [vmem:[%s9568_s1 + $0x478] sm:$0xff] }
 0x2f0   : > { %v1721_v31 = vpop.f32.mrf.mxu1  ;;  %9642 = vst [vmem:[#allocation50_spill] sm:$0xff] %v7546_v18  ;;  %v5345_v18 = vld [vmem:[%s9568_s1 + $0x480] sm:$0xff] }
 0x2f1   : > { %5301 = vmatmul.msk.f32.gmra.mxu0 %vm1051_vm2, %v1808_v52  ;;  %5326 = vmatmul.msk.f32.gmra.mxu2 %vm1051_vm2, %v1808_v52 }
 0x2f3   : > { %5285 = vmatmul.msk.f32.gmra.mxu3 %vm484_vm0, %v5260_v24  ;;  %1768 = vmatmul.f32.gmra.mxu1 %v5259_v43  ;;  %v7557_v43 = vpop.f32.mrf.mxu2  ;;  %v5346_v24 = vld [vmem:[%s9568_s1 + $0x488] sm:$0xff] }
 0x2f6   : > { %v1810_v50 = vpop.f32.mrf.mxu3 }
 0x2f7   : > { %v1811_v2 = vadd.f32 %v1810_v50, %v1721_v31 }
 0x2f8   : > { %v1724_v10 = vpop.f32.mrf.mxu1 }
 0x2f9   : > { %5302 = vmatmul.msk.f32.gmra.mxu0 %vm1051_vm2, %v1811_v2  ;;  %5327 = vmatmul.msk.f32.gmra.mxu2 %vm1051_vm2, %v1811_v2  ;;  %v7567_v2 = vpop.f32.mrf.mxu0 }
 0x2fa   : > { %9643 = vst [vmem:[#allocation51_spill] sm:$0xff] %v7567_v2  ;;  %v5349_v2 = vld [vmem:[%s9568_s1 + $0x4a0] sm:$0xff] }
 0x2fb   : > { %5286 = vmatmul.msk.f32.gmra.mxu3 %vm484_vm0, %v5262_v62  ;;  %1771 = vmatmul.f32.gmra.mxu1 %v5261_v7  ;;  %v7570_v62 = vpop.f32.mrf.mxu2 }
 0x2fe   : > { %v1813_v31 = vpop.f32.mrf.mxu3 }
 0x2ff   : > { %v1814_v52 = vadd.f32 %v1813_v31, %v1724_v10  ;;  %v5348_v31 = vld [vmem:[%s9568_s1 + $0x498] sm:$0xff] }
 0x300   : > { %v1727_v50 = vpop.f32.mrf.mxu1 }
 0x301   : > { %5303 = vmatmul.msk.f32.gmra.mxu0 %vm1051_vm2, %v1814_v52  ;;  %5328 = vmatmul.msk.f32.gmra.mxu2 %vm1051_vm2, %v1814_v52 }
 0x303   : > { %5393 = vmatmul.msk.f32.vlgmr.msrb.gmra.mxu3 %vm484_vm0, %v5346_v24  ;;  %2314 = vmatmul.f32.vlgmr.msra.gmra.mxu1 %v5345_v18  ;;  %v7581_v18 = vpop.f32.mrf.mxu0 }
 0x304   : > { %9644 = vst [vmem:[#allocation52_spill] sm:$0xff] %v7581_v18 }
 0x306   : > { %v1816_v7 = vpop.f32.mrf.mxu3 }
 0x307   : > { %v1817_v10 = vadd.f32 %v1816_v7, %v1727_v50  ;;  %v5350_v50 = vld [vmem:[%s9568_s1 + $0x4a8] sm:$0xff] }
 0x308   : > { %v1730_v8 = vpop.f32.mrf.mxu1 }
 0x309   : > { %5304 = vmatmul.msk.f32.gmra.mxu0 %vm1051_vm2, %v1817_v10  ;;  %5329 = vmatmul.msk.f32.gmra.mxu2 %vm1051_vm2, %v1817_v10  ;;  %v7591_v10 = vpop.f32.mrf.mxu2 }
 0x30b   : > { %5394 = vmatmul.msk.f32.gmra.mxu3 %vm484_vm0, %v5348_v31  ;;  %2317 = vmatmul.f32.gmra.mxu1 %v5347_v4  ;;  %v7594_v4 = vpop.f32.mrf.mxu0 }
 0x30c   : > { %9645 = vst [vmem:[#allocation53_spill] sm:$0xff] %v7594_v4 }
 0x30e   : > { %v1819_v52 = vpop.f32.mrf.mxu3 }
 0x30f   : > { %v1820_v24 = vadd.f32 %v1819_v52, %v1730_v8  ;;  %v5352_v52 = vld [vmem:[%s9568_s1 + $0x4b8] sm:$0xff] }
 0x310   : > { %v1733_v7 = vpop.f32.mrf.mxu1 }
 0x311   : > { %5305 = vmatmul.msk.f32.gmra.mxu0 %vm1051_vm2, %v1820_v24  ;;  %5330 = vmatmul.msk.f32.gmra.mxu2 %vm1051_vm2, %v1820_v24 }
 0x313   : > { %5395 = vmatmul.msk.f32.gmra.mxu3 %vm484_vm0, %v5350_v50  ;;  %2320 = vmatmul.f32.gmra.mxu1 %v5349_v2  ;;  %v7605_v2 = vpop.f32.mrf.mxu2 }
 0x316   : > { %v1822_v8 = vpop.f32.mrf.mxu3 }
 0x317   : > { %v1823_v31 = vadd.f32 %v1822_v8, %v1733_v7  ;;  %v7607_v7 = vpop.f32.mrf.mxu0  ;;  %v5354_v8 = vld [vmem:[%s9568_s1 + $0x4c8] sm:$0xff] }
 0x318   : > { %v1736_v18 = vpop.f32.mrf.mxu1  ;;  %9646 = vst [vmem:[#allocation54_spill] sm:$0xff] %v7607_v7  ;;  %v5355_v7 = vld [vmem:[%s9568_s1 + $0x4d0] sm:$0xff] }
 0x319   : > { %5306 = vmatmul.msk.f32.gmra.mxu0 %vm1051_vm2, %v1823_v31  ;;  %5331 = vmatmul.msk.f32.gmra.mxu2 %vm1051_vm2, %v1823_v31 }
 0x31b   : > { %5396 = vmatmul.msk.f32.gmra.mxu3 %vm484_vm0, %v5352_v52  ;;  %2323 = vmatmul.f32.gmra.mxu1 %v5351_v54  ;;  %v7618_v54 = vpop.f32.mrf.mxu2  ;;  %v5356_v52 = vld [vmem:[%s9568_s1 + $0x4d8] sm:$0xff] }
 0x31e   : > { %v1825_v24 = vpop.f32.mrf.mxu3 }
 0x31f   : > { %v1826_v50 = vadd.f32 %v1825_v24, %v1736_v18 }
 0x320   : > { %v1739_v4 = vpop.f32.mrf.mxu1 }
 0x321   : > { %5307 = vmatmul.msk.f32.gmra.mxu0 %vm1051_vm2, %v1826_v50  ;;  %5332 = vmatmul.msk.f32.gmra.mxu2 %vm1051_vm2, %v1826_v50  ;;  %v7628_v50 = vpop.f32.mrf.mxu0 }
 0x322   : > { %9647 = vst [vmem:[#allocation55_spill] sm:$0xff] %v7628_v50  ;;  %v5359_v50 = vld [vmem:[%s9568_s1 + $0x4f0] sm:$0xff] }
 0x323   : > { %5397 = vmatmul.msk.f32.gmra.mxu3 %vm484_vm0, %v5354_v8  ;;  %2326 = vmatmul.f32.gmra.mxu1 %v5353_v1  ;;  %v7631_v8 = vpop.f32.mrf.mxu2 }
 0x326   : > { %v1828_v18 = vpop.f32.mrf.mxu3 }
 0x327   : > { %v1829_v31 = vadd.f32 %v1828_v18, %v1739_v4  ;;  %v5358_v18 = vld [vmem:[%s9568_s1 + $0x4e8] sm:$0xff] }
 0x328   : > { %v1742_v24 = vpop.f32.mrf.mxu1 }
 0x329   : > { %5308 = vmatmul.msk.f32.gmra.mxu0 %vm1051_vm2, %v1829_v31  ;;  %5333 = vmatmul.msk.f32.gmra.mxu2 %vm1051_vm2, %v1829_v31 }
 0x32b   : > { %5398 = vmatmul.msk.f32.gmra.mxu3 %vm484_vm0, %v5356_v52  ;;  %2329 = vmatmul.f32.gmra.mxu1 %v5355_v7  ;;  %v7642_v7 = vpop.f32.mrf.mxu0 }
 0x32c   : > { %9648 = vst [vmem:[#allocation56_spill] sm:$0xff] %v7642_v7 }
 0x32e   : > { %v1831_v1 = vpop.f32.mrf.mxu3 }
 0x32f   : > { %v1832_v4 = vadd.f32 %v1831_v1, %v1742_v24  ;;  %v5360_v24 = vld [vmem:[%s9568_s1 + $0x4f8] sm:$0xff] }
 0x330   : > { %v1745_v51 = vpop.f32.mrf.mxu1 }
 0x331   : > { %5309 = vmatmul.msk.f32.gmra.mxu0 %vm1051_vm2, %v1832_v4  ;;  %5334 = vmatmul.msk.f32.gmra.mxu2 %vm1051_vm2, %v1832_v4  ;;  %v7652_v4 = vpop.f32.mrf.mxu2 }
 0x333   : > { %5399 = vmatmul.msk.f32.gmra.mxu3 %vm484_vm0, %v5358_v18  ;;  %2332 = vmatmul.f32.gmra.mxu1 %v5357_v61  ;;  %v7655_v61 = vpop.f32.mrf.mxu0 }
 0x334   : > { %9649 = vst [vmem:[#allocation57_spill] sm:$0xff] %v7655_v61 }
 0x336   : > { %v1834_v31 = vpop.f32.mrf.mxu3 }
 0x337   : > { %v1835_v52 = vadd.f32 %v1834_v31, %v1745_v51  ;;  %v5362_v31 = vld [vmem:[%s9568_s1 + $0x508] sm:$0xff] }
 0x338   : > { %v1748_v1 = vpop.f32.mrf.mxu1 }
 0x339   : > { %5310 = vmatmul.msk.f32.gmra.mxu0 %vm1051_vm2, %v1835_v52  ;;  %5335 = vmatmul.msk.f32.gmra.mxu2 %vm1051_vm2, %v1835_v52 }
 0x33b   : > { %5400 = vmatmul.msk.f32.gmra.mxu3 %vm484_vm0, %v5360_v24  ;;  %2335 = vmatmul.f32.gmra.mxu1 %v5359_v50  ;;  %v7666_v50 = vpop.f32.mrf.mxu2 }
 0x33e   : > { %v1837_v51 = vpop.f32.mrf.mxu3 }
 0x33f   : > { %v1838_v18 = vadd.f32 %v1837_v51, %v1748_v1  ;;  %v5364_v51 = vld [vmem:[%s9568_s1 + $0x518] sm:$0xff] }
 0x340   : > { %v1751_v7 = vpop.f32.mrf.mxu1 }
 0x341   : > { %5311 = vmatmul.msk.f32.gmra.mxu0 %vm1051_vm2, %v1838_v18  ;;  %5336 = vmatmul.msk.f32.gmra.mxu2 %vm1051_vm2, %v1838_v18 }
 0x343   : > { %5401 = vmatmul.msk.f32.gmra.mxu3 %vm484_vm0, %v5362_v31  ;;  %2338 = vmatmul.f32.gmra.mxu1 %v5361_v27  ;;  %v1494_v27 = vadd.f32 %v7260_v57, %v7140_v47  ;;  %v5424_v47 = vld [vmem:[%s9569_s2 + $0xf8] sm:$0xf] }
 0x344   : > { %5450 = vmatpush.msk.msrb.mxu2 %vm1124_vm1, %v5424_v47 }
 0x346   : > { %v1840_v52 = vpop.f32.mrf.mxu3  ;;  %v7668_v24 = vpop.f32.mrf.mxu0 }
 0x347   : > { %9650 = vst [vmem:[#allocation58_spill] sm:$0xff] %v7668_v24  ;;  %v1841_v1 = vadd.f32 %v1840_v52, %v1751_v7 }
 0x348   : > { %v1754_v61 = vpop.f32.mrf.mxu1 }
 0x349   : > { %5312 = vmatmul.msk.f32.gmra.mxu0 %vm1051_vm2, %v1841_v1  ;;  %5337 = vmatmul.msk.f32.gmra.mxu2 %vm1051_vm2, %v1841_v1  ;;  %v5365_v1 = vld [vmem:[%s9568_s1 + $0x520] sm:$0xff] }
 0x34b   : > { %5402 = vmatmul.msk.f32.gmra.mxu3 %vm484_vm0, %v5364_v51  ;;  %2341 = vmatmul.f32.gmra.mxu1 %v5363_v58  ;;  %v1497_v58 = vadd.f32 %v7280_v14, %v7147_v40  ;;  %v5367_v40 = vld [vmem:[%s9568_s1 + $0x530] sm:$0xff] }
 0x34c   : > { %v2057_v7 = vpop.f32.mrf.mxu2 }
 0x34d   : > { %v7681_v18 = vadd.f32 %v2057_v7, %v1494_v27 }
 0x34e   : > { %v1843_v31 = vpop.f32.mrf.mxu3  ;;  %v7683_v52 = vpop.f32.mrf.mxu0 }
 0x34f   : > { %v1844_v24 = vadd.f32 %v1843_v31, %v1754_v61  ;;  %v5368_v31 = vld [vmem:[%s9568_s1 + $0x538] sm:$0xff] }
 0x350   : > { %v1757_v46 = vpop.f32.mrf.mxu1 }
 0x351   : > { %5313 = vmatmul.msk.f32.gmra.mxu0 %vm1051_vm2, %v1844_v24  ;;  %5338 = vmatmul.msk.f32.gmra.mxu2 %vm1051_vm2, %v1844_v24  ;;  %v5423_v24 = vld [vmem:[%s9569_s2 + $0xf0] sm:$0xf] }
 0x352   : > { %5425 = vmatpush.msk.msrb.mxu0 %vm1124_vm1, %v5423_v24 }
 0x353   : > { %5403 = vmatmul.msk.f32.gmra.mxu3 %vm484_vm0, %v5366_v20  ;;  %2344 = vmatmul.f32.gmra.mxu1 %v5365_v1 }
 0x354   : > { %v2060_v57 = vpop.f32.mrf.mxu2 }
 0x355   : > { %v7700_v61 = vadd.f32 %v2060_v57, %v1497_v58 }
 0x356   : > { %v1846_v51 = vpop.f32.mrf.mxu3  ;;  %v7702_v27 = vpop.f32.mrf.mxu0 }
 0x357   : > { %v1847_v7 = vadd.f32 %v1846_v51, %v1757_v46  ;;  %v1500_v46 = vadd.f32 %v7303_v26, %v7154_v49  ;;  %v5370_v51 = vld [vmem:[%s9568_s1 + $0x548] sm:$0xff]  ;;  %v1503_v49 = vadd.f32 %v7319_v48, %v7161_v29  ;;  %v5419_v29 = vld [vmem:[%s9569_s2 + $0xd0] sm:$0xff]  ;;  %v5420_v48 = vld [vmem:[%s9569_s2 + $0xd8] sm:$0xff] }
 0x358   : > { %v1760_v47 = vpop.f32.mrf.mxu1 }
 0x359   : > { %5314 = vmatmul.msk.f32.gmra.mxu0 %vm1051_vm2, %v1847_v7  ;;  %5339 = vmatmul.msk.f32.gmra.mxu2 %vm1051_vm2, %v1847_v7  ;;  %v5369_v7 = vld [vmem:[%s9568_s1 + $0x540] sm:$0xff] }
 0x35b   : > { %5404 = vmatmul.msk.f32.gmra.mxu3 %vm484_vm0, %v5368_v31  ;;  %2347 = vmatmul.f32.gmra.mxu1 %v5367_v40  ;;  %v5421_v31 = vld [vmem:[%s9569_s2 + $0xe0] sm:$0xff] }
 0x35c   : > { %v2063_v14 = vpop.f32.mrf.mxu2  ;;  %2576 = vmatpush.msrb.mxu0 %v5421_v31 }
 0x35d   : > { %v7719_v20 = vadd.f32 %v2063_v14, %v1500_v46 }
 0x35e   : > { %v1849_v1 = vpop.f32.mrf.mxu3  ;;  %v7721_v58 = vpop.f32.mrf.mxu0  ;;  %2577 = vmatpush.msrb.mxu0 %v5419_v29 }
 0x35f   : > { %v1850_v57 = vadd.f32 %v1849_v1, %v1760_v47  ;;  %v5422_v47 = vld [vmem:[%s9569_s2 + $0xe8] sm:$0xff] }
 0x360   : > { %v1763_v24 = vpop.f32.mrf.mxu1  ;;  %2665 = vmatpush.msrb.mxu2 %v5422_v47 }
 0x361   : > { %5315 = vmatmul.msk.f32.gmra.mxu0 %vm1051_vm2, %v1850_v57  ;;  %5340 = vmatmul.msk.f32.gmra.mxu2 %vm1051_vm2, %v1850_v57  ;;  %v5417_v57 = vld [vmem:[%s9569_s2 + $0xc0] sm:$0xff] }
 0x362   : > { %2666 = vmatpush.msrb.mxu2 %v5420_v48  ;;  %2578 = vmatpush.msrb.mxu0 %v5417_v57  ;;  %v5373_v57 = vld [vmem:[%s9568_s1 + $0x560] sm:$0xff] }
 0x363   : > { %5405 = vmatmul.msk.f32.gmra.mxu3 %vm484_vm0, %v5370_v51  ;;  %2350 = vmatmul.f32.gmra.mxu1 %v5369_v7  ;;  %v5418_v51 = vld [vmem:[%s9569_s2 + $0xc8] sm:$0xff]  ;;  %v5372_v7 = vld [vmem:[%s9568_s1 + $0x558] sm:$0xff] }
 0x364   : > { %v2066_v26 = vpop.f32.mrf.mxu2  ;;  %2667 = vmatpush.msrb.mxu2 %v5418_v51 }
 0x365   : > { %v7740_v40 = vadd.f32 %v2066_v26, %v1503_v49  ;;  %v5371_v26 = vld [vmem:[%s9568_s1 + $0x550] sm:$0xff] }
 0x366   : > { %v1852_v46 = vpop.f32.mrf.mxu3  ;;  %v7742_v14 = vpop.f32.mrf.mxu0 }
 0x367   : > { %9651 = vst [vmem:[#allocation59_spill] sm:$0xff] %v7742_v14  ;;  %v1853_v1 = vadd.f32 %v1852_v46, %v1763_v24  ;;  %v1506_v24 = vadd.f32 %v7334_v35, %v7168_v0  ;;  %v5374_v14 = vld [vmem:[%s9568_s1 + $0x568] sm:$0xff]  ;;  %v1509_v0 = vadd.f32 %v7351_v59, %v7175_v3  ;;  %v1512_v3 = vadd.f32 %v7381_v34, %v7182_v6 }
 0x368   : > { %v1766_v49 = vpop.f32.mrf.mxu1  ;;  %v1515_v6 = vadd.f32 %v7404_v5, %v7189_v9  ;;  %v1518_v9 = vadd.f32 %v7431_v25, %v7202_v15  ;;  %v1521_v15 = vadd.f32 %v7448_v30, %v7221_v28  ;;  %v1524_v28 = vadd.f32 %v7469_v16, %v7240_v53 }
 0x369   : > { %5316 = vmatmul.msk.f32.gmra.mxu0 %vm1051_vm2, %v1853_v1  ;;  %5341 = vmatmul.msk.f32.gmra.mxu2 %vm1051_vm2, %v1853_v1  ;;  %v1527_v53 = vadd.f32 %v7483_v22, %v7262_v63  ;;  %v1530_v63 = vadd.f32 %v7496_v60, %v7278_v13  ;;  %v1533_v13 = vadd.f32 %v7509_v23, %v7293_v21 }
 0x36a   : > { %v1536_v21 = vadd.f32 %v7530_v37, %v7308_v32  ;;  %v1539_v32 = vadd.f32 %v7544_v36, %v7321_v39  ;;  %v1542_v39 = vadd.f32 %v7557_v43, %v7336_v33  ;;  %v1545_v33 = vadd.f32 %v7570_v62, %v7349_v44 }
 0x36b   : > { %5406 = vmatmul.msk.f32.gmra.mxu3 %vm484_vm0, %v5372_v7  ;;  %2353 = vmatmul.f32.gmra.mxu1 %v5371_v26  ;;  %v1548_v44 = vadd.f32 %v7591_v10, %v7368_v12  ;;  %v1551_v12 = vadd.f32 %v7605_v2, %v7387_v38  ;;  %v1554_v38 = vadd.f32 %v7618_v54, %v7406_v19 }
 0x36c   : > { %v2069_v31 = vpop.f32.mrf.mxu2  ;;  %v1557_v19 = vadd.f32 %v7631_v8, %v7433_v17  ;;  %v1560_v17 = vadd.f32 %v7652_v4, %v7446_v42  ;;  %v1563_v42 = vadd.f32 %v7666_v50, %v7461_v45 }
 0x36d   : > { %v7767_v47 = vadd.f32 %v2069_v31, %v1506_v24  ;;  %v5376_v24 = vld [vmem:[%s9568_s1 + $0x578] sm:$0xff] }
 0x36e   : > { %v1855_v46 = vpop.f32.mrf.mxu3  ;;  %v7769_v29 = vpop.f32.mrf.mxu0 }
 0x36f   : > { %v1856_v48 = vadd.f32 %v1855_v46, %v1766_v49  ;;  %v5375_v46 = vld [vmem:[%s9568_s1 + $0x570] sm:$0xff] }
 0x370   : > { %v1769_v1 = vpop.f32.mrf.mxu1 }
 0x371   : > { %5317 = vmatmul.msk.f32.gmra.mxu0 %vm1051_vm2, %v1856_v48  ;;  %5342 = vmatmul.msk.f32.gmra.mxu2 %vm1051_vm2, %v1856_v48 }
 0x373   : > { %5407 = vmatmul.msk.f32.gmra.mxu3 %vm484_vm0, %v5374_v14  ;;  %2356 = vmatmul.f32.gmra.mxu1 %v5373_v57 }
 0x374   : > { %v2072_v35 = vpop.f32.mrf.mxu2 }
 0x375   : > { %v7782_v51 = vadd.f32 %v2072_v35, %v1509_v0  ;;  %v5378_v0 = vld [vmem:[%s9568_s1 + $0x588] sm:$0xff] }
 0x376   : > { %v1858_v7 = vpop.f32.mrf.mxu3  ;;  %v7784_v49 = vpop.f32.mrf.mxu0 }
 0x377   : > { %v1859_v26 = vadd.f32 %v1858_v7, %v1769_v1  ;;  %v5377_v7 = vld [vmem:[%s9568_s1 + $0x580] sm:$0xff] }
 0x378   : > { %v1772_v31 = vpop.f32.mrf.mxu1 }
 0x379   : > { %5318 = vmatmul.msk.f32.gmra.mxu0 %vm1051_vm2, %v1859_v26  ;;  %5343 = vmatmul.msk.f32.gmra.mxu2 %vm1051_vm2, %v1859_v26 }
 0x37b   : > { %5408 = vmatmul.msk.f32.gmra.mxu3 %vm484_vm0, %v5376_v24  ;;  %2359 = vmatmul.f32.gmra.mxu1 %v5375_v46 }
 0x37c   : > { %v2075_v59 = vpop.f32.mrf.mxu2 }
 0x37d   : > { %v7797_v14 = vadd.f32 %v2075_v59, %v1512_v3  ;;  %v5380_v3 = vld [vmem:[%s9568_s1 + $0x598] sm:$0xff] }
 0x37e   : > { %v1861_v48 = vpop.f32.mrf.mxu3  ;;  %v7799_v1 = vpop.f32.mrf.mxu0 }
 0x37f   : > { %v1862_v57 = vadd.f32 %v1861_v48, %v1772_v31  ;;  %v5379_v48 = vld [vmem:[%s9568_s1 + $0x590] sm:$0xff] }
 0x380   : > { %v2315_v35 = vpop.f32.mrf.mxu1 }
 0x381   : > { %5319 = vmatmul.msk.f32.gmra.mxu0 %vm1051_vm2, %v1862_v57  ;;  %5344 = vmatmul.msk.f32.gmra.mxu2 %vm1051_vm2, %v1862_v57 }
 0x383   : > { %5409 = vmatmul.msk.f32.gmra.mxu3 %vm484_vm0, %v5378_v0  ;;  %2362 = vmatmul.f32.gmra.mxu1 %v5377_v7 }
 0x384   : > { %v2078_v34 = vpop.f32.mrf.mxu2 }
 0x385   : > { %v7812_v26 = vadd.f32 %v2078_v34, %v1515_v6  ;;  %v5382_v6 = vld [vmem:[%s9568_s1 + $0x5a8] sm:$0xff] }
 0x386   : > { %v7814_v24 = vpop.f32.mrf.mxu0  ;;  %v2404_v31 = vpop.f32.mrf.mxu3 }
 0x387   : > { %v2405_v46 = vadd.f32 %v2404_v31, %v2315_v35  ;;  %v5381_v31 = vld [vmem:[%s9568_s1 + $0x5a0] sm:$0xff] }
 0x388   : > { %v2318_v59 = vpop.f32.mrf.mxu1 }
 0x389   : > { %5426 = vmatmul.msk.f32.vlgmr.msrb.gmra.mxu0 %vm1051_vm2, %v2405_v46  ;;  %5451 = vmatmul.msk.f32.vlgmr.msrb.gmra.mxu2 %vm1051_vm2, %v2405_v46 }
 0x38b   : > { %5410 = vmatmul.msk.f32.gmra.mxu3 %vm484_vm0, %v5380_v3  ;;  %2365 = vmatmul.f32.gmra.mxu1 %v5379_v48 }
 0x38c   : > { %v2081_v5 = vpop.f32.mrf.mxu2 }
 0x38d   : > { %v7827_v57 = vadd.f32 %v2081_v5, %v1518_v9  ;;  %v5384_v9 = vld [vmem:[%s9568_s1 + $0x5b8] sm:$0xff] }
 0x38e   : > { %v7829_v0 = vpop.f32.mrf.mxu0  ;;  %v2407_v35 = vpop.f32.mrf.mxu3 }
 0x38f   : > { %v2408_v7 = vadd.f32 %v2407_v35, %v2318_v59  ;;  %v5383_v35 = vld [vmem:[%s9568_s1 + $0x5b0] sm:$0xff] }
 0x390   : > { %v2321_v34 = vpop.f32.mrf.mxu1 }
 0x391   : > { %5427 = vmatmul.msk.f32.gmra.mxu0 %vm1051_vm2, %v2408_v7  ;;  %5452 = vmatmul.msk.f32.gmra.mxu2 %vm1051_vm2, %v2408_v7 }
 0x393   : > { %5411 = vmatmul.msk.f32.gmra.mxu3 %vm484_vm0, %v5382_v6  ;;  %2368 = vmatmul.f32.gmra.mxu1 %v5381_v31 }
 0x394   : > { %v2084_v25 = vpop.f32.mrf.mxu2 }
 0x395   : > { %v7842_v46 = vadd.f32 %v2084_v25, %v1521_v15  ;;  %v5386_v15 = vld [vmem:[%s9568_s1 + $0x5c8] sm:$0xff] }
 0x396   : > { %v7844_v3 = vpop.f32.mrf.mxu0  ;;  %v2410_v59 = vpop.f32.mrf.mxu3 }
 0x397   : > { %v2411_v48 = vadd.f32 %v2410_v59, %v2321_v34  ;;  %v5385_v59 = vld [vmem:[%s9568_s1 + $0x5c0] sm:$0xff] }
 0x398   : > { %v2324_v5 = vpop.f32.mrf.mxu1 }
 0x399   : > { %5428 = vmatmul.msk.f32.gmra.mxu0 %vm1051_vm2, %v2411_v48  ;;  %5453 = vmatmul.msk.f32.gmra.mxu2 %vm1051_vm2, %v2411_v48 }
 0x39b   : > { %5412 = vmatmul.msk.f32.gmra.mxu3 %vm484_vm0, %v5384_v9  ;;  %2371 = vmatmul.f32.gmra.mxu1 %v5383_v35 }
 0x39c   : > { %v2087_v30 = vpop.f32.mrf.mxu2 }
 0x39d   : > { %v7857_v7 = vadd.f32 %v2087_v30, %v1524_v28  ;;  %v5388_v28 = vld [vmem:[%s9568_s1 + $0x5d8] sm:$0xff] }
 0x39e   : > { %v7859_v6 = vpop.f32.mrf.mxu0  ;;  %v2413_v34 = vpop.f32.mrf.mxu3 }
 0x39f   : > { %v2414_v31 = vadd.f32 %v2413_v34, %v2324_v5  ;;  %v5387_v34 = vld [vmem:[%s9568_s1 + $0x5d0] sm:$0xff] }
 0x3a0   : > { %v2327_v25 = vpop.f32.mrf.mxu1 }
 0x3a1   : > { %5429 = vmatmul.msk.f32.gmra.mxu0 %vm1051_vm2, %v2414_v31  ;;  %5454 = vmatmul.msk.f32.gmra.mxu2 %vm1051_vm2, %v2414_v31 }
 0x3a3   : > { %5413 = vmatmul.msk.f32.gmra.mxu3 %vm484_vm0, %v5386_v15  ;;  %2374 = vmatmul.f32.gmra.mxu1 %v5385_v59 }
 0x3a4   : > { %v2090_v16 = vpop.f32.mrf.mxu2 }
 0x3a5   : > { %v7872_v48 = vadd.f32 %v2090_v16, %v1527_v53  ;;  %v5390_v53 = vld [vmem:[%s9568_s1 + $0x5e8] sm:$0xff] }
 0x3a6   : > { %v7874_v9 = vpop.f32.mrf.mxu0  ;;  %v2416_v5 = vpop.f32.mrf.mxu3 }
 0x3a7   : > { %v2417_v35 = vadd.f32 %v2416_v5, %v2327_v25  ;;  %v5389_v5 = vld [vmem:[%s9568_s1 + $0x5e0] sm:$0xff] }
 0x3a8   : > { %v2330_v30 = vpop.f32.mrf.mxu1 }
 0x3a9   : > { %5430 = vmatmul.msk.f32.gmra.mxu0 %vm1051_vm2, %v2417_v35  ;;  %5455 = vmatmul.msk.f32.gmra.mxu2 %vm1051_vm2, %v2417_v35 }
 0x3ab   : > { %5414 = vmatmul.msk.f32.gmra.mxu3 %vm484_vm0, %v5388_v28  ;;  %2377 = vmatmul.f32.gmra.mxu1 %v5387_v34 }
 0x3ac   : > { %v2093_v22 = vpop.f32.mrf.mxu2 }
 0x3ad   : > { %v7887_v31 = vadd.f32 %v2093_v22, %v1530_v63  ;;  %v5392_v63 = vld [vmem:[%s9568_s1 + $0x5f8] sm:$0xff] }
 0x3ae   : > { %v7889_v15 = vpop.f32.mrf.mxu0  ;;  %v2419_v25 = vpop.f32.mrf.mxu3 }
 0x3af   : > { %v2420_v59 = vadd.f32 %v2419_v25, %v2330_v30  ;;  %v5391_v25 = vld [vmem:[%s9568_s1 + $0x5f0] sm:$0xff] }
 0x3b0   : > { %v2333_v16 = vpop.f32.mrf.mxu1 }
 0x3b1   : > { %5431 = vmatmul.msk.f32.gmra.mxu0 %vm1051_vm2, %v2420_v59  ;;  %5456 = vmatmul.msk.f32.gmra.mxu2 %vm1051_vm2, %v2420_v59 }
 0x3b3   : > { %5415 = vmatmul.msk.f32.gmra.mxu3 %vm484_vm0, %v5390_v53  ;;  %2380 = vmatmul.f32.gmra.mxu1 %v5389_v5 }
 0x3b4   : > { %v2096_v60 = vpop.f32.mrf.mxu2 }
 0x3b5   : > { %v7902_v35 = vadd.f32 %v2096_v60, %v1533_v13  ;;  %v5476_v13 = vld [vmem:[%s9568_s1 + $0x608] sm:$0xff] }
 0x3b6   : > { %v7904_v28 = vpop.f32.mrf.mxu0  ;;  %v2422_v30 = vpop.f32.mrf.mxu3 }
 0x3b7   : > { %v2423_v34 = vadd.f32 %v2422_v30, %v2333_v16  ;;  %v5475_v30 = vld [vmem:[%s9568_s1 + $0x600] sm:$0xff] }
 0x3b8   : > { %v2336_v22 = vpop.f32.mrf.mxu1 }
 0x3b9   : > { %5432 = vmatmul.msk.f32.gmra.mxu0 %vm1051_vm2, %v2423_v34  ;;  %5457 = vmatmul.msk.f32.gmra.mxu2 %vm1051_vm2, %v2423_v34 }
 0x3bb   : > { %5416 = vmatmul.msk.f32.gmra.mxu3 %vm484_vm0, %v5392_v63  ;;  %2383 = vmatmul.f32.gmra.mxu1 %v5391_v25 }
 0x3bc   : > { %v2099_v23 = vpop.f32.mrf.mxu2 }
 0x3bd   : > { %v7917_v59 = vadd.f32 %v2099_v23, %v1536_v21  ;;  %v5478_v21 = vld [vmem:[%s9568_s1 + $0x618] sm:$0xff] }
 0x3be   : > { %v7919_v53 = vpop.f32.mrf.mxu0  ;;  %v2425_v16 = vpop.f32.mrf.mxu3 }
 0x3bf   : > { %v2426_v5 = vadd.f32 %v2425_v16, %v2336_v22  ;;  %v5477_v16 = vld [vmem:[%s9568_s1 + $0x610] sm:$0xff] }
 0x3c0   : > { %v2339_v60 = vpop.f32.mrf.mxu1 }
 0x3c1   : > { %5433 = vmatmul.msk.f32.gmra.mxu0 %vm1051_vm2, %v2426_v5  ;;  %5458 = vmatmul.msk.f32.gmra.mxu2 %vm1051_vm2, %v2426_v5 }
 0x3c3   : > { %5523 = vmatmul.msk.f32.vlgmr.msra.gmra.mxu3 %vm484_vm0, %v5476_v13  ;;  %2926 = vmatmul.f32.vlgmr.msrb.gmra.mxu1 %v5475_v30 }
 0x3c4   : > { %v2102_v37 = vpop.f32.mrf.mxu2 }
 0x3c5   : > { %v7932_v34 = vadd.f32 %v2102_v37, %v1539_v32  ;;  %v5480_v32 = vld [vmem:[%s9568_s1 + $0x628] sm:$0xff] }
 0x3c6   : > { %v7934_v63 = vpop.f32.mrf.mxu0  ;;  %v2428_v22 = vpop.f32.mrf.mxu3 }
 0x3c7   : > { %v2429_v25 = vadd.f32 %v2428_v22, %v2339_v60  ;;  %v5479_v22 = vld [vmem:[%s9568_s1 + $0x620] sm:$0xff] }
 0x3c8   : > { %v2342_v23 = vpop.f32.mrf.mxu1 }
 0x3c9   : > { %5434 = vmatmul.msk.f32.gmra.mxu0 %vm1051_vm2, %v2429_v25  ;;  %5459 = vmatmul.msk.f32.gmra.mxu2 %vm1051_vm2, %v2429_v25 }
 0x3cb   : > { %5524 = vmatmul.msk.f32.gmra.mxu3 %vm484_vm0, %v5478_v21  ;;  %2929 = vmatmul.f32.gmra.mxu1 %v5477_v16 }
 0x3cc   : > { %v2105_v36 = vpop.f32.mrf.mxu2 }
 0x3cd   : > { %v7947_v5 = vadd.f32 %v2105_v36, %v1542_v39  ;;  %v5482_v39 = vld [vmem:[%s9568_s1 + $0x638] sm:$0xff] }
 0x3ce   : > { %v7949_v13 = vpop.f32.mrf.mxu0  ;;  %v2431_v60 = vpop.f32.mrf.mxu3 }
 0x3cf   : > { %v2432_v30 = vadd.f32 %v2431_v60, %v2342_v23  ;;  %v5481_v60 = vld [vmem:[%s9568_s1 + $0x630] sm:$0xff] }
 0x3d0   : > { %v2345_v37 = vpop.f32.mrf.mxu1 }
 0x3d1   : > { %5435 = vmatmul.msk.f32.gmra.mxu0 %vm1051_vm2, %v2432_v30  ;;  %5460 = vmatmul.msk.f32.gmra.mxu2 %vm1051_vm2, %v2432_v30 }
 0x3d3   : > { %5525 = vmatmul.msk.f32.gmra.mxu3 %vm484_vm0, %v5480_v32  ;;  %2932 = vmatmul.f32.gmra.mxu1 %v5479_v22 }
 0x3d4   : > { %v2108_v43 = vpop.f32.mrf.mxu2 }
 0x3d5   : > { %v7962_v25 = vadd.f32 %v2108_v43, %v1545_v33  ;;  %v5484_v33 = vld [vmem:[%s9568_s1 + $0x648] sm:$0xff] }
 0x3d6   : > { %v7964_v21 = vpop.f32.mrf.mxu0  ;;  %v2434_v23 = vpop.f32.mrf.mxu3 }
 0x3d7   : > { %v2435_v16 = vadd.f32 %v2434_v23, %v2345_v37  ;;  %v5483_v23 = vld [vmem:[%s9568_s1 + $0x640] sm:$0xff] }
 0x3d8   : > { %v2348_v36 = vpop.f32.mrf.mxu1 }
 0x3d9   : > { %5436 = vmatmul.msk.f32.gmra.mxu0 %vm1051_vm2, %v2435_v16  ;;  %5461 = vmatmul.msk.f32.gmra.mxu2 %vm1051_vm2, %v2435_v16 }
 0x3db   : > { %5526 = vmatmul.msk.f32.gmra.mxu3 %vm484_vm0, %v5482_v39  ;;  %2935 = vmatmul.f32.gmra.mxu1 %v5481_v60 }
 0x3dc   : > { %v2111_v62 = vpop.f32.mrf.mxu2 }
 0x3dd   : > { %v7977_v30 = vadd.f32 %v2111_v62, %v1548_v44  ;;  %v5486_v44 = vld [vmem:[%s9568_s1 + $0x658] sm:$0xff] }
 0x3de   : > { %v7979_v32 = vpop.f32.mrf.mxu0  ;;  %v2437_v37 = vpop.f32.mrf.mxu3 }
 0x3df   : > { %9652 = vst [vmem:[#allocation60_spill] sm:$0xff] %v7979_v32  ;;  %v2438_v22 = vadd.f32 %v2437_v37, %v2348_v36  ;;  %v5485_v37 = vld [vmem:[%s9568_s1 + $0x650] sm:$0xff] }
 0x3e0   : > { %v2351_v43 = vpop.f32.mrf.mxu1 }
 0x3e1   : > { %5437 = vmatmul.msk.f32.gmra.mxu0 %vm1051_vm2, %v2438_v22  ;;  %5462 = vmatmul.msk.f32.gmra.mxu2 %vm1051_vm2, %v2438_v22 }
 0x3e3   : > { %5527 = vmatmul.msk.f32.gmra.mxu3 %vm484_vm0, %v5484_v33  ;;  %2938 = vmatmul.f32.gmra.mxu1 %v5483_v23 }
 0x3e4   : > { %v2114_v10 = vpop.f32.mrf.mxu2 }
 0x3e5   : > { %v7992_v16 = vadd.f32 %v2114_v10, %v1551_v12  ;;  %v5488_v12 = vld [vmem:[%s9568_s1 + $0x668] sm:$0xff] }
 0x3e6   : > { %v7994_v39 = vpop.f32.mrf.mxu0  ;;  %v2440_v36 = vpop.f32.mrf.mxu3 }
 0x3e7   : > { %9653 = vst [vmem:[#allocation61_spill] sm:$0xff] %v7994_v39  ;;  %v2441_v60 = vadd.f32 %v2440_v36, %v2351_v43  ;;  %v5487_v36 = vld [vmem:[%s9568_s1 + $0x660] sm:$0xff] }
 0x3e8   : > { %v2354_v62 = vpop.f32.mrf.mxu1 }
 0x3e9   : > { %5438 = vmatmul.msk.f32.gmra.mxu0 %vm1051_vm2, %v2441_v60  ;;  %5463 = vmatmul.msk.f32.gmra.mxu2 %vm1051_vm2, %v2441_v60 }
 0x3eb   : > { %5528 = vmatmul.msk.f32.gmra.mxu3 %vm484_vm0, %v5486_v44  ;;  %2941 = vmatmul.f32.gmra.mxu1 %v5485_v37 }
 0x3ec   : > { %v2117_v2 = vpop.f32.mrf.mxu2 }
 0x3ed   : > { %v8007_v22 = vadd.f32 %v2117_v2, %v1554_v38  ;;  %v5490_v38 = vld [vmem:[%s9568_s1 + $0x678] sm:$0xff] }
 0x3ee   : > { %v8009_v33 = vpop.f32.mrf.mxu0  ;;  %v2443_v43 = vpop.f32.mrf.mxu3 }
 0x3ef   : > { %9654 = vst [vmem:[#allocation62_spill] sm:$0xff] %v8009_v33  ;;  %v2444_v23 = vadd.f32 %v2443_v43, %v2354_v62  ;;  %v5489_v43 = vld [vmem:[%s9568_s1 + $0x670] sm:$0xff] }
 0x3f0   : > { %v2357_v10 = vpop.f32.mrf.mxu1 }
 0x3f1   : > { %5439 = vmatmul.msk.f32.gmra.mxu0 %vm1051_vm2, %v2444_v23  ;;  %5464 = vmatmul.msk.f32.gmra.mxu2 %vm1051_vm2, %v2444_v23 }
 0x3f3   : > { %5529 = vmatmul.msk.f32.gmra.mxu3 %vm484_vm0, %v5488_v12  ;;  %2944 = vmatmul.f32.gmra.mxu1 %v5487_v36 }
 0x3f4   : > { %v2120_v54 = vpop.f32.mrf.mxu2 }
 0x3f5   : > { %v8022_v60 = vadd.f32 %v2120_v54, %v1557_v19  ;;  %v5492_v19 = vld [vmem:[%s9568_s1 + $0x688] sm:$0xff] }
 0x3f6   : > { %v8024_v44 = vpop.f32.mrf.mxu0  ;;  %v2446_v62 = vpop.f32.mrf.mxu3 }
 0x3f7   : > { %9655 = vst [vmem:[#allocation63_spill] sm:$0xff] %v8024_v44  ;;  %v2447_v37 = vadd.f32 %v2446_v62, %v2357_v10  ;;  %v5491_v62 = vld [vmem:[%s9568_s1 + $0x680] sm:$0xff] }
 0x3f8   : > { %v2360_v2 = vpop.f32.mrf.mxu1 }
 0x3f9   : > { %5440 = vmatmul.msk.f32.gmra.mxu0 %vm1051_vm2, %v2447_v37  ;;  %5465 = vmatmul.msk.f32.gmra.mxu2 %vm1051_vm2, %v2447_v37 }
 0x3fb   : > { %5530 = vmatmul.msk.f32.gmra.mxu3 %vm484_vm0, %v5490_v38  ;;  %2947 = vmatmul.f32.gmra.mxu1 %v5489_v43 }
 0x3fc   : > { %v2123_v8 = vpop.f32.mrf.mxu2 }
 0x3fd   : > { %v8037_v23 = vadd.f32 %v2123_v8, %v1560_v17  ;;  %v5494_v17 = vld [vmem:[%s9568_s1 + $0x698] sm:$0xff] }
 0x3fe   : > { %v8039_v12 = vpop.f32.mrf.mxu0  ;;  %v2449_v10 = vpop.f32.mrf.mxu3 }
 0x3ff   : > { %9656 = vst [vmem:[#allocation64_spill] sm:$0xff] %v8039_v12  ;;  %v2450_v36 = vadd.f32 %v2449_v10, %v2360_v2  ;;  %v5493_v10 = vld [vmem:[%s9568_s1 + $0x690] sm:$0xff] }
 0x400   : > { %v2363_v54 = vpop.f32.mrf.mxu1 }
 0x401   : > { %5441 = vmatmul.msk.f32.gmra.mxu0 %vm1051_vm2, %v2450_v36  ;;  %5466 = vmatmul.msk.f32.gmra.mxu2 %vm1051_vm2, %v2450_v36 }
 0x403   : > { %5531 = vmatmul.msk.f32.gmra.mxu3 %vm484_vm0, %v5492_v19  ;;  %2950 = vmatmul.f32.gmra.mxu1 %v5491_v62  ;;  %v5496_v62 = vld [vmem:[%s9568_s1 + $0x6a8] sm:$0xff] }
 0x404   : > { %v2126_v4 = vpop.f32.mrf.mxu2 }
 0x405   : > { %v8052_v37 = vadd.f32 %v2126_v4, %v1563_v42  ;;  %v5495_v4 = vld [vmem:[%s9568_s1 + $0x6a0] sm:$0xff] }
 0x406   : > { %v2452_v38 = vpop.f32.mrf.mxu3  ;;  %v8054_v2 = vpop.f32.mrf.mxu0 }
 0x407   : > { %9657 = vst [vmem:[#allocation65_spill] sm:$0xff] %v8054_v2  ;;  %v2453_v43 = vadd.f32 %v2452_v38, %v2363_v54 }
 0x408   : > { %v2366_v8 = vpop.f32.mrf.mxu1 }
 0x409   : > { %5442 = vmatmul.msk.f32.gmra.mxu0 %vm1051_vm2, %v2453_v43  ;;  %5467 = vmatmul.msk.f32.gmra.mxu2 %vm1051_vm2, %v2453_v43 }
 0x40b   : > { %5532 = vmatmul.msk.f32.gmra.mxu3 %vm484_vm0, %v5494_v17  ;;  %2953 = vmatmul.f32.gmra.mxu1 %v5493_v10 }
 0x40c   : > { %v2669_v45 = vpop.f32.mrf.mxu2 }
 0x40d   : > { %v8066_v50 = vadd.f32 %v2669_v45, %v7681_v18  ;;  %v5554_v18 = vld [vmem:[%s9569_s2 + $0x138] sm:$0xf]  ;;  %v5553_v45 = vld [vmem:[%s9569_s2 + $0x130] sm:$0xf] }
 0x40e   : > { %v2455_v36 = vpop.f32.mrf.mxu3  ;;  %v8068_v19 = vpop.f32.mrf.mxu0  ;;  %5580 = vmatpush.msk.msra.mxu2 %vm1124_vm1, %v5554_v18  ;;  %5555 = vmatpush.msk.msra.mxu0 %vm1124_vm1, %v5553_v45 }
 0x40f   : > { %9658 = vst [vmem:[#allocation66_spill] sm:$0xff] %v8068_v19  ;;  %v2456_v54 = vadd.f32 %v2455_v36, %v2366_v8  ;;  %v5498_v36 = vld [vmem:[%s9568_s1 + $0x6b8] sm:$0xff] }
 0x410   : > { %v2369_v42 = vpop.f32.mrf.mxu1 }
 0x411   : > { %5443 = vmatmul.msk.f32.gmra.mxu0 %vm1051_vm2, %v2456_v54  ;;  %5468 = vmatmul.msk.f32.gmra.mxu2 %vm1051_vm2, %v2456_v54 }
 0x413   : > { %5533 = vmatmul.msk.f32.gmra.mxu3 %vm484_vm0, %v5496_v62  ;;  %2956 = vmatmul.f32.gmra.mxu1 %v5495_v4  ;;  %v5497_v62 = vld [vmem:[%s9568_s1 + $0x6b0] sm:$0xff] }
 0x414   : > { %v2672_v38 = vpop.f32.mrf.mxu2 }
 0x415   : > { %v8084_v43 = vadd.f32 %v2672_v38, %v7700_v61 }
 0x416   : > { %v2458_v17 = vpop.f32.mrf.mxu3  ;;  %v8086_v8 = vpop.f32.mrf.mxu0 }
 0x417   : > { %9659 = vst [vmem:[#allocation67_spill] sm:$0xff] %v8086_v8  ;;  %v2459_v10 = vadd.f32 %v2458_v17, %v2369_v42  ;;  %v5500_v17 = vld [vmem:[%s9568_s1 + $0x6c8] sm:$0xff] }
 0x418   : > { %v2372_v54 = vpop.f32.mrf.mxu1  ;;  %v5504_v8 = vld [vmem:[%s9568_s1 + $0x6e8] sm:$0xff] }
 0x419   : > { %5444 = vmatmul.msk.f32.gmra.mxu0 %vm1051_vm2, %v2459_v10  ;;  %5469 = vmatmul.msk.f32.gmra.mxu2 %vm1051_vm2, %v2459_v10  ;;  %v5499_v10 = vld [vmem:[%s9568_s1 + $0x6c0] sm:$0xff] }
 0x41b   : > { %5534 = vmatmul.msk.f32.gmra.mxu3 %vm484_vm0, %v5498_v36  ;;  %2959 = vmatmul.f32.gmra.mxu1 %v5497_v62  ;;  %v5551_v36 = vld [vmem:[%s9569_s2 + $0x120] sm:$0xff] }
 0x41c   : > { %v2675_v61 = vpop.f32.mrf.mxu2  ;;  %3188 = vmatpush.msra.mxu0 %v5551_v36  ;;  %v5502_v36 = vld [vmem:[%s9568_s1 + $0x6d8] sm:$0xff] }
 0x41d   : > { %v8102_v42 = vadd.f32 %v2675_v61, %v7719_v20 }
 0x41e   : > { %v2461_v4 = vpop.f32.mrf.mxu3  ;;  %v8104_v18 = vpop.f32.mrf.mxu0 }
 0x41f   : > { %9660 = vst [vmem:[#allocation68_spill] sm:$0xff] %v8104_v18  ;;  %v2462_v38 = vadd.f32 %v2461_v4, %v2372_v54  ;;  %v5552_v54 = vld [vmem:[%s9569_s2 + $0x128] sm:$0xff] }
 0x420   : > { %v2375_v45 = vpop.f32.mrf.mxu1  ;;  %3277 = vmatpush.msra.mxu2 %v5552_v54 }
 0x421   : > { %5445 = vmatmul.msk.f32.gmra.mxu0 %vm1051_vm2, %v2462_v38  ;;  %5470 = vmatmul.msk.f32.gmra.mxu2 %vm1051_vm2, %v2462_v38  ;;  %v5549_v38 = vld [vmem:[%s9569_s2 + $0x110] sm:$0xff] }
 0x422   : > { %3189 = vmatpush.msra.mxu0 %v5549_v38 }
 0x423   : > { %5535 = vmatmul.msk.f32.gmra.mxu3 %vm484_vm0, %v5500_v17  ;;  %2962 = vmatmul.f32.gmra.mxu1 %v5499_v10  ;;  %v5550_v17 = vld [vmem:[%s9569_s2 + $0x118] sm:$0xff] }
 0x424   : > { %v2678_v20 = vpop.f32.mrf.mxu2  ;;  %3278 = vmatpush.msra.mxu2 %v5550_v17 }
 0x425   : > { %v8122_v62 = vadd.f32 %v2678_v20, %v7740_v40  ;;  %v5547_v40 = vld [vmem:[%s9569_s2 + $0x100] sm:$0xff]  ;;  %v5548_v20 = vld [vmem:[%s9569_s2 + $0x108] sm:$0xff] }
 0x426   : > { %v2464_v61 = vpop.f32.mrf.mxu3  ;;  %v8124_v4 = vpop.f32.mrf.mxu0  ;;  %3190 = vmatpush.msra.mxu0 %v5547_v40  ;;  %3279 = vmatpush.msra.mxu2 %v5548_v20 }
 0x427   : > { %9661 = vst [vmem:[#allocation69_spill] sm:$0xff] %v8124_v4  ;;  %v2465_v10 = vadd.f32 %v2464_v61, %v2375_v45  ;;  %v5501_v4 = vld [vmem:[%s9568_s1 + $0x6d0] sm:$0xff] }
 0x428   : > { %v2378_v54 = vpop.f32.mrf.mxu1 }
 0x429   : > { %5446 = vmatmul.msk.f32.gmra.mxu0 %vm1051_vm2, %v2465_v10  ;;  %5471 = vmatmul.msk.f32.gmra.mxu2 %vm1051_vm2, %v2465_v10  ;;  %v5503_v10 = vld [vmem:[%s9568_s1 + $0x6e0] sm:$0xff] }
 0x42b   : > { %5536 = vmatmul.msk.f32.gmra.mxu3 %vm484_vm0, %v5502_v36  ;;  %2965 = vmatmul.f32.gmra.mxu1 %v5501_v4 }
 0x42c   : > { %v2681_v45 = vpop.f32.mrf.mxu2 }
 0x42d   : > { %v8148_v61 = vadd.f32 %v2681_v45, %v7767_v47 }
 0x42e   : > { %v2467_v38 = vpop.f32.mrf.mxu3  ;;  %v8150_v17 = vpop.f32.mrf.mxu0 }
 0x42f   : > { %9662 = vst [vmem:[#allocation70_spill] sm:$0xff] %v8150_v17  ;;  %v2468_v18 = vadd.f32 %v2467_v38, %v2378_v54  ;;  %v5506_v54 = vld [vmem:[%s9568_s1 + $0x6f8] sm:$0xff] }
 0x430   : > { %v2381_v19 = vpop.f32.mrf.mxu1 }
 0x431   : > { %5447 = vmatmul.msk.f32.gmra.mxu0 %vm1051_vm2, %v2468_v18  ;;  %5472 = vmatmul.msk.f32.gmra.mxu2 %vm1051_vm2, %v2468_v18  ;;  %v5505_v18 = vld [vmem:[%s9568_s1 + $0x6f0] sm:$0xff] }
 0x433   : > { %5537 = vmatmul.msk.f32.gmra.mxu3 %vm484_vm0, %v5504_v8  ;;  %2968 = vmatmul.f32.gmra.mxu1 %v5503_v10 }
 0x434   : > { %v2684_v47 = vpop.f32.mrf.mxu2 }
 0x435   : > { %v8162_v4 = vadd.f32 %v2684_v47, %v7782_v51  ;;  %v5508_v47 = vld [vmem:[%s9568_s1 + $0x708] sm:$0xff] }
 0x436   : > { %v2470_v40 = vpop.f32.mrf.mxu3  ;;  %v8164_v20 = vpop.f32.mrf.mxu0 }
 0x437   : > { %9663 = vst [vmem:[#allocation71_spill] sm:$0xff] %v8164_v20  ;;  %v2471_v36 = vadd.f32 %v2470_v40, %v2381_v19 }
 0x438   : > { %v2384_v45 = vpop.f32.mrf.mxu1 }
 0x439   : > { %5448 = vmatmul.msk.f32.gmra.mxu0 %vm1051_vm2, %v2471_v36  ;;  %5473 = vmatmul.msk.f32.gmra.mxu2 %vm1051_vm2, %v2471_v36  ;;  %v5507_v36 = vld [vmem:[%s9568_s1 + $0x700] sm:$0xff] }
 0x43b   : > { %5538 = vmatmul.msk.f32.gmra.mxu3 %vm484_vm0, %v5506_v54  ;;  %2971 = vmatmul.f32.gmra.mxu1 %v5505_v18 }
 0x43c   : > { %v2687_v51 = vpop.f32.mrf.mxu2 }
 0x43d   : > { %v8176_v8 = vadd.f32 %v2687_v51, %v7797_v14 }
 0x43e   : > { %v2473_v19 = vpop.f32.mrf.mxu3  ;;  %v8178_v38 = vpop.f32.mrf.mxu0 }
 0x43f   : > { %9664 = vst [vmem:[#allocation72_spill] sm:$0xff] %v8178_v38  ;;  %v2474_v10 = vadd.f32 %v2473_v19, %v2384_v45  ;;  %v5510_v19 = vld [vmem:[%s9568_s1 + $0x718] sm:$0xff] }
 0x440   : > { %v2927_v40 = vpop.f32.mrf.mxu1 }
 0x441   : > { %5449 = vmatmul.msk.f32.gmra.mxu0 %vm1051_vm2, %v2474_v10  ;;  %5474 = vmatmul.msk.f32.gmra.mxu2 %vm1051_vm2, %v2474_v10  ;;  %v5509_v10 = vld [vmem:[%s9568_s1 + $0x710] sm:$0xff] }
 0x443   : > { %5539 = vmatmul.msk.f32.gmra.mxu3 %vm484_vm0, %v5508_v47  ;;  %2974 = vmatmul.f32.gmra.mxu1 %v5507_v36 }
 0x444   : > { %v2690_v14 = vpop.f32.mrf.mxu2 }
 0x445   : > { %v8190_v54 = vadd.f32 %v2690_v14, %v7812_v26 }
 0x446   : > { %v8192_v45 = vpop.f32.mrf.mxu0  ;;  %v3016_v18 = vpop.f32.mrf.mxu3 }
 0x447   : > { %9665 = vst [vmem:[#allocation73_spill] sm:$0xff] %v8192_v45  ;;  %v3017_v51 = vadd.f32 %v3016_v18, %v2927_v40  ;;  %v5512_v18 = vld [vmem:[%s9568_s1 + $0x728] sm:$0xff] }
 0x448   : > { %v2930_v38 = vpop.f32.mrf.mxu1 }
 0x449   : > { %5556 = vmatmul.msk.f32.vlgmr.msra.gmra.mxu0 %vm1051_vm2, %v3017_v51  ;;  %5581 = vmatmul.msk.f32.vlgmr.msra.gmra.mxu2 %vm1051_vm2, %v3017_v51  ;;  %v5511_v51 = vld [vmem:[%s9568_s1 + $0x720] sm:$0xff] }
 0x44b   : > { %5540 = vmatmul.msk.f32.gmra.mxu3 %vm484_vm0, %v5510_v19  ;;  %2977 = vmatmul.f32.gmra.mxu1 %v5509_v10 }
 0x44c   : > { %v2693_v26 = vpop.f32.mrf.mxu2 }
 0x44d   : > { %v8204_v47 = vadd.f32 %v2693_v26, %v7827_v57 }
 0x44e   : > { %v8206_v40 = vpop.f32.mrf.mxu0  ;;  %v3019_v36 = vpop.f32.mrf.mxu3 }
 0x44f   : > { %9666 = vst [vmem:[#allocation74_spill] sm:$0xff] %v8206_v40  ;;  %v3020_v14 = vadd.f32 %v3019_v36, %v2930_v38  ;;  %v5514_v36 = vld [vmem:[%s9568_s1 + $0x738] sm:$0xff] }
 0x450   : > { %v2933_v45 = vpop.f32.mrf.mxu1 }
 0x451   : > { %5557 = vmatmul.msk.f32.gmra.mxu0 %vm1051_vm2, %v3020_v14  ;;  %5582 = vmatmul.msk.f32.gmra.mxu2 %vm1051_vm2, %v3020_v14  ;;  %v5513_v14 = vld [vmem:[%s9568_s1 + $0x730] sm:$0xff] }
 0x453   : > { %5541 = vmatmul.msk.f32.gmra.mxu3 %vm484_vm0, %v5512_v18  ;;  %2980 = vmatmul.f32.gmra.mxu1 %v5511_v51 }
 0x454   : > { %v2696_v57 = vpop.f32.mrf.mxu2 }
 0x455   : > { %v8218_v19 = vadd.f32 %v2696_v57, %v7842_v46 }
 0x456   : > { %v8220_v38 = vpop.f32.mrf.mxu0  ;;  %v3022_v10 = vpop.f32.mrf.mxu3 }
 0x457   : > { %9667 = vst [vmem:[#allocation75_spill] sm:$0xff] %v8220_v38  ;;  %v3023_v26 = vadd.f32 %v3022_v10, %v2933_v45  ;;  %v5516_v10 = vld [vmem:[%s9568_s1 + $0x748] sm:$0xff] }
 0x458   : > { %v2936_v40 = vpop.f32.mrf.mxu1 }
 0x459   : > { %5558 = vmatmul.msk.f32.gmra.mxu0 %vm1051_vm2, %v3023_v26  ;;  %5583 = vmatmul.msk.f32.gmra.mxu2 %vm1051_vm2, %v3023_v26  ;;  %v5515_v26 = vld [vmem:[%s9568_s1 + $0x740] sm:$0xff] }
 0x45b   : > { %5542 = vmatmul.msk.f32.gmra.mxu3 %vm484_vm0, %v5514_v36  ;;  %2983 = vmatmul.f32.gmra.mxu1 %v5513_v14 }
 0x45c   : > { %v2699_v46 = vpop.f32.mrf.mxu2 }
 0x45d   : > { %v8232_v18 = vadd.f32 %v2699_v46, %v7857_v7 }
 0x45e   : > { %v8234_v45 = vpop.f32.mrf.mxu0  ;;  %v3025_v51 = vpop.f32.mrf.mxu3 }
 0x45f   : > { %9668 = vst [vmem:[#allocation76_spill] sm:$0xff] %v8232_v18  ;;  %v3026_v57 = vadd.f32 %v3025_v51, %v2936_v40  ;;  %v5518_v51 = vld [vmem:[%s9568_s1 + $0x758] sm:$0xff] }
 0x460   : > { %9669 = vst [vmem:[#allocation77_spill] sm:$0xff] %v8234_v45  ;;  %v2939_v38 = vpop.f32.mrf.mxu1 }
 0x461   : > { %5559 = vmatmul.msk.f32.gmra.mxu0 %vm1051_vm2, %v3026_v57  ;;  %5584 = vmatmul.msk.f32.gmra.mxu2 %vm1051_vm2, %v3026_v57  ;;  %v5517_v57 = vld [vmem:[%s9568_s1 + $0x750] sm:$0xff] }
 0x463   : > { %5543 = vmatmul.msk.f32.gmra.mxu3 %vm484_vm0, %v5516_v10  ;;  %2986 = vmatmul.f32.gmra.mxu1 %v5515_v26 }
 0x464   : > { %v2702_v7 = vpop.f32.mrf.mxu2 }
 0x465   : > { %v8246_v36 = vadd.f32 %v2702_v7, %v7872_v48 }
 0x466   : > { %v8248_v40 = vpop.f32.mrf.mxu0  ;;  %v3028_v14 = vpop.f32.mrf.mxu3 }
 0x467   : > { %9670 = vst [vmem:[#allocation78_spill] sm:$0xff] %v8246_v36  ;;  %v3029_v46 = vadd.f32 %v3028_v14, %v2939_v38  ;;  %v5520_v14 = vld [vmem:[%s9568_s1 + $0x768] sm:$0xff] }
 0x468   : > { %9671 = vst [vmem:[#allocation79_spill] sm:$0xff] %v8248_v40  ;;  %v2942_v45 = vpop.f32.mrf.mxu1 }
 0x469   : > { %5560 = vmatmul.msk.f32.gmra.mxu0 %vm1051_vm2, %v3029_v46  ;;  %5585 = vmatmul.msk.f32.gmra.mxu2 %vm1051_vm2, %v3029_v46  ;;  %v5519_v46 = vld [vmem:[%s9568_s1 + $0x760] sm:$0xff] }
 0x46b   : > { %5544 = vmatmul.msk.f32.gmra.mxu3 %vm484_vm0, %v5518_v51  ;;  %2989 = vmatmul.f32.gmra.mxu1 %v5517_v57 }
 0x46c   : > { %v2705_v48 = vpop.f32.mrf.mxu2 }
 0x46d   : > { %v8260_v10 = vadd.f32 %v2705_v48, %v7887_v31 }
 0x46e   : > { %v8262_v38 = vpop.f32.mrf.mxu0  ;;  %v3031_v26 = vpop.f32.mrf.mxu3 }
 0x46f   : > { %9672 = vst [vmem:[#allocation80_spill] sm:$0xff] %v8262_v38  ;;  %v3032_v7 = vadd.f32 %v3031_v26, %v2942_v45  ;;  %v5522_v26 = vld [vmem:[%s9568_s1 + $0x778] sm:$0xff] }
 0x470   : > { %v2945_v36 = vpop.f32.mrf.mxu1 }
 0x471   : > { %5561 = vmatmul.msk.f32.gmra.mxu0 %vm1051_vm2, %v3032_v7  ;;  %5586 = vmatmul.msk.f32.gmra.mxu2 %vm1051_vm2, %v3032_v7  ;;  %v5521_v7 = vld [vmem:[%s9568_s1 + $0x770] sm:$0xff] }
 0x473   : > { %5545 = vmatmul.msk.f32.gmra.mxu3 %vm484_vm0, %v5520_v14  ;;  %2992 = vmatmul.f32.gmra.mxu1 %v5519_v46 }
 0x474   : > { %v2708_v31 = vpop.f32.mrf.mxu2 }
 0x475   : > { %v8274_v51 = vadd.f32 %v2708_v31, %v7902_v35 }
 0x476   : > { %v8276_v45 = vpop.f32.mrf.mxu0  ;;  %v3034_v57 = vpop.f32.mrf.mxu3 }
 0x477   : > { %9673 = vst [vmem:[#allocation81_spill] sm:$0xff] %v8276_v45  ;;  %v3035_v48 = vadd.f32 %v3034_v57, %v2945_v36 }
 0x478   : > { %v2948_v38 = vpop.f32.mrf.mxu1 }
 0x479   : > { %5562 = vmatmul.msk.f32.gmra.mxu0 %vm1051_vm2, %v3035_v48  ;;  %5587 = vmatmul.msk.f32.gmra.mxu2 %vm1051_vm2, %v3035_v48 }
 0x47b   : > { %5546 = vmatmul.msk.f32.gmra.mxu3 %vm484_vm0, %v5522_v26  ;;  %2995 = vmatmul.f32.gmra.mxu1 %v5521_v7 }
 0x47c   : > { %v2711_v35 = vpop.f32.mrf.mxu2 }
 0x47d   : > { %v8288_v14 = vadd.f32 %v2711_v35, %v7917_v59 }
 0x47e   : > { %v8290_v36 = vpop.f32.mrf.mxu0  ;;  %v3037_v46 = vpop.f32.mrf.mxu3 }
 0x47f   : > { %9674 = vst [vmem:[#allocation82_spill] sm:$0xff] %v8290_v36  ;;  %v3038_v31 = vadd.f32 %v3037_v46, %v2948_v38 }
 0x480   : > { %v2951_v57 = vpop.f32.mrf.mxu1 }
 0x481   : > { %5563 = vmatmul.msk.f32.gmra.mxu0 %vm1051_vm2, %v3038_v31  ;;  %5588 = vmatmul.msk.f32.gmra.mxu2 %vm1051_vm2, %v3038_v31 }
 0x484   : > { %v2714_v45 = vpop.f32.mrf.mxu2 }
 0x485   : > { %v8295_v40 = vadd.f32 %v2714_v45, %v7932_v34 }
 0x486   : > { %v8297_v48 = vpop.f32.mrf.mxu0  ;;  %v3040_v26 = vpop.f32.mrf.mxu3 }
 0x487   : > { %9675 = vst [vmem:[#allocation83_spill] sm:$0xff] %v8297_v48  ;;  %v3041_v7 = vadd.f32 %v3040_v26, %v2951_v57 }
 0x488   : > { %v2954_v20 = vpop.f32.mrf.mxu1 }
 0x489   : > { %5564 = vmatmul.msk.f32.gmra.mxu0 %vm1051_vm2, %v3041_v7  ;;  %5589 = vmatmul.msk.f32.gmra.mxu2 %vm1051_vm2, %v3041_v7 }
 0x48c   : > { %v2717_v59 = vpop.f32.mrf.mxu2 }
 0x48d   : > { %v8302_v38 = vadd.f32 %v2717_v59, %v7947_v5 }
 0x48e   : > { %v8304_v35 = vpop.f32.mrf.mxu0  ;;  %v3043_v46 = vpop.f32.mrf.mxu3 }
 0x48f   : > { %9676 = vst [vmem:[#allocation84_spill] sm:$0xff] %v8304_v35  ;;  %v3044_v31 = vadd.f32 %v3043_v46, %v2954_v20 }
 0x490   : > { %v2957_v36 = vpop.f32.mrf.mxu1 }
 0x491   : > { %5565 = vmatmul.msk.f32.gmra.mxu0 %vm1051_vm2, %v3044_v31  ;;  %5590 = vmatmul.msk.f32.gmra.mxu2 %vm1051_vm2, %v3044_v31 }
 0x494   : > { %v2720_v34 = vpop.f32.mrf.mxu2 }
 0x495   : > { %v8309_v45 = vadd.f32 %v2720_v34, %v7962_v25 }
 0x496   : > { %v8311_v57 = vpop.f32.mrf.mxu0  ;;  %v3046_v26 = vpop.f32.mrf.mxu3 }
 0x497   : > { %9677 = vst [vmem:[#allocation85_spill] sm:$0xff] %v8311_v57  ;;  %v3047_v7 = vadd.f32 %v3046_v26, %v2957_v36 }
 0x498   : > { %v2960_v48 = vpop.f32.mrf.mxu1 }
 0x499   : > { %5566 = vmatmul.msk.f32.gmra.mxu0 %vm1051_vm2, %v3047_v7  ;;  %5591 = vmatmul.msk.f32.gmra.mxu2 %vm1051_vm2, %v3047_v7 }
 0x49c   : > { %v2723_v5 = vpop.f32.mrf.mxu2 }
 0x49d   : > { %v8316_v20 = vadd.f32 %v2723_v5, %v7977_v30 }
 0x49e   : > { %v8318_v59 = vpop.f32.mrf.mxu0  ;;  %v3049_v46 = vpop.f32.mrf.mxu3 }
 0x49f   : > { %9678 = vst [vmem:[#allocation86_spill] sm:$0xff] %v8318_v59  ;;  %v3050_v31 = vadd.f32 %v3049_v46, %v2960_v48 }
 0x4a0   : > { %v2963_v35 = vpop.f32.mrf.mxu1 }
 0x4a1   : > { %5567 = vmatmul.msk.f32.gmra.mxu0 %vm1051_vm2, %v3050_v31  ;;  %5592 = vmatmul.msk.f32.gmra.mxu2 %vm1051_vm2, %v3050_v31 }
 0x4a4   : > { %v2726_v25 = vpop.f32.mrf.mxu2 }
 0x4a5   : > { %v8323_v36 = vadd.f32 %v2726_v25, %v7992_v16 }
 0x4a6   : > { %v8325_v34 = vpop.f32.mrf.mxu0  ;;  %v3052_v26 = vpop.f32.mrf.mxu3 }
 0x4a7   : > { %9679 = vst [vmem:[#allocation87_spill] sm:$0xff] %v8325_v34  ;;  %v3053_v7 = vadd.f32 %v3052_v26, %v2963_v35 }
 0x4a8   : > { %v2966_v57 = vpop.f32.mrf.mxu1 }
 0x4a9   : > { %5568 = vmatmul.msk.f32.gmra.mxu0 %vm1051_vm2, %v3053_v7  ;;  %5593 = vmatmul.msk.f32.gmra.mxu2 %vm1051_vm2, %v3053_v7 }
 0x4ac   : > { %v2729_v30 = vpop.f32.mrf.mxu2 }
 0x4ad   : > { %v8330_v48 = vadd.f32 %v2729_v30, %v8007_v22 }
 0x4ae   : > { %v8332_v5 = vpop.f32.mrf.mxu0  ;;  %v3055_v46 = vpop.f32.mrf.mxu3 }
 0x4af   : > { %9680 = vst [vmem:[#allocation88_spill] sm:$0xff] %v8332_v5  ;;  %v3056_v31 = vadd.f32 %v3055_v46, %v2966_v57 }
 0x4b0   : > { %v2969_v59 = vpop.f32.mrf.mxu1 }
 0x4b1   : > { %5569 = vmatmul.msk.f32.gmra.mxu0 %vm1051_vm2, %v3056_v31  ;;  %5594 = vmatmul.msk.f32.gmra.mxu2 %vm1051_vm2, %v3056_v31 }
 0x4b4   : > { %v2732_v16 = vpop.f32.mrf.mxu2 }
 0x4b5   : > { %v8337_v35 = vadd.f32 %v2732_v16, %v8022_v60 }
 0x4b6   : > { %v8339_v25 = vpop.f32.mrf.mxu0  ;;  %v3058_v26 = vpop.f32.mrf.mxu3 }
 0x4b7   : > { %9681 = vst [vmem:[#allocation89_spill] sm:$0xff] %v8339_v25  ;;  %v3059_v7 = vadd.f32 %v3058_v26, %v2969_v59 }
 0x4b8   : > { %v2972_v34 = vpop.f32.mrf.mxu1 }
 0x4b9   : > { %5570 = vmatmul.msk.f32.gmra.mxu0 %vm1051_vm2, %v3059_v7  ;;  %5595 = vmatmul.msk.f32.gmra.mxu2 %vm1051_vm2, %v3059_v7 }
 0x4bc   : > { %v2735_v22 = vpop.f32.mrf.mxu2 }
 0x4bd   : > { %v8344_v57 = vadd.f32 %v2735_v22, %v8037_v23 }
 0x4be   : > { %v8346_v30 = vpop.f32.mrf.mxu0  ;;  %v3061_v46 = vpop.f32.mrf.mxu3 }
 0x4bf   : > { %9682 = vst [vmem:[#allocation90_spill] sm:$0xff] %v8344_v57  ;;  %v3062_v31 = vadd.f32 %v3061_v46, %v2972_v34 }
 0x4c0   : > { %9683 = vst [vmem:[#allocation91_spill] sm:$0xff] %v8346_v30  ;;  %v2975_v5 = vpop.f32.mrf.mxu1 }
 0x4c1   : > { %5571 = vmatmul.msk.f32.gmra.mxu0 %vm1051_vm2, %v3062_v31  ;;  %5596 = vmatmul.msk.f32.gmra.mxu2 %vm1051_vm2, %v3062_v31 }
 0x4c4   : > { %v2738_v60 = vpop.f32.mrf.mxu2 }
 0x4c5   : > { %v8351_v59 = vadd.f32 %v2738_v60, %v8052_v37 }
 0x4c6   : > { %v3064_v16 = vpop.f32.mrf.mxu3  ;;  %v8353_v26 = vpop.f32.mrf.mxu0 }
 0x4c7   : > { %9684 = vst [vmem:[#allocation92_spill] sm:$0xff] %v8351_v59  ;;  %v3065_v7 = vadd.f32 %v3064_v16, %v2975_v5 }
 0x4c8   : > { %9685 = vst [vmem:[#allocation93_spill] sm:$0xff] %v8353_v26  ;;  %v2978_v25 = vpop.f32.mrf.mxu1 }
 0x4c9   : > { %5572 = vmatmul.msk.f32.gmra.mxu0 %vm1051_vm2, %v3065_v7  ;;  %5597 = vmatmul.msk.f32.gmra.mxu2 %vm1051_vm2, %v3065_v7 }
 0x4cc   : > { %v3281_v23 = vpop.f32.mrf.mxu2 }
 0x4ce   : > { %v3067_v34 = vpop.f32.mrf.mxu3  ;;  %v8357_v22 = vpop.f32.mrf.mxu0 }
 0x4cf   : > { %9686 = vst [vmem:[#allocation94_spill] sm:$0xff] %v8357_v22  ;;  %v3068_v46 = vadd.f32 %v3067_v34, %v2978_v25 }
 0x4d0   : > { %v2981_v57 = vpop.f32.mrf.mxu1 }
 0x4d1   : > { %5573 = vmatmul.msk.f32.gmra.mxu0 %vm1051_vm2, %v3068_v46  ;;  %5598 = vmatmul.msk.f32.gmra.mxu2 %vm1051_vm2, %v3068_v46 }
 0x4d4   : > { %v3284_v37 = vpop.f32.mrf.mxu2 }
 0x4d6   : > { %v3070_v31 = vpop.f32.mrf.mxu3  ;;  %v8361_v60 = vpop.f32.mrf.mxu0 }
 0x4d7   : > { %9687 = vst [vmem:[#allocation95_spill] sm:$0xff] %v8361_v60  ;;  %v3071_v5 = vadd.f32 %v3070_v31, %v2981_v57 }
 0x4d8   : > { %v2984_v16 = vpop.f32.mrf.mxu1 }
 0x4d9   : > { %5574 = vmatmul.msk.f32.gmra.mxu0 %vm1051_vm2, %v3071_v5  ;;  %5599 = vmatmul.msk.f32.gmra.mxu2 %vm1051_vm2, %v3071_v5 }
 0x4dc   : > { %v3287_v7 = vpop.f32.mrf.mxu2 }
 0x4de   : > { %v3073_v26 = vpop.f32.mrf.mxu3  ;;  %v8365_v59 = vpop.f32.mrf.mxu0 }
 0x4df   : > { %9688 = vst [vmem:[#allocation96_spill] sm:$0xff] %v8365_v59  ;;  %v3074_v25 = vadd.f32 %v3073_v26, %v2984_v16 }
 0x4e0   : > { %v2987_v34 = vpop.f32.mrf.mxu1 }
 0x4e1   : > { %5575 = vmatmul.msk.f32.gmra.mxu0 %vm1051_vm2, %v3074_v25  ;;  %5600 = vmatmul.msk.f32.gmra.mxu2 %vm1051_vm2, %v3074_v25 }
 0x4e4   : > { %v8369_v46 = vpop.f32.mrf.mxu2 }
 0x4e6   : > { %v3076_v22 = vpop.f32.mrf.mxu3  ;;  %v8371_v60 = vpop.f32.mrf.mxu0 }
 0x4e7   : > { %9689 = vst [vmem:[#allocation97_spill] sm:$0xff] %v8371_v60  ;;  %v3077_v57 = vadd.f32 %v3076_v22, %v2987_v34 }
 0x4e8   : > { %v2990_v31 = vpop.f32.mrf.mxu1 }
 0x4e9   : > { %5576 = vmatmul.msk.f32.gmra.mxu0 %vm1051_vm2, %v3077_v57  ;;  %5601 = vmatmul.msk.f32.gmra.mxu2 %vm1051_vm2, %v3077_v57 }
 0x4ec   : > { %v8375_v5 = vpop.f32.mrf.mxu2 }
 0x4ee   : > { %v3079_v59 = vpop.f32.mrf.mxu3  ;;  %v8377_v26 = vpop.f32.mrf.mxu0 }
 0x4ef   : > { %9690 = vst [vmem:[#allocation98_spill] sm:$0xff] %v8377_v26  ;;  %v3080_v16 = vadd.f32 %v3079_v59, %v2990_v31 }
 0x4f0   : > { %v2993_v25 = vpop.f32.mrf.mxu1 }
 0x4f1   : > { %5577 = vmatmul.msk.f32.gmra.mxu0 %vm1051_vm2, %v3080_v16  ;;  %5602 = vmatmul.msk.f32.gmra.mxu2 %vm1051_vm2, %v3080_v16 }
 0x4f4   : > { %v8381_v30 = vpop.f32.mrf.mxu2 }
 0x4f6   : > { %v3082_v60 = vpop.f32.mrf.mxu3  ;;  %v8383_v22 = vpop.f32.mrf.mxu0 }
 0x4f7   : > { %9691 = vst [vmem:[#allocation99_spill] sm:$0xff] %v8383_v22  ;;  %v3083_v34 = vadd.f32 %v3082_v60, %v2993_v25 }
 0x4f8   : > { %v2996_v17 = vpop.f32.mrf.mxu1 }
 0x4f9   : > { %5578 = vmatmul.msk.f32.gmra.mxu0 %vm1051_vm2, %v3083_v34  ;;  %5603 = vmatmul.msk.f32.gmra.mxu2 %vm1051_vm2, %v3083_v34 }
 0x4fc   : > { %v8387_v57 = vpop.f32.mrf.mxu2 }
 0x4fe   : > { %v3085_v26 = vpop.f32.mrf.mxu3  ;;  %v8389_v59 = vpop.f32.mrf.mxu0 }
 0x4ff   : > { %9692 = vst [vmem:[#allocation100_spill] sm:$0xff] %v8389_v59  ;;  %v3086_v31 = vadd.f32 %v3085_v26, %v2996_v17 }
 0x501   : > { %5579 = vmatmul.msk.f32.gmra.mxu0 %vm1051_vm2, %v3086_v31  ;;  %5604 = vmatmul.msk.f32.gmra.mxu2 %vm1051_vm2, %v3086_v31  ;;  %v8413_v31 = vld [vmem:[#allocation7] ss:$8 sm:$0x3] }
 0x502   : > { %9700 = vst [vmem:[#allocation108_spill] sm:$0xff] %v8413_v31  ;;  %v8417_v44 = vperm.slane %v8413_v31, 1 }
 0x504   : > { %v8393_v16 = vpop.f32.mrf.mxu2 }
 0x506   : > { %v8395_v2 = vpop.f32.mrf.mxu0 }
 0x507   : > { %9693 = vst [vmem:[#allocation101_spill] sm:$0xff] %v8395_v2  ;;  %v3354_v2 = vadd.f32 %v3281_v23, %v8066_v50 }
 0x509   : > { %v3408_v33 = vadd.f32 %v8417_v44, %v3354_v2 }
 0x50b   : > { %v3456_v32 = vmax.f32 %v3408_v33, 0.0 }
 0x50c   : > { %v8397_v60 = vpop.f32.mrf.mxu2 }
 0x50e   : > { %v8399_v25 = vpop.f32.mrf.mxu0 }
 0x50f   : > { %9694 = vst [vmem:[#allocation102_spill] sm:$0xff] %v8399_v25 }
 0x514   : > { %v8401_v34 = vpop.f32.mrf.mxu2 }
 0x516   : > { %v8403_v22 = vpop.f32.mrf.mxu0 }
 0x517   : > { %9695 = vst [vmem:[#allocation103_spill] sm:$0xff] %v8403_v22 }
 0x51c   : > { %v8405_v12 = vpop.f32.mrf.mxu2 }
 0x51d   : > { %9696 = vst [vmem:[#allocation104_spill] sm:$0xff] %v8405_v12 }
 0x51e   : > { %v8407_v59 = vpop.f32.mrf.mxu0 }
 0x51f   : > { %9697 = vst [vmem:[#allocation105_spill] sm:$0xff] %v8407_v59 }
 0x524   : > { %v8409_v17 = vpop.f32.mrf.mxu2 }
 0x525   : > { %9698 = vst [vmem:[#allocation106_spill] sm:$0xff] %v8409_v17  ;;  %v3356_v17 = vadd.f32 %v3284_v37, %v8084_v43 }
 0x526   : > { %v8411_v26 = vpop.f32.mrf.mxu0 }
 0x527   : > { %9699 = vst [vmem:[#allocation107_spill] sm:$0xff] %v8411_v26  ;;  %v3410_v50 = vadd.f32 %v8417_v44, %v3356_v17 }
 0x52c   : > { %v3317_v25 = vpop.f32.mrf.mxu2 }
 0x52d   : > { %v3378_v22 = vadd.f32 %v3317_v25, %v8260_v10  ;;  %v3458_v10 = vmax.f32 %v3410_v50, 0.0  ;;  %v3358_v25 = vadd.f32 %v3287_v7, %v8102_v42 }
 0x52e   : > { %v8421_v39 = vpop.f32.mrf.mxu0 }
 0x52f   : > { %9701 = vst [vmem:[#allocation109_spill] sm:$0xff] %v8421_v39  ;;  %v3432_v59 = vadd.f32 %v8417_v44, %v3378_v22  ;;  %v3412_v43 = vadd.f32 %v8417_v44, %v3358_v25 }
 0x531   : > { %v3480_v26 = vmax.f32 %v3432_v59, 0.0 }
 0x533   : > { %v8425_v12 = vmax.f32 %v3456_v32, %v3480_v26 }
 0x534   : > { %v3320_v18 = vpop.f32.mrf.mxu2 }
 0x535   : > { %9702 = vst [vmem:[#allocation110_spill] sm:$0xff] %v8425_v12  ;;  %v3380_v23 = vadd.f32 %v3320_v18, %v8274_v51  ;;  %v3460_v18 = vmax.f32 %v3412_v43, 0.0  ;;  %v3360_v51 = vadd.f32 %v8369_v46, %v8122_v62  ;;  %v9735_v12 = vld [vmem:[#allocation24_spill] sm:$0xff] }
 0x536   : > { %v8429_v31 = vpop.f32.mrf.mxu0 }
 0x537   : > { %9703 = vst [vmem:[#allocation111_spill] sm:$0xff] %v8429_v31  ;;  %v3434_v2 = vadd.f32 %v8417_v44, %v3380_v23  ;;  %v9750_v31 = vld [vmem:[#allocation53_spill] sm:$0xff] }
 0x539   : > { %v3482_v39 = vmax.f32 %v3434_v2, 0.0  ;;  %v3362_v2 = vadd.f32 %v8375_v5, %v8148_v61 }
 0x53b   : > { %v8433_v22 = vmax.f32 %v3458_v10, %v3482_v39  ;;  %v3414_v39 = vadd.f32 %v8417_v44, %v3360_v51  ;;  %v3416_v46 = vadd.f32 %v8417_v44, %v3362_v2 }
 0x53c   : > { %v3323_v33 = vpop.f32.mrf.mxu2 }
 0x53d   : > { %9704 = vst [vmem:[#allocation112_spill] sm:$0xff] %v8433_v22  ;;  %v3382_v32 = vadd.f32 %v3323_v33, %v8288_v14  ;;  %v3462_v23 = vmax.f32 %v3414_v39, 0.0  ;;  %v9736_v22 = vld [vmem:[#allocation46_spill] sm:$0xff] }
 0x53e   : > { %v8437_v37 = vpop.f32.mrf.mxu0 }
 0x53f   : > { %9705 = vst [vmem:[#allocation113_spill] sm:$0xff] %v8437_v37  ;;  %v3436_v59 = vadd.f32 %v8417_v44, %v3382_v32  ;;  %v3464_v32 = vmax.f32 %v3416_v46, 0.0  ;;  %v3368_v46 = vadd.f32 %v8393_v16, %v8190_v54  ;;  %v5637_v16 = vld [vmem:[%s9571_s4 + $0xd0] sm:$0xff]  ;;  %v9752_v37 = vld [vmem:[#allocation54_spill] sm:$0xff] }
 0x541   : > { %v3484_v17 = vmax.f32 %v3436_v59, 0.0  ;;  %v3364_v59 = vadd.f32 %v8381_v30, %v8162_v4 }
 0x543   : > { %v8442_v26 = vmax.f32 %v3460_v18, %v3484_v17  ;;  %v3418_v5 = vadd.f32 %v8417_v44, %v3364_v59  ;;  %v5639_v59 = vld [vmem:[%s9571_s4 + $0xe0] sm:$0xff] }
 0x544   : > { %v3326_v42 = vpop.f32.mrf.mxu2 }
 0x545   : > { %9706 = vst [vmem:[#allocation114_spill] sm:$0xff] %v8442_v26  ;;  %v3384_v7 = vadd.f32 %v3326_v42, %v8295_v40  ;;  %v3466_v39 = vmax.f32 %v3418_v5, 0.0  ;;  %v9740_v26 = vld [vmem:[#allocation48_spill] sm:$0xff] }
 0x546   : > { %v8446_v50 = vpop.f32.mrf.mxu0 }
 0x547   : > { %9707 = vst [vmem:[#allocation115_spill] sm:$0xff] %v8446_v50  ;;  %v3438_v14 = vadd.f32 %v8417_v44, %v3384_v7  ;;  %v3366_v7 = vadd.f32 %v8387_v57, %v8176_v8  ;;  %v5643_v8 = vld [vmem:[%s9571_s4 + $0x100] sm:$0xff]  ;;  %v9754_v50 = vld [vmem:[#allocation55_spill] sm:$0xff] }
 0x549   : > { %v3486_v10 = vmax.f32 %v3438_v14, 0.0  ;;  %v3420_v30 = vadd.f32 %v8417_v44, %v3366_v7 }
 0x54b   : > { %v8451_v25 = vmax.f32 %v3462_v23, %v3486_v10  ;;  %v3468_v57 = vmax.f32 %v3420_v30, 0.0  ;;  %v1408_v30 = vadd.f32 %v7274_v11, %v7142_v55  ;;  %v5629_v11 = vld [vmem:[%s9571_s4 + $0x90] sm:$0xff] }
 0x54c   : > { %v3329_v62 = vpop.f32.mrf.mxu2 }
 0x54d   : > { %9708 = vst [vmem:[#allocation116_spill] sm:$0xff] %v8451_v25  ;;  %v3386_v33 = vadd.f32 %v3329_v62, %v8302_v38  ;;  %v9742_v25 = vld [vmem:[#allocation49_spill] sm:$0xff] }
 0x54e   : > { %v8455_v43 = vpop.f32.mrf.mxu0 }
 0x54f   : > { %9709 = vst [vmem:[#allocation117_spill] sm:$0xff] %v8455_v43  ;;  %v3440_v40 = vadd.f32 %v8417_v44, %v3386_v33  ;;  %v9756_v43 = vld [vmem:[#allocation56_spill] sm:$0xff] }
 0x551   : > { %v3488_v18 = vmax.f32 %v3440_v40, 0.0 }
 0x553   : > { %v8460_v51 = vmax.f32 %v3464_v32, %v3488_v18  ;;  %v3422_v18 = vadd.f32 %v8417_v44, %v3368_v46  ;;  %v5631_v46 = vld [vmem:[%s9571_s4 + $0xa0] sm:$0xff] }
 0x554   : > { %v3332_v61 = vpop.f32.mrf.mxu2 }
 0x555   : > { %9710 = vst [vmem:[#allocation118_spill] sm:$0xff] %v8460_v51  ;;  %v3388_v17 = vadd.f32 %v3332_v61, %v8309_v45  ;;  %v5645_v45 = vld [vmem:[%s9571_s4 + $0x110] sm:$0xff] }
 0x556   : > { %v8464_v42 = vpop.f32.mrf.mxu0  ;;  %3755 = vmatpush.msrb.mxu0 %v5645_v45  ;;  %v9716_v45 = vld [vmem:[#allocation26_spill] sm:$0xff] }
 0x557   : > { %9711 = vst [vmem:[#allocation119_spill] sm:$0xff] %v8464_v42  ;;  %v3442_v38 = vadd.f32 %v8417_v44, %v3388_v17  ;;  %v5635_v17 = vld [vmem:[%s9571_s4 + $0xc0] sm:$0xff] }
 0x558   : > { %3756 = vmatpush.msrb.mxu0 %v5643_v8  ;;  %v9717_v8 = vld [vmem:[#allocation15_spill] sm:$0xff] }
 0x559   : > { %v3490_v14 = vmax.f32 %v3442_v38, 0.0  ;;  %v3470_v38 = vmax.f32 %v3422_v18, 0.0  ;;  %v9722_v18 = vld [vmem:[#allocation33_spill] sm:$0xff] }
 0x55b   : > { %v8469_v23 = vmax.f32 %v3466_v39, %v3490_v14  ;;  %v3370_v39 = vadd.f32 %v8397_v60, %v8204_v47  ;;  %v9718_v47 = vld [vmem:[#allocation28_spill] sm:$0xff] }
 0x55c   : > { %v3335_v4 = vpop.f32.mrf.mxu2  ;;  %v1414_v60 = vadd.f32 %v9718_v47, %v9717_v8  ;;  %v9729_v8 = vld [vmem:[#allocation21_spill] sm:$0xff]  ;;  %v9730_v47 = vld [vmem:[#allocation42_spill] sm:$0xff] }
 0x55d   : > { %9712 = vst [vmem:[#allocation120_spill] sm:$0xff] %v8469_v23  ;;  %v3390_v2 = vadd.f32 %v3335_v4, %v8316_v20  ;;  %v5641_v20 = vld [vmem:[%s9571_s4 + $0xf0] sm:$0xff]  ;;  %v1405_v4 = vadd.f32 %v7244_v56, %v7135_v41  ;;  %v3424_v56 = vadd.f32 %v8417_v44, %v3370_v39  ;;  %v9743_v23 = vld [vmem:[#allocation31_spill] sm:$0xff] }
 0x55e   : > { %v8473_v10 = vpop.f32.mrf.mxu0  ;;  %3757 = vmatpush.msrb.mxu0 %v5641_v20  ;;  %v9720_v20 = vld [vmem:[#allocation30_spill] sm:$0xff] }
 0x55f   : > { %v3444_v62 = vadd.f32 %v8417_v44, %v3390_v2  ;;  %v9715_v2 = vld [vmem:[#allocation14_spill] sm:$0xff] }
 0x560   : > { %3758 = vmatpush.msrb.mxu0 %v5639_v59  ;;  %v9721_v59 = vld [vmem:[#allocation17_spill] sm:$0xff] }
 0x561   : > { %v3492_v33 = vmax.f32 %v3444_v62, 0.0  ;;  %v1411_v62 = vadd.f32 %v9716_v45, %v9715_v2  ;;  %v1420_v41 = vadd.f32 %v9722_v18, %v9721_v59  ;;  %v9728_v2 = vld [vmem:[#allocation39_spill] sm:$0xff]  ;;  %v9734_v59 = vld [vmem:[#allocation45_spill] sm:$0xff] }
 0x562   : > { %3759 = vmatpush.msrb.mxu0 %v5637_v16  ;;  %v9724_v16 = vld [vmem:[#allocation35_spill] sm:$0xff] }
 0x563   : > { %v8487_v40 = vmax.f32 %v3468_v57, %v3492_v33  ;;  %v9719_v33 = vld [vmem:[#allocation16_spill] sm:$0xff] }
 0x564   : > { %v3338_v32 = vpop.f32.mrf.mxu2  ;;  %3760 = vmatpush.msrb.mxu0 %v5635_v17  ;;  %v9725_v17 = vld [vmem:[#allocation19_spill] sm:$0xff] }
 0x565   : > { %9713 = vst [vmem:[#allocation121_spill] sm:$0xff] %v8487_v40  ;;  %v3392_v61 = vadd.f32 %v3338_v32, %v8323_v36  ;;  %v5633_v36 = vld [vmem:[%s9571_s4 + $0xb0] sm:$0xff]  ;;  %v1417_v32 = vadd.f32 %v9720_v20, %v9719_v33  ;;  %v1432_v33 = vadd.f32 %v9730_v47, %v9729_v8  ;;  %v9733_v20 = vld [vmem:[#allocation23_spill] sm:$0xff]  ;;  %v9741_v47 = vld [vmem:[#allocation29_spill] sm:$0xff] }
 0x566   : > { %v8494_v54 = vpop.f32.mrf.mxu0  ;;  %3761 = vmatpush.msrb.mxu0 %v5633_v36  ;;  %v9727_v36 = vld [vmem:[#allocation20_spill] sm:$0xff]  ;;  %v1438_v18 = vadd.f32 %v9734_v59, %v9733_v20  ;;  %v1450_v51 = vadd.f32 %v9742_v25, %v9741_v47  ;;  %v9746_v20 = vld [vmem:[#allocation51_spill] sm:$0xff] }
 0x567   : > { %v3446_v5 = vadd.f32 %v8417_v44, %v3392_v61  ;;  %v9723_v61 = vld [vmem:[#allocation18_spill] sm:$0xff]  ;;  %v1429_v45 = vadd.f32 %v9728_v2, %v9727_v36  ;;  %v9739_v2 = vld [vmem:[#allocation27_spill] sm:$0xff]  ;;  %v9745_v40 = vld [vmem:[#allocation32_spill] sm:$0xff] }
 0x568   : > { %3762 = vmatpush.msrb.mxu0 %v5631_v46  ;;  %v1447_v8 = vadd.f32 %v9740_v26, %v9739_v2  ;;  %v1456_v59 = vadd.f32 %v9746_v20, %v9745_v40  ;;  %v9751_v2 = vld [vmem:[#allocation38_spill] sm:$0xff]  ;;  %v9753_v47 = vld [vmem:[#allocation40_spill] sm:$0xff]  ;;  %v9758_v20 = vld [vmem:[#allocation57_spill] sm:$0xff] }
 0x569   : > { %v3494_v7 = vmax.f32 %v3446_v5, 0.0  ;;  %v1423_v5 = vadd.f32 %v9724_v16, %v9723_v61  ;;  %v1441_v61 = vadd.f32 %v9736_v22, %v9735_v12  ;;  %v3372_v12 = vadd.f32 %v8401_v34, %v8218_v19  ;;  %v9759_v19 = vld [vmem:[#allocation58_spill] sm:$0xff] }
 0x56a   : > { %3763 = vmatpush.msrb.mxu0 %v5629_v11  ;;  %v9748_v11 = vld [vmem:[#allocation52_spill] sm:$0xff]  ;;  %v1465_v25 = vadd.f32 %v9752_v37, %v9751_v2  ;;  %v2129_v34 = vadd.f32 %v9759_v19, %v1405_v4  ;;  %v9760_v37 = vld [vmem:[#allocation59_spill] sm:$0xff]  ;;  %v2145_v4 = vadd.f32 %v7814_v24, %v1429_v45  ;;  %v2163_v24 = vadd.f32 %v7949_v13, %v1456_v59  ;;  %v9769_v13 = vld [vmem:[#allocation66_spill] sm:$0xff] }
 0x56b   : > { %v8508_v14 = vmax.f32 %v3470_v38, %v3494_v7  ;;  %v9726_v38 = vld [vmem:[#allocation37_spill] sm:$0xff]  ;;  %v9771_v59 = vld [vmem:[#allocation68_spill] sm:$0xff] }
 0x56c   : > { %v3341_v57 = vpop.f32.mrf.mxu2  ;;  %v1426_v7 = vadd.f32 %v9726_v38, %v9725_v17  ;;  %v9737_v17 = vld [vmem:[#allocation25_spill] sm:$0xff]  ;;  %v9738_v38 = vld [vmem:[#allocation47_spill] sm:$0xff] }
 0x56d   : > { %9714 = vst [vmem:[#allocation122_spill] sm:$0xff] %v8508_v14  ;;  %v3394_v55 = vadd.f32 %v3341_v57, %v8330_v48  ;;  %v9731_v48 = vld [vmem:[#allocation22_spill] sm:$0xff]  ;;  %v9732_v57 = vld [vmem:[#allocation44_spill] sm:$0xff]  ;;  %v1444_v36 = vadd.f32 %v9738_v38, %v9737_v17  ;;  %v3472_v14 = vmax.f32 %v3424_v56, 0.0  ;;  %v9757_v56 = vld [vmem:[#allocation43_spill] sm:$0xff] }
 0x56e   : > { %v8538_v39 = vpop.f32.mrf.mxu0  ;;  %v1435_v46 = vadd.f32 %v9732_v57, %v9731_v48  ;;  %v9744_v48 = vld [vmem:[#allocation50_spill] sm:$0xff]  ;;  %v9749_v38 = vld [vmem:[#allocation36_spill] sm:$0xff]  ;;  %v1474_v42 = vadd.f32 %v9758_v20, %v9757_v56  ;;  %v9775_v56 = vld [vmem:[#allocation91_spill] sm:$0xff] }
 0x56f   : > { %v3448_v16 = vadd.f32 %v8417_v44, %v3394_v55  ;;  %v1453_v57 = vadd.f32 %v9744_v48, %v9743_v23  ;;  %v9747_v55 = vld [vmem:[#allocation34_spill] sm:$0xff]  ;;  %v1462_v26 = vadd.f32 %v9750_v31, %v9749_v38  ;;  %v1468_v23 = vadd.f32 %v9754_v50, %v9753_v47  ;;  %v9755_v48 = vld [vmem:[#allocation41_spill] sm:$0xff] }
 0x570   : > { %v1459_v17 = vadd.f32 %v9748_v11, %v9747_v55  ;;  %v1471_v40 = vadd.f32 %v9756_v43, %v9755_v48  ;;  %v2131_v55 = vadd.f32 %v7683_v52, %v1408_v30  ;;  %v2133_v31 = vadd.f32 %v7702_v27, %v1411_v62 }
 0x571   : > { %v3496_v22 = vmax.f32 %v3448_v16, 0.0  ;;  %v2135_v11 = vadd.f32 %v7721_v58, %v1414_v60  ;;  %v2137_v38 = vadd.f32 %v9760_v37, %v1417_v32  ;;  %v2139_v50 = vadd.f32 %v7769_v29, %v1420_v41  ;;  %v9761_v32 = vld [vmem:[#allocation76_spill] sm:$0xff] }
 0x572   : > { %v2141_v43 = vadd.f32 %v7784_v49, %v1423_v5  ;;  %v3426_v47 = vadd.f32 %v8417_v44, %v3372_v12  ;;  %v2147_v52 = vadd.f32 %v7829_v0, %v1432_v33  ;;  %v2149_v27 = vadd.f32 %v7844_v3, %v1435_v46  ;;  %v9762_v41 = vld [vmem:[#allocation104_spill] sm:$0xff]  ;;  %v9765_v33 = vld [vmem:[#allocation62_spill] sm:$0xff] }
 0x573   : > { %v8572_v16 = vmax.f32 %v3472_v14, %v3496_v22  ;;  %v2143_v14 = vadd.f32 %v7799_v1, %v1426_v7  ;;  %v2151_v30 = vadd.f32 %v7859_v6, %v1438_v18  ;;  %v2153_v62 = vadd.f32 %v7874_v9, %v1441_v61  ;;  %v9763_v9 = vld [vmem:[#allocation60_spill] sm:$0xff]  ;;  %v9772_v22 = vld [vmem:[#allocation69_spill] sm:$0xff] }
 0x574   : > { %v3344_v2 = vpop.f32.mrf.mxu2  ;;  %v2155_v29 = vadd.f32 %v7889_v15, %v1444_v36  ;;  %v2157_v60 = vadd.f32 %v7904_v28, %v1447_v8  ;;  %v2161_v1 = vadd.f32 %v7934_v63, %v1453_v57  ;;  %v2165_v0 = vadd.f32 %v7964_v21, %v1459_v17  ;;  %v9764_v15 = vld [vmem:[#allocation61_spill] sm:$0xff]  ;;  %v9766_v28 = vld [vmem:[#allocation63_spill] sm:$0xff] }
 0x575   : > { %v3396_v48 = vadd.f32 %v3344_v2, %v8337_v35  ;;  %v2159_v35 = vadd.f32 %v7919_v53, %v1450_v51  ;;  %v3474_v3 = vmax.f32 %v3426_v47, 0.0  ;;  %v3374_v6 = vadd.f32 %v9762_v41, %v9761_v32  ;;  %v9767_v53 = vld [vmem:[#allocation64_spill] sm:$0xff]  ;;  %v9768_v63 = vld [vmem:[#allocation65_spill] sm:$0xff]  ;;  %v9770_v8 = vld [vmem:[#allocation67_spill] sm:$0xff] }
 0x576   : > { %v3258_v58 = vpop.f32.mrf.mxu0  ;;  %v2167_v7 = vadd.f32 %v9763_v9, %v1462_v26  ;;  %v2169_v45 = vadd.f32 %v9764_v15, %v1465_v25  ;;  %v2171_v46 = vadd.f32 %v9765_v33, %v1468_v23  ;;  %v2173_v18 = vadd.f32 %v9766_v28, %v1471_v40  ;;  %v9773_v26 = vld [vmem:[#allocation70_spill] sm:$0xff]  ;;  %v9774_v23 = vld [vmem:[#allocation71_spill] sm:$0xff]  ;;  %v9778_v2 = vld [vmem:[#allocation73_spill] sm:$0xff] }
 0x577   : > { %v3450_v49 = vadd.f32 %v8417_v44, %v3396_v48  ;;  %v2175_v51 = vadd.f32 %v9767_v53, %v1474_v42  ;;  %v8603_v61 = vadd.f32 %v9768_v63, %v2129_v34  ;;  %v8606_v21 = vadd.f32 %v9769_v13, %v2131_v55  ;;  %v9776_v34 = vld [vmem:[#allocation90_spill] sm:$0xff]  ;;  %v9782_v41 = vld [vmem:[#allocation89_spill] sm:$0xff]  ;;  %v9783_v15 = vld [vmem:[#allocation79_spill] sm:$0xff] }
 0x578   : > { %v8611_v57 = vadd.f32 %v9770_v8, %v2133_v31  ;;  %v8614_v12 = vadd.f32 %v9771_v59, %v2135_v11  ;;  %v8617_v17 = vadd.f32 %v9772_v22, %v2137_v38  ;;  %v8620_v25 = vadd.f32 %v9773_v26, %v2139_v50  ;;  %v9777_v31 = vld [vmem:[#allocation72_spill] sm:$0xff]  ;;  %v9779_v47 = vld [vmem:[#allocation74_spill] sm:$0xff]  ;;  %v9780_v38 = vld [vmem:[#allocation77_spill] sm:$0xff] }
 0x579   : > { %v3498_v5 = vmax.f32 %v3450_v49, 0.0  ;;  %v2753_v40 = vadd.f32 %v9774_v23, %v2141_v43  ;;  %v2787_v20 = vadd.f32 %v9775_v56, %v2175_v51  ;;  %v3428_v19 = vadd.f32 %v8417_v44, %v3374_v6  ;;  %v9781_v50 = vld [vmem:[#allocation75_spill] sm:$0xff]  ;;  %v9784_v33 = vld [vmem:[#allocation108_spill] sm:$0xff]  ;;  %v9786_v53 = vld [vmem:[#allocation78_spill] sm:$0xff] }
 0x57a   : > { %v2755_v37 = vadd.f32 %v9777_v31, %v2143_v14  ;;  %v2757_v11 = vadd.f32 %v9778_v2, %v2145_v4  ;;  %v2759_v48 = vadd.f32 %v9779_v47, %v2147_v52  ;;  %v2763_v49 = vadd.f32 %v9780_v38, %v2151_v30  ;;  %v9785_v14 = vld [vmem:[#allocation105_spill] sm:$0xff]  ;;  %v9787_v52 = vld [vmem:[#allocation106_spill] sm:$0xff]  ;;  %v9788_v30 = vld [vmem:[#allocation88_spill] sm:$0xff] }
 0x57b   : > { %v8608_v36 = vmax.f32 %v3474_v3, %v3498_v5  ;;  %v2761_v32 = vadd.f32 %v9781_v50, %v2149_v27  ;;  %v2785_v5 = vadd.f32 %v9782_v41, %v2173_v18  ;;  %v8634_v6 = vadd.f32 %v9783_v15, %v2153_v62  ;;  %v9789_v18 = vld [vmem:[#allocation80_spill] sm:$0xff]  ;;  %v9790_v22 = vld [vmem:[#allocation81_spill] sm:$0xff]  ;;  %v9791_v62 = vld [vmem:[#allocation82_spill] sm:$0xff] }
 0x57c   : > { %v3347_v42 = vpop.f32.mrf.mxu2  ;;  %v8637_v28 = vperm.slane %v9784_v33, 0  ;;  %v3375_v4 = vadd.f32 %v9785_v14, %v2763_v49  ;;  %v3376_v51 = vadd.f32 %v9787_v52, %v9786_v53  ;;  %v2783_v63 = vadd.f32 %v9788_v30, %v2171_v46  ;;  %v9792_v23 = vld [vmem:[#allocation103_spill] sm:$0xff]  ;;  %v9796_v49 = vld [vmem:[#allocation86_spill] sm:$0xff]  ;;  %v9797_v50 = vld [vmem:[#allocation92_spill] sm:$0xff] }
 0x57d   : > { %v3398_v55 = vadd.f32 %v3347_v42, %v9776_v34  ;;  %v3476_v13 = vmax.f32 %v3428_v19, 0.0  ;;  %v3397_v27 = vadd.f32 %v3258_v58, %v2785_v5  ;;  %v8644_v59 = vadd.f32 %v9789_v18, %v2155_v29  ;;  %v9794_v46 = vld [vmem:[#allocation83_spill] sm:$0xff]  ;;  %v9795_v58 = vld [vmem:[#allocation102_spill] sm:$0xff]  ;;  %v9799_v5 = vld [vmem:[#allocation85_spill] sm:$0xff] }
 0x57e   : > { %v3261_v3 = vpop.f32.mrf.mxu0  ;;  %v2769_v26 = vadd.f32 %v9790_v22, %v2157_v60  ;;  %v2771_v42 = vadd.f32 %v9791_v62, %v2159_v35  ;;  %v3373_v56 = vadd.f32 %v9792_v23, %v2761_v32  ;;  %v2773_v19 = vadd.f32 %v9794_v46, %v2161_v1  ;;  %v9798_v32 = vld [vmem:[#allocation84_spill] sm:$0xff]  ;;  %v9800_v1 = vld [vmem:[#allocation101_spill] sm:$0xff] }
 0x57f   : > { %v3452_v43 = vadd.f32 %v8417_v44, %v3398_v55  ;;  %v3399_v9 = vadd.f32 %v3261_v3, %v2787_v20  ;;  %v9793_v20 = vld [vmem:[#allocation87_spill] sm:$0xff]  ;;  %v3395_v55 = vadd.f32 %v8538_v39, %v2783_v63  ;;  %v3371_v47 = vadd.f32 %v9795_v58, %v2759_v48  ;;  %v9804_v18 = vld [vmem:[#allocation117_spill] sm:$0xff] }
 0x580   : > { %v2781_v34 = vadd.f32 %v9793_v20, %v2169_v45  ;;  %v3429_v29 = vadd.f32 %v8637_v28, %v3375_v4  ;;  %v3430_v38 = vadd.f32 %v8417_v44, %v3376_v51  ;;  %v2779_v35 = vadd.f32 %v9796_v49, %v2167_v7 }
 0x581   : > { %v3500_v8 = vmax.f32 %v3452_v43, 0.0  ;;  %v3453_v2 = vadd.f32 %v8637_v28, %v3399_v9  ;;  %v3451_v45 = vadd.f32 %v8637_v28, %v3397_v27  ;;  %v2775_v41 = vadd.f32 %v9798_v32, %v2163_v24  ;;  %v9802_v24 = vld [vmem:[#allocation119_spill] sm:$0xff] }
 0x582   : > { %v3393_v3 = vadd.f32 %v8494_v54, %v2781_v34  ;;  %v2777_v43 = vadd.f32 %v9799_v5, %v2165_v0  ;;  %v3369_v9 = vadd.f32 %v9800_v1, %v2757_v11  ;;  %v3427_v48 = vadd.f32 %v8637_v28, %v3373_v56  ;;  %v9801_v54 = vld [vmem:[#allocation100_spill] sm:$0xff]  ;;  %v9805_v56 = vld [vmem:[#allocation98_spill] sm:$0xff] }
 0x583   : > { %v3524_v31 = vmax.f32 %v3476_v13, %v3500_v8  ;;  %v3391_v15 = vadd.f32 %v8473_v10, %v2779_v35  ;;  %v3449_v33 = vadd.f32 %v8637_v28, %v3395_v55  ;;  %v3501_v14 = vmax.f32 %v3453_v2, 0.0  ;;  %v9803_v13 = vld [vmem:[#allocation99_spill] sm:$0xff] }
 0x584   : > { %v3350_v60 = vpop.f32.mrf.mxu2  ;;  %v3367_v4 = vadd.f32 %v9801_v54, %v2755_v37  ;;  %v3425_v53 = vadd.f32 %v8637_v28, %v3371_v47  ;;  %v3477_v52 = vmax.f32 %v3429_v29, 0.0  ;;  %v3478_v51 = vmax.f32 %v3430_v38, 0.0  ;;  %v9806_v2 = vld [vmem:[#allocation115_spill] sm:$0xff]  ;;  %v9807_v38 = vld [vmem:[#allocation97_spill] sm:$0xff] }
 0x585   : > { %v3400_v39 = vadd.f32 %v3350_v60, %v9797_v50  ;;  %v3389_v30 = vadd.f32 %v9802_v24, %v2777_v43  ;;  %v3447_v0 = vadd.f32 %v8637_v28, %v3393_v3  ;;  %v3499_v11 = vmax.f32 %v3451_v45, 0.0  ;;  %v9808_v3 = vld [vmem:[#allocation113_spill] sm:$0xff]  ;;  %v9810_v43 = vld [vmem:[#allocation111_spill] sm:$0xff] }
 0x586   : > { %v3365_v27 = vadd.f32 %v9803_v13, %v2753_v40  ;;  %v3423_v10 = vadd.f32 %v8637_v28, %v3369_v9  ;;  %v3475_v8 = vmax.f32 %v3427_v48, 0.0  ;;  %v3387_v22 = vadd.f32 %v9804_v18, %v2775_v41 }
 0x587   : > { %v3454_v7 = vadd.f32 %v8417_v44, %v3400_v39  ;;  %v3445_v44 = vadd.f32 %v8637_v28, %v3391_v15  ;;  %v3497_v37 = vmax.f32 %v3449_v33, 0.0  ;;  %v3525_v62 = vmax.f32 %v3477_v52, %v3501_v14 }
 0x588   : > { %v3363_v20 = vadd.f32 %v9805_v56, %v8620_v25  ;;  %v3421_v34 = vadd.f32 %v8637_v28, %v3367_v4  ;;  %v3473_v55 = vmax.f32 %v3425_v53, 0.0  ;;  %v3385_v46 = vadd.f32 %v9806_v2, %v2773_v19  ;;  %v9809_v19 = vld [vmem:[#allocation96_spill] sm:$0xff] }
 0x589   : > { %v3502_v63 = vmax.f32 %v3454_v7, 0.0  ;;  %v3443_v40 = vadd.f32 %v8637_v28, %v3389_v30  ;;  %v3495_v58 = vmax.f32 %v3447_v0, 0.0  ;;  %v3523_v47 = vmax.f32 %v3475_v8, %v3499_v11 }
 0x58a   : > { %v3361_v60 = vadd.f32 %v9807_v38, %v8617_v17  ;;  %v3419_v49 = vadd.f32 %v8637_v28, %v3365_v27  ;;  %v3471_v35 = vmax.f32 %v3423_v10, 0.0  ;;  %v3383_v45 = vadd.f32 %v9808_v3, %v2771_v42  ;;  %v9820_v3 = vld [vmem:[#allocation116_spill] sm:$0xff] }
 0x58b   : > { %v3526_v23 = vmax.f32 %v3478_v51, %v3502_v63  ;;  %v3441_v25 = vadd.f32 %v8637_v28, %v3387_v22  ;;  %v3493_v50 = vmax.f32 %v3445_v44, 0.0  ;;  %v3521_v39 = vmax.f32 %v3473_v55, %v3497_v37  ;;  %v9815_v63 = vld [vmem:[#allocation122_spill] sm:$0xff]  ;;  %v9817_v44 = vld [vmem:[#allocation121_spill] sm:$0xff] }
 0x58c   : > { %v8687_v32 = vmax.f32 %v3523_v47, %v3524_v31  ;;  %v3359_v41 = vadd.f32 %v9809_v19, %v8614_v12  ;;  %v3417_v17 = vadd.f32 %v8637_v28, %v3363_v20  ;;  %v3469_v5 = vmax.f32 %v3421_v34, 0.0  ;;  %v9811_v12 = vld [vmem:[#allocation95_spill] sm:$0xff]  ;;  %v9818_v34 = vld [vmem:[#allocation120_spill] sm:$0xff]  ;;  %v9819_v47 = vld [vmem:[#allocation118_spill] sm:$0xff] }
 0x58d   : > { %v8680_v29 = vmax.f32 %v3525_v62, %v3526_v23  ;;  %v3381_v1 = vadd.f32 %v9810_v43, %v2769_v26  ;;  %v3439_v42 = vadd.f32 %v8637_v28, %v3385_v46  ;;  %v3491_v9 = vmax.f32 %v3443_v40, 0.0  ;;  %v9812_v26 = vld [vmem:[#allocation109_spill] sm:$0xff] }
 0x58e   : > { %v3519_v48 = vmax.f32 %v3471_v35, %v3495_v58  ;;  %v8698_v31 = vmax.f32 %v3521_v39, %v8608_v36  ;;  %v3357_v15 = vadd.f32 %v9811_v12, %v8611_v57  ;;  %v3415_v33 = vadd.f32 %v8637_v28, %v3361_v60  ;;  %v9813_v57 = vld [vmem:[#allocation94_spill] sm:$0xff]  ;;  %v3625_v12 = vld [vmem:[%s9571_s4 + $0x68] sm:$0xff] }
 0x58f   : > { %3575 = vmatpush.msra.mxu1 %v8680_v29  ;;  %3667 = vmatpush.msrb.mxu3 %v8680_v29  ;;  %v3467_v14 = vmax.f32 %v3419_v49, 0.0  ;;  %v3379_v7 = vadd.f32 %v9812_v26, %v8644_v59  ;;  %v3437_v54 = vadd.f32 %v8637_v28, %v3383_v45  ;;  %v3489_v4 = vmax.f32 %v3441_v25, 0.0  ;;  %v9814_v59 = vld [vmem:[#allocation107_spill] sm:$0xff] }
 0x590   : > { %3973 = vmatpush.msra.mxu0 %v8680_v29  ;;  %v3517_v36 = vmax.f32 %v3469_v5, %v3493_v50  ;;  %v8710_v53 = vmax.f32 %v3519_v48, %v8572_v16  ;;  %v3355_v52 = vadd.f32 %v9813_v57, %v8606_v21  ;;  %v3413_v51 = vadd.f32 %v8637_v28, %v3359_v41  ;;  %v9816_v21 = vld [vmem:[#allocation93_spill] sm:$0xff]  ;;  %v9821_v50 = vld [vmem:[#allocation114_spill] sm:$0xff]  ;;  %v9822_v41 = vld [vmem:[#allocation112_spill] sm:$0xff] }
 0x591   : > { %3576 = vmatpush.msra.mxu1 %v8687_v32  ;;  %3668 = vmatpush.msrb.mxu3 %v8687_v32  ;;  %v3465_v24 = vmax.f32 %v3417_v17, 0.0  ;;  %v3377_v30 = vadd.f32 %v9814_v59, %v8634_v6  ;;  %v3435_v0 = vadd.f32 %v8637_v28, %v3381_v1  ;;  %v3487_v11 = vmax.f32 %v3439_v42, 0.0  ;;  %v9823_v5 = vld [vmem:[#allocation110_spill] sm:$0xff]  ;;  %v3627_v48 = vld [vmem:[%s9571_s4 + $0x78] sm:$0xff]  ;;  %v3621_v26 = vld [vmem:[%s9571_s4 + $0x48] sm:$0xff] }
 0x592   : > { %3974 = vmatpush.msra.mxu0 %v8687_v32  ;;  %v3515_v16 = vmax.f32 %v3467_v14, %v3491_v9  ;;  %v8722_v13 = vmax.f32 %v3517_v36, %v9815_v63  ;;  %v3353_v27 = vadd.f32 %v9816_v21, %v8603_v61  ;;  %v3411_v10 = vadd.f32 %v8637_v28, %v3357_v15  ;;  %v3539_v1 = vld [vmem:[%s9570_s3] sm:$0xff]  ;;  %v3629_v9 = vld [vmem:[%s9571_s4 + $0x88] sm:$0xff]  ;;  %v3623_v15 = vld [vmem:[%s9571_s4 + $0x58] sm:$0xff] }
 0x593   : > { %3577 = vmatpush.msra.mxu1 %v8698_v31  ;;  %3669 = vmatpush.msrb.mxu3 %v8698_v31  ;;  %v3463_v8 = vmax.f32 %v3415_v33, 0.0  ;;  %v3433_v6 = vadd.f32 %v8637_v28, %v3379_v7  ;;  %v3485_v18 = vmax.f32 %v3437_v54, 0.0  ;;  %v3513_v22 = vmax.f32 %v3465_v24, %v3489_v4  ;;  %v5613_v42 = vld [vmem:[%s9570_s3 + $0x40] sm:$0xff]  ;;  %v3540_v33 = vld [vmem:[%s9570_s3 + $0x8] sm:$0xff]  ;;  %v3619_v7 = vld [vmem:[%s9571_s4 + $0x38] sm:$0xff] }
 0x594   : > { %3975 = vmatpush.msra.mxu0 %v8698_v31  ;;  %v8732_v37 = vmax.f32 %v3515_v16, %v9817_v44  ;;  %v3409_v62 = vadd.f32 %v8637_v28, %v3355_v52  ;;  %v3461_v23 = vmax.f32 %v3413_v51, 0.0  ;;  %v3431_v61 = vadd.f32 %v8637_v28, %v3377_v30  ;;  %v5614_v14 = vld [vmem:[%s9570_s3 + $0x48] sm:$0xff]  ;;  %v3615_v4 = vld [vmem:[%s9571_s4 + $0x18] sm:$0xff]  ;;  %v3541_v36 = vld [vmem:[%s9570_s3 + $0x10] sm:$0xff] }
 0x595   : > { %3578 = vmatpush.msra.mxu1 %v8710_v53  ;;  %3670 = vmatpush.msrb.mxu3 %v8710_v53  ;;  %v3483_v56 = vmax.f32 %v3435_v0, 0.0  ;;  %v3511_v20 = vmax.f32 %v3463_v8, %v3487_v11  ;;  %v8740_v55 = vmax.f32 %v3513_v22, %v9818_v34  ;;  %v3407_v2 = vadd.f32 %v8637_v28, %v3353_v27  ;;  %v3617_v54 = vld [vmem:[%s9571_s4 + $0x28] sm:$0xff]  ;;  %v5615_v57 = vld [vmem:[%s9570_s3 + $0x50] sm:$0xff]  ;;  %v3542_v51 = vld [vmem:[%s9570_s3 + $0x18] sm:$0xff] }
 0x596   : > { %3976 = vmatpush.msra.mxu0 %v8710_v53  ;;  %v3459_v46 = vmax.f32 %v3411_v10, 0.0  ;;  %v3481_v40 = vmax.f32 %v3433_v6, 0.0  ;;  %v3509_v58 = vmax.f32 %v3461_v23, %v3485_v18  ;;  %v3457_v60 = vmax.f32 %v3409_v62, 0.0  ;;  %v3613_v52 = vld [vmem:[%s9571_s4 + $0x8] sm:$0xff]  ;;  %v5616_v24 = vld [vmem:[%s9570_s3 + $0x58] sm:$0xff]  ;;  %v3628_v59 = vld [vmem:[%s9571_s4 + $0x80] sm:$0xff] }
 0x597   : > { %3579 = vmatpush.msra.mxu1 %v8722_v13  ;;  %3671 = vmatpush.msrb.mxu3 %v8722_v13  ;;  %v8747_v38 = vmax.f32 %v3511_v20, %v9819_v47  ;;  %v3479_v49 = vmax.f32 %v3431_v61, 0.0  ;;  %v3455_v28 = vmax.f32 %v3407_v2, 0.0  ;;  %v3626_v30 = vld [vmem:[%s9571_s4 + $0x70] sm:$0xff]  ;;  %v3624_v0 = vld [vmem:[%s9571_s4 + $0x60] sm:$0xff]  ;;  %v3544_v8 = vld [vmem:[%s9570_s3 + $0x28] sm:$0xff] }
 0x598   : > { %3977 = vmatpush.msra.mxu0 %v8722_v13  ;;  %v3507_v35 = vmax.f32 %v3459_v46, %v3483_v56  ;;  %v8753_v45 = vmax.f32 %v3509_v58, %v9820_v3  ;;  %v3505_v25 = vmax.f32 %v3457_v60, %v3481_v40  ;;  %v3543_v11 = vld [vmem:[%s9570_s3 + $0x20] sm:$0xff]  ;;  %v3622_v16 = vld [vmem:[%s9571_s4 + $0x50] sm:$0xff]  ;;  %v5618_v18 = vld [vmem:[%s9570_s3 + $0x68] sm:$0xff] }
 0x599   : > { %3580 = vmatpush.msra.mxu1 %v8732_v37  ;;  %3672 = vmatpush.msrb.mxu3 %v8732_v37  ;;  %v3503_v19 = vmax.f32 %v3455_v28, %v3479_v49  ;;  %v5617_v63 = vld [vmem:[%s9570_s3 + $0x60] sm:$0xff]  ;;  %v3618_v27 = vld [vmem:[%s9571_s4 + $0x30] sm:$0xff]  ;;  %v5712_v44 = vld [vmem:[%s9571_s4 + $0x1a8] sm:$0xff] }
 0x59a   : > { %3978 = vmatpush.msra.mxu0 %v8732_v37  ;;  %v8759_v39 = vmax.f32 %v3507_v35, %v9821_v50  ;;  %v8765_v17 = vmax.f32 %v3505_v25, %v9822_v41  ;;  %v3620_v21 = vld [vmem:[%s9571_s4 + $0x40] sm:$0xff]  ;;  %v3614_v6 = vld [vmem:[%s9571_s4 + $0x10] sm:$0xff]  ;;  %v5710_v62 = vld [vmem:[%s9571_s4 + $0x198] sm:$0xff] }
 0x59b   : > { %3581 = vmatpush.msra.mxu1 %v8740_v55  ;;  %3673 = vmatpush.msrb.mxu3 %v8740_v55  ;;  %v8771_v43 = vmax.f32 %v3503_v19, %v9823_v5  ;;  %v3616_v10 = vld [vmem:[%s9571_s4 + $0x20] sm:$0xff]  ;;  %v3545_v23 = vld [vmem:[%s9570_s3 + $0x30] sm:$0xff]  ;;  %v5708_v61 = vld [vmem:[%s9571_s4 + $0x188] sm:$0xff] }
 0x59c   : > { %3979 = vmatpush.msra.mxu0 %v8740_v55  ;;  %v3612_v22 = vld [vmem:[%s9571_s4] sm:$0xff]  ;;  %v5619_v56 = vld [vmem:[%s9570_s3 + $0x70] sm:$0xff]  ;;  %v5706_v20 = vld [vmem:[%s9571_s4 + $0x178] sm:$0xff] }
 0x59d   : > { %3582 = vmatpush.msra.mxu1 %v8747_v38  ;;  %3674 = vmatpush.msrb.mxu3 %v8747_v38  ;;  %v5704_v34 = vld [vmem:[%s9571_s4 + $0x168] sm:$0xff]  ;;  %v5702_v2 = vld [vmem:[%s9571_s4 + $0x158] sm:$0xff] }
 0x59e   : > { %3980 = vmatpush.msra.mxu0 %v8747_v38  ;;  %v3546_v46 = vld [vmem:[%s9570_s3 + $0x38] sm:$0xff]  ;;  %v5700_v40 = vld [vmem:[%s9571_s4 + $0x148] sm:$0xff] }
 0x59f   : > { %3583 = vmatpush.msra.mxu1 %v8753_v45  ;;  %3675 = vmatpush.msrb.mxu3 %v8753_v45  ;;  %v5620_v58 = vld [vmem:[%s9570_s3 + $0x78] sm:$0xff]  ;;  %v5644_v49 = vld [vmem:[%s9571_s4 + $0x108] sm:$0xff] }
 0x5a0   : > { %3981 = vmatpush.msra.mxu0 %v8753_v45  ;;  %v5698_v47 = vld [vmem:[%s9571_s4 + $0x138] sm:$0xff]  ;;  %v5640_v3 = vld [vmem:[%s9571_s4 + $0xe8] sm:$0xff] }
 0x5a1   : > { %3584 = vmatpush.msra.mxu1 %v8759_v39  ;;  %3676 = vmatpush.msrb.mxu3 %v8759_v39  ;;  %v5646_v60 = vld [vmem:[%s9571_s4 + $0x118] sm:$0xff]  ;;  %v5696_v25 = vld [vmem:[%s9571_s4 + $0x128] sm:$0xff] }
 0x5a2   : > { %3982 = vmatpush.msra.mxu0 %v8759_v39  ;;  %3796 = vmatpush.msrb.mxu2 %v5646_v60  ;;  %v5642_v35 = vld [vmem:[%s9571_s4 + $0xf8] sm:$0xff]  ;;  %v5636_v50 = vld [vmem:[%s9571_s4 + $0xc8] sm:$0xff]  ;;  %v5695_v60 = vld [vmem:[%s9571_s4 + $0x120] sm:$0xff] }
 0x5a3   : > { %3585 = vmatpush.msra.mxu1 %v8765_v17  ;;  %3677 = vmatpush.msrb.mxu3 %v8765_v17  ;;  %v5638_v28 = vld [vmem:[%s9571_s4 + $0xd8] sm:$0xff]  ;;  %v5632_v41 = vld [vmem:[%s9571_s4 + $0xa8] sm:$0xff] }
 0x5a4   : > { %3983 = vmatpush.msra.mxu0 %v8765_v17  ;;  %3797 = vmatpush.msrb.mxu2 %v5644_v49  ;;  %v5634_v19 = vld [vmem:[%s9571_s4 + $0xb8] sm:$0xff]  ;;  %v5753_v49 = vld [vmem:[%s9571_s4 + $0x1f0] sm:$0xff] }
 0x5a5   : > { %3586 = vmatpush.msra.mxu1 %v8771_v43  ;;  %3678 = vmatpush.msrb.mxu3 %v8771_v43  ;;  %v5630_v5 = vld [vmem:[%s9571_s4 + $0x98] sm:$0xff] }
 0x5a6   : > { %3984 = vmatpush.msra.mxu0 %v8771_v43  ;;  %5605 = vmatmul.msk.f32.vlgmr.msra.gmra.mxu1 %vm484_vm0, %v3539_v1 }
 0x5a7   : > { %5621 = vmatmul.msk.f32.vlgmr.msrb.gmra.mxu3 %vm484_vm0, %v5613_v42  ;;  %3861 = vmatpush.msrb.mxu1 %v3628_v59  ;;  %v5685_v59 = vld [vmem:[%s9570_s3 + $0xb0] sm:$0xff] }
 0x5a8   : > { %3902 = vmatpush.msra.mxu3 %v3629_v9  ;;  %3798 = vmatpush.msrb.mxu2 %v5642_v35  ;;  %v5751_v35 = vld [vmem:[%s9571_s4 + $0x1e0] sm:$0xff] }
 0x5a9   : > { %3862 = vmatpush.msrb.mxu1 %v3626_v30  ;;  %v5736_v30 = vld [vmem:[%s9570_s3 + $0xf8] sm:$0xff] }
 0x5aa   : > { %3903 = vmatpush.msra.mxu3 %v3627_v48  ;;  %3799 = vmatpush.msrb.mxu2 %v5640_v3  ;;  %v5729_v48 = vld [vmem:[%s9570_s3 + $0xc0] sm:$0xff]  ;;  %v5749_v3 = vld [vmem:[%s9571_s4 + $0x1d0] sm:$0xff] }
 0x5ab   : > { %3863 = vmatpush.msrb.mxu1 %v3624_v0  ;;  %v5686_v0 = vld [vmem:[%s9570_s3 + $0xb8] sm:$0xff] }
 0x5ac   : > { %3904 = vmatpush.msra.mxu3 %v3625_v12  ;;  %3800 = vmatpush.msrb.mxu2 %v5638_v28  ;;  %v5747_v28 = vld [vmem:[%s9571_s4 + $0x1c0] sm:$0xff] }
 0x5ad   : > { %3864 = vmatpush.msrb.mxu1 %v3622_v16 }
 0x5ae   : > { %3905 = vmatpush.msra.mxu3 %v3623_v15  ;;  %5606 = vmatmul.msk.f32.gmra.mxu1 %vm484_vm0, %v3540_v33  ;;  %v5679_v15 = vld [vmem:[%s9570_s3 + $0x80] sm:$0xff]  ;;  %v5730_v33 = vld [vmem:[%s9570_s3 + $0xc8] sm:$0xff] }
 0x5af   : > { %5622 = vmatmul.msk.f32.gmra.mxu3 %vm484_vm0, %v5614_v14  ;;  %3865 = vmatpush.msrb.mxu1 %v3620_v21  ;;  %v5680_v14 = vld [vmem:[%s9570_s3 + $0x88] sm:$0xff] }
 0x5b0   : > { %3906 = vmatpush.msra.mxu3 %v3621_v26  ;;  %3801 = vmatpush.msrb.mxu2 %v5636_v50  ;;  %v5731_v26 = vld [vmem:[%s9570_s3 + $0xd0] sm:$0xff] }
 0x5b1   : > { %3866 = vmatpush.msrb.mxu1 %v3618_v27 }
 0x5b2   : > { %3907 = vmatpush.msra.mxu3 %v3619_v7  ;;  %3802 = vmatpush.msrb.mxu2 %v5634_v19  ;;  %v5681_v7 = vld [vmem:[%s9570_s3 + $0x90] sm:$0xff] }
 0x5b3   : > { %3867 = vmatpush.msrb.mxu1 %v3616_v10  ;;  %v5745_v19 = vld [vmem:[%s9571_s4 + $0x1b0] sm:$0xff] }
 0x5b4   : > { %3908 = vmatpush.msra.mxu3 %v3617_v54  ;;  %3803 = vmatpush.msrb.mxu2 %v5632_v41  ;;  %v5732_v54 = vld [vmem:[%s9570_s3 + $0xd8] sm:$0xff] }
 0x5b5   : > { %3868 = vmatpush.msrb.mxu1 %v3614_v6  ;;  %v5709_v6 = vld [vmem:[%s9571_s4 + $0x190] sm:$0xff] }
 0x5b6   : > { %3909 = vmatpush.msra.mxu3 %v3615_v4  ;;  %5607 = vmatmul.msk.f32.gmra.mxu1 %vm484_vm0, %v3541_v36  ;;  %v5682_v4 = vld [vmem:[%s9570_s3 + $0x98] sm:$0xff]  ;;  %v5733_v36 = vld [vmem:[%s9570_s3 + $0xe0] sm:$0xff] }
 0x5b7   : > { %5623 = vmatmul.msk.f32.gmra.mxu3 %vm484_vm0, %v5615_v57  ;;  %3869 = vmatpush.msrb.mxu1 %v3612_v22  ;;  %v5683_v57 = vld [vmem:[%s9570_s3 + $0xa0] sm:$0xff]  ;;  %v5705_v22 = vld [vmem:[%s9571_s4 + $0x170] sm:$0xff] }
 0x5b8   : > { %3910 = vmatpush.msra.mxu3 %v3613_v52  ;;  %3804 = vmatpush.msrb.mxu2 %v5630_v5  ;;  %v5734_v52 = vld [vmem:[%s9570_s3 + $0xe8] sm:$0xff] }
 0x5b9   : > { %4101 = vmatpush.msra.mxu1 %v5712_v44 }
 0x5ba   : > { %4188 = vmatpush.msrb.mxu3 %v8680_v29 }
 0x5bb   : > { %4102 = vmatpush.msra.mxu1 %v5710_v62 }
 0x5bc   : > { %4189 = vmatpush.msrb.mxu3 %v8687_v32 }
 0x5bd   : > { %4103 = vmatpush.msra.mxu1 %v5708_v61  ;;  %v5761_v61 = vld [vmem:[%s9571_s4 + $0x230] sm:$0xff] }
 0x5be   : > { %4190 = vmatpush.msrb.mxu3 %v8698_v31  ;;  %5608 = vmatmul.msk.f32.gmra.mxu1 %vm484_vm0, %v3542_v51  ;;  %v5684_v51 = vld [vmem:[%s9570_s3 + $0xa8] sm:$0xff] }
 0x5bf   : > { %5624 = vmatmul.msk.f32.gmra.mxu3 %vm484_vm0, %v5616_v24  ;;  %4104 = vmatpush.msra.mxu1 %v5706_v20  ;;  %v5735_v24 = vld [vmem:[%s9570_s3 + $0xf0] sm:$0xff]  ;;  %v5759_v20 = vld [vmem:[%s9571_s4 + $0x220] sm:$0xff] }
 0x5c0   : > { %4191 = vmatpush.msrb.mxu3 %v8710_v53 }
 0x5c1   : > { %4105 = vmatpush.msra.mxu1 %v5704_v34  ;;  %v5699_v34 = vld [vmem:[%s9571_s4 + $0x140] sm:$0xff] }
 0x5c2   : > { %4192 = vmatpush.msrb.mxu3 %v8722_v13 }
 0x5c3   : > { %4106 = vmatpush.msra.mxu1 %v5702_v2  ;;  %v5757_v2 = vld [vmem:[%s9571_s4 + $0x210] sm:$0xff] }
 0x5c4   : > { %4193 = vmatpush.msrb.mxu3 %v8732_v37 }
 0x5c5   : > { %4107 = vmatpush.msra.mxu1 %v5700_v40  ;;  %v5755_v40 = vld [vmem:[%s9571_s4 + $0x200] sm:$0xff] }
 0x5c6   : > { %4194 = vmatpush.msrb.mxu3 %v8740_v55  ;;  %5609 = vmatmul.msk.f32.gmra.mxu1 %vm484_vm0, %v3543_v11 }
 0x5c7   : > { %5625 = vmatmul.msk.f32.gmra.mxu3 %vm484_vm0, %v5617_v63  ;;  %4108 = vmatpush.msra.mxu1 %v5698_v47 }
 0x5c8   : > { %4195 = vmatpush.msrb.mxu3 %v8747_v38 }
 0x5c9   : > { %4109 = vmatpush.msra.mxu1 %v5696_v25 }
 0x5ca   : > { %4196 = vmatpush.msrb.mxu3 %v8753_v45 }
 0x5cc   : > { %4197 = vmatpush.msrb.mxu3 %v8759_v39 }
 0x5ce   : > { %4198 = vmatpush.msrb.mxu3 %v8765_v17  ;;  %5610 = vmatmul.msk.f32.gmra.mxu1 %vm484_vm0, %v3544_v8  ;;  %v5711_v8 = vld [vmem:[%s9571_s4 + $0x1a0] sm:$0xff] }
 0x5cf   : > { %5626 = vmatmul.msk.f32.gmra.mxu3 %vm484_vm0, %v5618_v18  ;;  %4060 = vmatpush.msra.mxu2 %v5711_v8  ;;  %v5707_v18 = vld [vmem:[%s9571_s4 + $0x180] sm:$0xff] }
 0x5d0   : > { %4199 = vmatpush.msrb.mxu3 %v8771_v43 }
 0x5d1   : > { %4061 = vmatpush.msra.mxu2 %v5709_v6  ;;  %v5780_v6 = vld [vmem:[%s9570_s3 + $0x108] sm:$0xff] }
 0x5d3   : > { %4062 = vmatpush.msra.mxu2 %v5707_v18 }
 0x5d5   : > { %4063 = vmatpush.msra.mxu2 %v5705_v22 }
 0x5d6   : > { %5611 = vmatmul.msk.f32.gmra.mxu1 %vm484_vm0, %v3545_v23  ;;  %v5703_v23 = vld [vmem:[%s9571_s4 + $0x160] sm:$0xff] }
 0x5d7   : > { %5627 = vmatmul.msk.f32.gmra.mxu3 %vm484_vm0, %v5619_v56  ;;  %v5701_v56 = vld [vmem:[%s9571_s4 + $0x150] sm:$0xff]  ;;  %4064 = vmatpush.msra.mxu2 %v5703_v23 }
 0x5d8   : > { %v5781_v23 = vld [vmem:[%s9570_s3 + $0x110] sm:$0xff] }
 0x5d9   : > { %4065 = vmatpush.msra.mxu2 %v5701_v56  ;;  %v5782_v56 = vld [vmem:[%s9570_s3 + $0x118] sm:$0xff] }
 0x5db   : > { %4066 = vmatpush.msra.mxu2 %v5699_v34 }
 0x5de   : > { %5612 = vmatmul.msk.f32.gmra.mxu1 %vm484_vm0, %v3546_v46  ;;  %v5697_v46 = vld [vmem:[%s9571_s4 + $0x130] sm:$0xff] }
 0x5df   : > { %5628 = vmatmul.msk.f32.gmra.mxu3 %vm484_vm0, %v5620_v58  ;;  %4067 = vmatpush.msra.mxu2 %v5697_v46 }
 0x5e1   : > { %4068 = vmatpush.msra.mxu2 %v5695_v60 }
 0x623   : > { %v3588_v1 = vpop.f32.mrf.mxu1 }
 0x624   : > { %5663 = vmatmul.msk.f32.vlgmr.msrb.gmra.mxu1 %vm3723_vm3, %v3588_v1  ;;  %5671 = vmatmul.msk.f32.vlgmr.msra.gmra.mxu3 %vm3723_vm3, %v3588_v1 }
 0x625   : > { %4403 = vmatpush.msrb.mxu1 %v8680_v29 }
 0x627   : > { %4404 = vmatpush.msrb.mxu1 %v8687_v32 }
 0x629   : > { %4405 = vmatpush.msrb.mxu1 %v8698_v31 }
 0x62a   : > { %v3680_v42 = vpop.f32.mrf.mxu3 }
 0x62b   : > { %5647 = vmatmul.msk.f32.vlgmr.msrb.gmra.mxu0 %vm3723_vm3, %v3680_v42  ;;  %4406 = vmatpush.msrb.mxu1 %v8710_v53  ;;  %v3591_v9 = vpop.f32.mrf.mxu1 }
 0x62c   : > { %5672 = vmatmul.msk.f32.gmra.mxu3 %vm3723_vm3, %v3591_v9  ;;  %5655 = vmatmul.msk.f32.vlgmr.msrb.gmra.mxu2 %vm3723_vm3, %v3680_v42 }
 0x62d   : > { %4407 = vmatpush.msrb.mxu1 %v8722_v13  ;;  %4275 = vmatpush.msrb.mxu0 %v5761_v61 }
 0x62e   : > { %5664 = vmatmul.msk.f32.gmra.mxu1 %vm3723_vm3, %v3591_v9 }
 0x62f   : > { %4408 = vmatpush.msrb.mxu1 %v8732_v37  ;;  %4276 = vmatpush.msrb.mxu0 %v5759_v20 }
 0x631   : > { %4409 = vmatpush.msrb.mxu1 %v8740_v55  ;;  %4277 = vmatpush.msrb.mxu0 %v5757_v2  ;;  %v5783_v2 = vld [vmem:[%s9570_s3 + $0x120] sm:$0xff] }
 0x632   : > { %v3683_v29 = vpop.f32.mrf.mxu3 }
 0x633   : > { %5648 = vmatmul.msk.f32.gmra.mxu0 %vm3723_vm3, %v3683_v29  ;;  %4410 = vmatpush.msrb.mxu1 %v8747_v38  ;;  %v3594_v32 = vpop.f32.mrf.mxu1 }
 0x634   : > { %5673 = vmatmul.msk.f32.gmra.mxu3 %vm3723_vm3, %v3594_v32  ;;  %5656 = vmatmul.msk.f32.gmra.mxu2 %vm3723_vm3, %v3683_v29 }
 0x635   : > { %4411 = vmatpush.msrb.mxu1 %v8753_v45  ;;  %4278 = vmatpush.msrb.mxu0 %v5755_v40  ;;  %v5784_v40 = vld [vmem:[%s9570_s3 + $0x128] sm:$0xff] }
 0x636   : > { %5665 = vmatmul.msk.f32.gmra.mxu1 %vm3723_vm3, %v3594_v32 }
 0x637   : > { %4412 = vmatpush.msrb.mxu1 %v8759_v39  ;;  %4279 = vmatpush.msrb.mxu0 %v5753_v49 }
 0x639   : > { %4413 = vmatpush.msrb.mxu1 %v8765_v17  ;;  %4280 = vmatpush.msrb.mxu0 %v5751_v35  ;;  %v5785_v35 = vld [vmem:[%s9570_s3 + $0x130] sm:$0xff] }
 0x63a   : > { %v3686_v31 = vpop.f32.mrf.mxu3 }
 0x63b   : > { %5649 = vmatmul.msk.f32.gmra.mxu0 %vm3723_vm3, %v3686_v31  ;;  %4414 = vmatpush.msrb.mxu1 %v8771_v43  ;;  %v3597_v53 = vpop.f32.mrf.mxu1 }
 0x63c   : > { %5674 = vmatmul.msk.f32.gmra.mxu3 %vm3723_vm3, %v3597_v53  ;;  %5657 = vmatmul.msk.f32.gmra.mxu2 %vm3723_vm3, %v3686_v31 }
 0x63d   : > { %4281 = vmatpush.msrb.mxu0 %v5749_v3 }
 0x63e   : > { %5666 = vmatmul.msk.f32.gmra.mxu1 %vm3723_vm3, %v3597_v53 }
 0x63f   : > { %4282 = vmatpush.msrb.mxu0 %v5747_v28 }
 0x641   : > { %4283 = vmatpush.msrb.mxu0 %v5745_v19  ;;  %v5786_v19 = vld [vmem:[%s9570_s3 + $0x138] sm:$0xff] }
 0x642   : > { %v3689_v13 = vpop.f32.mrf.mxu3 }
 0x643   : > { %v3600_v37 = vpop.f32.mrf.mxu1  ;;  %5650 = vmatmul.msk.f32.gmra.mxu0 %vm3723_vm3, %v3689_v13 }
 0x644   : > { %5675 = vmatmul.msk.f32.gmra.mxu3 %vm3723_vm3, %v3600_v37  ;;  %5658 = vmatmul.msk.f32.gmra.mxu2 %vm3723_vm3, %v3689_v13 }
 0x646   : > { %5667 = vmatmul.msk.f32.gmra.mxu1 %vm3723_vm3, %v3600_v37  ;;  %v5762_v37 = vld [vmem:[%s9571_s4 + $0x238] sm:$0xff] }
 0x647   : > { %4316 = vmatpush.msrb.mxu2 %v5762_v37 }
 0x64a   : > { %v3692_v55 = vpop.f32.mrf.mxu3 }
 0x64b   : > { %v3603_v38 = vpop.f32.mrf.mxu1  ;;  %5651 = vmatmul.msk.f32.gmra.mxu0 %vm3723_vm3, %v3692_v55 }
 0x64c   : > { %5676 = vmatmul.msk.f32.gmra.mxu3 %vm3723_vm3, %v3603_v38  ;;  %5659 = vmatmul.msk.f32.gmra.mxu2 %vm3723_vm3, %v3692_v55  ;;  %v5760_v55 = vld [vmem:[%s9571_s4 + $0x228] sm:$0xff] }
 0x64d   : > { %4317 = vmatpush.msrb.mxu2 %v5760_v55 }
 0x64e   : > { %5668 = vmatmul.msk.f32.gmra.mxu1 %vm3723_vm3, %v3603_v38  ;;  %v5758_v38 = vld [vmem:[%s9571_s4 + $0x218] sm:$0xff] }
 0x64f   : > { %4318 = vmatpush.msrb.mxu2 %v5758_v38 }
 0x652   : > { %v3695_v45 = vpop.f32.mrf.mxu3 }
 0x653   : > { %v3606_v39 = vpop.f32.mrf.mxu1  ;;  %5652 = vmatmul.msk.f32.gmra.mxu0 %vm3723_vm3, %v3695_v45 }
 0x654   : > { %5677 = vmatmul.msk.f32.gmra.mxu3 %vm3723_vm3, %v3606_v39  ;;  %5660 = vmatmul.msk.f32.gmra.mxu2 %vm3723_vm3, %v3695_v45  ;;  %v5756_v45 = vld [vmem:[%s9571_s4 + $0x208] sm:$0xff] }
 0x655   : > { %4319 = vmatpush.msrb.mxu2 %v5756_v45 }
 0x656   : > { %5669 = vmatmul.msk.f32.gmra.mxu1 %vm3723_vm3, %v3606_v39 }
 0x65a   : > { %v3698_v17 = vpop.f32.mrf.mxu3 }
 0x65b   : > { %v3609_v43 = vpop.f32.mrf.mxu1  ;;  %5653 = vmatmul.msk.f32.gmra.mxu0 %vm3723_vm3, %v3698_v17 }
 0x65c   : > { %5678 = vmatmul.msk.f32.gmra.mxu3 %vm3723_vm3, %v3609_v43  ;;  %5661 = vmatmul.msk.f32.gmra.mxu2 %vm3723_vm3, %v3698_v17 }
 0x65e   : > { %5670 = vmatmul.msk.f32.gmra.mxu1 %vm3723_vm3, %v3609_v43  ;;  %v5754_v43 = vld [vmem:[%s9571_s4 + $0x1f8] sm:$0xff] }
 0x65f   : > { %4320 = vmatpush.msrb.mxu2 %v5754_v43 }
 0x662   : > { %v3701_v12 = vpop.f32.mrf.mxu3 }
 0x663   : > { %5654 = vmatmul.msk.f32.gmra.mxu0 %vm3723_vm3, %v3701_v12 }
 0x664   : > { %5737 = vmatmul.msk.f32.vlgmr.msrb.gmra.mxu3 %vm484_vm0, %v5729_v48  ;;  %5662 = vmatmul.msk.f32.gmra.mxu2 %vm3723_vm3, %v3701_v12  ;;  %v5752_v48 = vld [vmem:[%s9571_s4 + $0x1e8] sm:$0xff]  ;;  %v5750_v12 = vld [vmem:[%s9571_s4 + $0x1d8] sm:$0xff] }
 0x665   : > { %4321 = vmatpush.msrb.mxu2 %v5752_v48 }
 0x667   : > { %4322 = vmatpush.msrb.mxu2 %v5750_v12 }
 0x66b   : > { %5687 = vmatmul.msk.f32.vlgmr.msra.gmra.mxu0 %vm484_vm0, %v5679_v15  ;;  %v5748_v15 = vld [vmem:[%s9571_s4 + $0x1c8] sm:$0xff] }
 0x66c   : > { %5738 = vmatmul.msk.f32.gmra.mxu3 %vm484_vm0, %v5730_v33  ;;  %4323 = vmatpush.msrb.mxu2 %v5748_v15 }
 0x673   : > { %5688 = vmatmul.msk.f32.gmra.mxu0 %vm484_vm0, %v5680_v14  ;;  %v5746_v14 = vld [vmem:[%s9571_s4 + $0x1b8] sm:$0xff] }
 0x674   : > { %5739 = vmatmul.msk.f32.gmra.mxu3 %vm484_vm0, %v5731_v26  ;;  %4324 = vmatpush.msrb.mxu2 %v5746_v14 }
 0x67b   : > { %5689 = vmatmul.msk.f32.gmra.mxu0 %vm484_vm0, %v5681_v7 }
 0x67c   : > { %5740 = vmatmul.msk.f32.gmra.mxu3 %vm484_vm0, %v5732_v54 }
 0x683   : > { %5690 = vmatmul.msk.f32.gmra.mxu0 %vm484_vm0, %v5682_v4 }
 0x684   : > { %5741 = vmatmul.msk.f32.gmra.mxu3 %vm484_vm0, %v5733_v36 }
 0x68b   : > { %5691 = vmatmul.msk.f32.gmra.mxu0 %vm484_vm0, %v5683_v57 }
 0x68c   : > { %5742 = vmatmul.msk.f32.gmra.mxu3 %vm484_vm0, %v5734_v52 }
 0x693   : > { %5692 = vmatmul.msk.f32.gmra.mxu0 %vm484_vm0, %v5684_v51 }
 0x694   : > { %5743 = vmatmul.msk.f32.gmra.mxu3 %vm484_vm0, %v5735_v24 }
 0x69b   : > { %5693 = vmatmul.msk.f32.gmra.mxu0 %vm484_vm0, %v5685_v59 }
 0x69c   : > { %5744 = vmatmul.msk.f32.gmra.mxu3 %vm484_vm0, %v5736_v30  ;;  %v5779_v30 = vld [vmem:[%s9570_s3 + $0x100] sm:$0xff] }
 0x6a1   : > { %v3871_v36 = vpop.f32.mrf.mxu1 }
 0x6a3   : > { %5694 = vmatmul.msk.f32.gmra.mxu0 %vm484_vm0, %v5686_v0 }
 0x6a7   : > { %v9071_v11 = vpop.f32.mrf.mxu3 }
 0x6a8   : > { %v9073_v16 = vpop.f32.mrf.mxu0 }
 0x6ab   : > { %v3874_v59 = vpop.f32.mrf.mxu1 }
 0x6af   : > { %v9075_v63 = vpop.f32.mrf.mxu3  ;;  %v9208_v52 = vpop.f32.mrf.mxu2 }
 0x6b0   : > { %v9077_v21 = vpop.f32.mrf.mxu0 }
 0x6b3   : > { %v3877_v8 = vpop.f32.mrf.mxu1 }
 0x6b7   : > { %v9079_v27 = vpop.f32.mrf.mxu3  ;;  %v3809_v0 = vpop.f32.mrf.mxu2 }
 0x6b8   : > { %v9081_v10 = vpop.f32.mrf.mxu0  ;;  %v3916_v37 = vadd.f32 %v9075_v63, %v3809_v0  ;;  %v5812_v63 = vld [vmem:[%s9571_s4 + $0x2c8] sm:$0xff] }
 0x6b9   : > { %4531 = vmatpush.msra.mxu0 %v5812_v63 }
 0x6bb   : > { %v9224_v22 = vpop.f32.mrf.mxu1 }
 0x6bf   : > { %v9095_v44 = vpop.f32.mrf.mxu3  ;;  %v3812_v18 = vpop.f32.mrf.mxu2 }
 0x6c0   : > { %v9097_v62 = vpop.f32.mrf.mxu0  ;;  %v3919_v12 = vadd.f32 %v9079_v27, %v3812_v18  ;;  %v5810_v27 = vld [vmem:[%s9571_s4 + $0x2b8] sm:$0xff] }
 0x6c1   : > { %4532 = vmatpush.msra.mxu0 %v5810_v27 }
 0x6c3   : > { %v9234_v20 = vpop.f32.mrf.mxu1 }
 0x6c7   : > { %v9123_v58 = vpop.f32.mrf.mxu3  ;;  %v3815_v61 = vpop.f32.mrf.mxu2 }
 0x6c8   : > { %v9125_v47 = vpop.f32.mrf.mxu0 }
 0x6cb   : > { %v9245_v46 = vpop.f32.mrf.mxu1 }
 0x6cf   : > { %v9142_v25 = vpop.f32.mrf.mxu3  ;;  %v9238_v34 = vpop.f32.mrf.mxu2 }
 0x6d0   : > { %v9144_v50 = vpop.f32.mrf.mxu0 }
 0x6d3   : > { %v9254_v49 = vpop.f32.mrf.mxu1 }
 0x6d7   : > { %v9149_v41 = vpop.f32.mrf.mxu3  ;;  %v9250_v60 = vpop.f32.mrf.mxu2 }
 0x6d8   : > { %v9151_v5 = vpop.f32.mrf.mxu0 }
 0x6db   : > { %v9263_v28 = vpop.f32.mrf.mxu1 }
 0x6df   : > { %v9153_v1 = vpop.f32.mrf.mxu3  ;;  %v9261_v3 = vpop.f32.mrf.mxu2 }
 0x6e0   : > { %v9155_v42 = vpop.f32.mrf.mxu0  ;;  %v3931_v63 = vadd.f32 %v9149_v41, %v9261_v3 }
 0x6e7   : > { %v9157_v9 = vpop.f32.mrf.mxu3 }
 0x6e8   : > { %5763 = vmatmul.msk.f32.vlgmr.msrb.gmra.mxu0 %vm3723_vm3, %v9157_v9  ;;  %v3986_v29 = vpop.f32.mrf.mxu0 }
 0x6e9   : > { %5713 = vmatmul.msk.f32.vlgmr.msra.gmra.mxu2 %vm3723_vm3, %v3986_v29  ;;  %5721 = vmatmul.msk.f32.vlgmr.msra.gmra.mxu1 %vm3723_vm3, %v3986_v29 }
 0x6ef   : > { %v4204_v32 = vpop.f32.mrf.mxu3 }
 0x6f0   : > { %5764 = vmatmul.msk.f32.gmra.mxu0 %vm3723_vm3, %v4204_v32  ;;  %v3989_v31 = vpop.f32.mrf.mxu0 }
 0x6f1   : > { %5714 = vmatmul.msk.f32.gmra.mxu2 %vm3723_vm3, %v3989_v31  ;;  %5722 = vmatmul.msk.f32.gmra.mxu1 %vm3723_vm3, %v3989_v31  ;;  %v3872_v31 = vadd.f32 %v3871_v36, %v9073_v16  ;;  %v5811_v16 = vld [vmem:[%s9571_s4 + $0x2c0] sm:$0xff] }
 0x6f2   : > { %4490 = vmatpush.msra.mxu3 %v5811_v16 }
 0x6f7   : > { %v4207_v53 = vpop.f32.mrf.mxu3 }
 0x6f8   : > { %5765 = vmatmul.msk.f32.gmra.mxu0 %vm3723_vm3, %v4207_v53  ;;  %v3992_v13 = vpop.f32.mrf.mxu0 }
 0x6f9   : > { %5715 = vmatmul.msk.f32.gmra.mxu2 %vm3723_vm3, %v3992_v13  ;;  %5723 = vmatmul.msk.f32.gmra.mxu1 %vm3723_vm3, %v3992_v13 }
 0x6ff   : > { %v4210_v39 = vpop.f32.mrf.mxu3 }
 0x700   : > { %5766 = vmatmul.msk.f32.gmra.mxu0 %vm3723_vm3, %v4210_v39  ;;  %v3995_v17 = vpop.f32.mrf.mxu0 }
 0x701   : > { %5716 = vmatmul.msk.f32.gmra.mxu2 %vm3723_vm3, %v3995_v17  ;;  %5724 = vmatmul.msk.f32.gmra.mxu1 %vm3723_vm3, %v3995_v17  ;;  %v3875_v17 = vadd.f32 %v3874_v59, %v9077_v21  ;;  %v5809_v21 = vld [vmem:[%s9571_s4 + $0x2b0] sm:$0xff] }
 0x702   : > { %4491 = vmatpush.msra.mxu3 %v5809_v21 }
 0x707   : > { %v4213_v33 = vpop.f32.mrf.mxu3 }
 0x708   : > { %5767 = vmatmul.msk.f32.gmra.mxu0 %vm3723_vm3, %v4213_v33  ;;  %v3998_v26 = vpop.f32.mrf.mxu0 }
 0x709   : > { %5717 = vmatmul.msk.f32.gmra.mxu2 %vm3723_vm3, %v3998_v26  ;;  %5725 = vmatmul.msk.f32.gmra.mxu1 %vm3723_vm3, %v3998_v26 }
 0x70f   : > { %v4216_v7 = vpop.f32.mrf.mxu3 }
 0x710   : > { %5768 = vmatmul.msk.f32.gmra.mxu0 %vm3723_vm3, %v4216_v7  ;;  %v4001_v54 = vpop.f32.mrf.mxu0 }
 0x711   : > { %5718 = vmatmul.msk.f32.gmra.mxu2 %vm3723_vm3, %v4001_v54  ;;  %5726 = vmatmul.msk.f32.gmra.mxu1 %vm3723_vm3, %v4001_v54  ;;  %v5808_v54 = vld [vmem:[%s9571_s4 + $0x2a8] sm:$0xff] }
 0x712   : > { %4533 = vmatpush.msra.mxu0 %v5808_v54 }
 0x717   : > { %v4219_v4 = vpop.f32.mrf.mxu3 }
 0x718   : > { %5769 = vmatmul.msk.f32.gmra.mxu0 %vm3723_vm3, %v4219_v4  ;;  %v4004_v57 = vpop.f32.mrf.mxu0 }
 0x719   : > { %5719 = vmatmul.msk.f32.gmra.mxu2 %vm3723_vm3, %v4004_v57  ;;  %5727 = vmatmul.msk.f32.gmra.mxu1 %vm3723_vm3, %v4004_v57  ;;  %v5805_v57 = vld [vmem:[%s9571_s4 + $0x290] sm:$0xff] }
 0x71f   : > { %v4222_v51 = vpop.f32.mrf.mxu3 }
 0x720   : > { %5770 = vmatmul.msk.f32.gmra.mxu0 %vm3723_vm3, %v4222_v51  ;;  %v4007_v24 = vpop.f32.mrf.mxu0 }
 0x721   : > { %5720 = vmatmul.msk.f32.gmra.mxu2 %vm3723_vm3, %v4007_v24  ;;  %5728 = vmatmul.msk.f32.gmra.mxu1 %vm3723_vm3, %v4007_v24  ;;  %v3922_v24 = vadd.f32 %v9095_v44, %v3815_v61  ;;  %v5801_v44 = vld [vmem:[%s9571_s4 + $0x270] sm:$0xff]  ;;  %v5799_v61 = vld [vmem:[%s9571_s4 + $0x260] sm:$0xff] }
 0x729   : > { %5771 = vmatmul.msk.f32.vlgmr.msrb.gmra.mxu2 %vm3723_vm3, %v9157_v9  ;;  %5787 = vmatmul.msk.f32.vlgmr.msrb.gmra.mxu1 %vm484_vm0, %v5779_v30  ;;  %v9270_v9 = vpop.f32.mrf.mxu2 }
 0x72a   : > { %v3934_v54 = vadd.f32 %v9153_v1, %v9270_v9 }
 0x731   : > { %5772 = vmatmul.msk.f32.gmra.mxu2 %vm3723_vm3, %v4204_v32  ;;  %5788 = vmatmul.msk.f32.gmra.mxu1 %vm484_vm0, %v5780_v6 }
 0x739   : > { %5773 = vmatmul.msk.f32.gmra.mxu2 %vm3723_vm3, %v4207_v53  ;;  %5789 = vmatmul.msk.f32.gmra.mxu1 %vm484_vm0, %v5781_v23  ;;  %v5802_v23 = vld [vmem:[%s9571_s4 + $0x278] sm:$0xff] }
 0x741   : > { %5774 = vmatmul.msk.f32.gmra.mxu2 %vm3723_vm3, %v4210_v39  ;;  %5790 = vmatmul.msk.f32.gmra.mxu1 %vm484_vm0, %v5782_v56  ;;  %v5800_v56 = vld [vmem:[%s9571_s4 + $0x268] sm:$0xff] }
 0x749   : > { %5775 = vmatmul.msk.f32.gmra.mxu2 %vm3723_vm3, %v4213_v33  ;;  %5791 = vmatmul.msk.f32.gmra.mxu1 %vm484_vm0, %v5783_v2  ;;  %v3881_v2 = vadd.f32 %v9224_v22, %v9097_v62  ;;  %v5795_v62 = vld [vmem:[%s9571_s4 + $0x240] sm:$0xff]  ;;  %v5796_v22 = vld [vmem:[%s9571_s4 + $0x248] sm:$0xff] }
 0x751   : > { %5776 = vmatmul.msk.f32.gmra.mxu2 %vm3723_vm3, %v4216_v7  ;;  %5792 = vmatmul.msk.f32.gmra.mxu1 %vm484_vm0, %v5784_v40  ;;  %v5807_v7 = vld [vmem:[%s9571_s4 + $0x2a0] sm:$0xff] }
 0x752   : > { %4492 = vmatpush.msra.mxu3 %v5807_v7 }
 0x754   : > { %4493 = vmatpush.msra.mxu3 %v5805_v57 }
 0x759   : > { %5777 = vmatmul.msk.f32.gmra.mxu2 %vm3723_vm3, %v4219_v4  ;;  %5793 = vmatmul.msk.f32.gmra.mxu1 %vm484_vm0, %v5785_v35  ;;  %v3878_v4 = vadd.f32 %v3877_v8, %v9081_v10  ;;  %v5803_v10 = vld [vmem:[%s9571_s4 + $0x280] sm:$0xff]  ;;  %v5804_v8 = vld [vmem:[%s9571_s4 + $0x288] sm:$0xff]  ;;  %v5797_v35 = vld [vmem:[%s9571_s4 + $0x250] sm:$0xff] }
 0x75a   : > { %4494 = vmatpush.msra.mxu3 %v5803_v10 }
 0x75c   : > { %4495 = vmatpush.msra.mxu3 %v5801_v44 }
 0x75e   : > { %4496 = vmatpush.msra.mxu3 %v5799_v61 }
 0x760   : > { %4497 = vmatpush.msra.mxu3 %v5797_v35 }
 0x761   : > { %5778 = vmatmul.msk.f32.gmra.mxu2 %vm3723_vm3, %v4222_v51  ;;  %5794 = vmatmul.msk.f32.gmra.mxu1 %vm484_vm0, %v5786_v19  ;;  %v5806_v51 = vld [vmem:[%s9571_s4 + $0x298] sm:$0xff] }
 0x762   : > { %4534 = vmatpush.msra.mxu0 %v5806_v51  ;;  %v5798_v19 = vld [vmem:[%s9571_s4 + $0x258] sm:$0xff]  ;;  %4498 = vmatpush.msra.mxu3 %v5795_v62 }
 0x764   : > { %4535 = vmatpush.msra.mxu0 %v5804_v8 }
 0x765   : > { %v4285_v29 = vpop.f32.mrf.mxu0 }
 0x766   : > { %v9272_v32 = vpop.f32.mrf.mxu1  ;;  %4536 = vmatpush.msra.mxu0 %v5802_v23 }
 0x768   : > { %4537 = vmatpush.msra.mxu0 %v5800_v56 }
 0x76a   : > { %4538 = vmatpush.msra.mxu0 %v5798_v19  ;;  %v3913_v19 = vadd.f32 %v9071_v11, %v9208_v52 }
 0x76c   : > { %v4070_v53 = vpop.f32.mrf.mxu2  ;;  %4539 = vmatpush.msra.mxu0 %v5796_v22 }
 0x76d   : > { %v4288_v13 = vpop.f32.mrf.mxu0  ;;  %v4135_v55 = vadd.f32 %v4070_v53, %v3872_v31 }
 0x76e   : > { %v4114_v38 = vpop.f32.mrf.mxu1 }
 0x76f   : > { %v9276_v45 = vadd.f32 %v4114_v38, %v3916_v37  ;;  %v9278_v39 = vadd.f32 %v4285_v29, %v4135_v55  ;;  %v3925_v29 = vadd.f32 %v9123_v58, %v9238_v34  ;;  %v3884_v58 = vadd.f32 %v9234_v20, %v9125_v47 }
 0x770   : > { %v3928_v38 = vadd.f32 %v9142_v25, %v9250_v60  ;;  %v3890_v25 = vadd.f32 %v9254_v49, %v9151_v5 }
 0x774   : > { %v4073_v43 = vpop.f32.mrf.mxu2 }
 0x775   : > { %v4291_v48 = vpop.f32.mrf.mxu0  ;;  %v4137_v15 = vadd.f32 %v4073_v43, %v3875_v17 }
 0x776   : > { %v4117_v33 = vpop.f32.mrf.mxu1 }
 0x777   : > { %v9288_v14 = vadd.f32 %v4117_v33, %v3919_v12  ;;  %v9290_v26 = vadd.f32 %v4288_v13, %v4137_v15  ;;  %v3887_v33 = vadd.f32 %v9245_v46, %v9144_v50 }
 0x77c   : > { %v4076_v36 = vpop.f32.mrf.mxu2 }
 0x77d   : > { %v4139_v59 = vadd.f32 %v4076_v36, %v3878_v4  ;;  %v4294_v0 = vpop.f32.mrf.mxu0 }
 0x77e   : > { %v4120_v30 = vpop.f32.mrf.mxu1 }
 0x77f   : > { %v9318_v6 = vadd.f32 %v4120_v30, %v3922_v24  ;;  %v9320_v18 = vadd.f32 %v4291_v48, %v4139_v59 }
 0x784   : > { %v4079_v40 = vpop.f32.mrf.mxu2 }
 0x785   : > { %v4141_v31 = vadd.f32 %v4079_v40, %v3881_v2  ;;  %v4297_v55 = vpop.f32.mrf.mxu0 }
 0x786   : > { %v4123_v53 = vpop.f32.mrf.mxu1 }
 0x787   : > { %v9350_v13 = vadd.f32 %v4123_v53, %v3925_v29  ;;  %v9352_v37 = vadd.f32 %v4294_v0, %v4141_v31  ;;  %v4136_v31 = vadd.f32 %v9272_v32, %v3913_v19  ;;  %v4582_v53 = vld [vmem:[#allocation7 + $0x1] ss:$8 sm:$0x3] }
 0x788   : > { %v9409_v52 = vperm.slane %v4582_v53, 0 }
 0x78c   : > { %v4082_v34 = vpop.f32.mrf.mxu2 }
 0x78d   : > { %v4143_v17 = vadd.f32 %v4082_v34, %v3884_v58  ;;  %v4300_v15 = vpop.f32.mrf.mxu0 }
 0x78e   : > { %v4126_v43 = vpop.f32.mrf.mxu1 }
 0x78f   : > { %v9358_v48 = vadd.f32 %v4126_v43, %v3928_v38  ;;  %v9360_v12 = vadd.f32 %v4297_v55, %v4143_v17  ;;  %v9401_v55 = vperm.slane %v4582_v53, 1 }
 0x794   : > { %v4085_v16 = vpop.f32.mrf.mxu2 }
 0x795   : > { %v4145_v21 = vadd.f32 %v4085_v16, %v3887_v33  ;;  %v4303_v7 = vpop.f32.mrf.mxu0 }
 0x796   : > { %v4129_v47 = vpop.f32.mrf.mxu1 }
 0x797   : > { %v9366_v20 = vadd.f32 %v4129_v47, %v3931_v63  ;;  %v9368_v27 = vadd.f32 %v4300_v15, %v4145_v21 }
 0x79c   : > { %v4088_v60 = vpop.f32.mrf.mxu2 }
 0x79d   : > { %v4147_v4 = vadd.f32 %v4088_v60, %v3890_v25  ;;  %v9396_v0 = vpop.f32.mrf.mxu0 }
 0x79e   : > { %v4132_v50 = vpop.f32.mrf.mxu1 }
 0x79f   : > { %v9374_v46 = vadd.f32 %v4132_v50, %v3934_v54  ;;  %v9376_v36 = vadd.f32 %v4303_v7, %v4147_v4 }
 0x7a4   : > { %v9394_v24 = vpop.f32.mrf.mxu2 }
 0x7a6   : > { %v4416_v41 = vpop.f32.mrf.mxu1 }
 0x7a7   : > { %5813 = vmatmul.msk.f32.vlgmr.msra.gmra.mxu3 %vm3723_vm3, %v4416_v41  ;;  %5821 = vmatmul.msk.f32.vlgmr.msra.gmra.mxu0 %vm3723_vm3, %v4416_v41 }
 0x7ac   : > { %v4326_v59 = vpop.f32.mrf.mxu2 }
 0x7ad   : > { %v4351_v62 = vadd.f32 %v4326_v59, %v4136_v31 }
 0x7ae   : > { %v4419_v3 = vpop.f32.mrf.mxu1 }
 0x7af   : > { %5814 = vmatmul.msk.f32.gmra.mxu3 %vm3723_vm3, %v4419_v3  ;;  %5822 = vmatmul.msk.f32.gmra.mxu0 %vm3723_vm3, %v4419_v3 }
 0x7b4   : > { %v4329_v30 = vpop.f32.mrf.mxu2 }
 0x7b5   : > { %v4353_v33 = vadd.f32 %v4329_v30, %v9276_v45 }
 0x7b6   : > { %v4422_v5 = vpop.f32.mrf.mxu1 }
 0x7b7   : > { %5815 = vmatmul.msk.f32.gmra.mxu3 %vm3723_vm3, %v4422_v5  ;;  %5823 = vmatmul.msk.f32.gmra.mxu0 %vm3723_vm3, %v4422_v5 }
 0x7bc   : > { %v4332_v8 = vpop.f32.mrf.mxu2 }
 0x7bd   : > { %v4355_v41 = vadd.f32 %v4332_v8, %v9288_v14 }
 0x7be   : > { %v4425_v1 = vpop.f32.mrf.mxu1 }
 0x7bf   : > { %5816 = vmatmul.msk.f32.gmra.mxu3 %vm3723_vm3, %v4425_v1  ;;  %5824 = vmatmul.msk.f32.gmra.mxu0 %vm3723_vm3, %v4425_v1 }
 0x7c4   : > { %v4335_v61 = vpop.f32.mrf.mxu2 }
 0x7c6   : > { %v4428_v49 = vpop.f32.mrf.mxu1 }
 0x7c7   : > { %5817 = vmatmul.msk.f32.gmra.mxu3 %vm3723_vm3, %v4428_v49  ;;  %5825 = vmatmul.msk.f32.gmra.mxu0 %vm3723_vm3, %v4428_v49 }
 0x7cc   : > { %v4338_v40 = vpop.f32.mrf.mxu2 }
 0x7cd   : > { %v4359_v34 = vadd.f32 %v4338_v40, %v9350_v13 }
 0x7ce   : > { %v4431_v9 = vpop.f32.mrf.mxu1 }
 0x7cf   : > { %5818 = vmatmul.msk.f32.gmra.mxu3 %vm3723_vm3, %v4431_v9  ;;  %5826 = vmatmul.msk.f32.gmra.mxu0 %vm3723_vm3, %v4431_v9 }
 0x7d4   : > { %v4341_v38 = vpop.f32.mrf.mxu2 }
 0x7d5   : > { %v4361_v25 = vadd.f32 %v4341_v38, %v9358_v48  ;;  %v3893_v38 = vadd.f32 %v9263_v28, %v9155_v42 }
 0x7d6   : > { %v4434_v57 = vpop.f32.mrf.mxu1 }
 0x7d7   : > { %5819 = vmatmul.msk.f32.gmra.mxu3 %vm3723_vm3, %v4434_v57  ;;  %5827 = vmatmul.msk.f32.gmra.mxu0 %vm3723_vm3, %v4434_v57 }
 0x7dc   : > { %v4344_v45 = vpop.f32.mrf.mxu2 }
 0x7de   : > { %v4437_v51 = vpop.f32.mrf.mxu1 }
 0x7df   : > { %5820 = vmatmul.msk.f32.gmra.mxu3 %vm3723_vm3, %v4437_v51  ;;  %5828 = vmatmul.msk.f32.gmra.mxu0 %vm3723_vm3, %v4437_v51  ;;  %v4363_v51 = vadd.f32 %v4344_v45, %v9366_v20 }
 0x7e4   : > { %v4347_v40 = vpop.f32.mrf.mxu2 }
 0x824   : > { %v4541_v10 = vpop.f32.mrf.mxu0 }
 0x825   : > { %v4566_v22 = vadd.f32 %v4541_v10, %v4351_v62 }
 0x827   : > { %v4589_v43 = vadd.f32 %v9401_v55, %v4566_v22 }
 0x829   : > { %v4605_v16 = vmax.f32 %v4589_v43, 0.0 }
 0x82a   : > { %v4500_v44 = vpop.f32.mrf.mxu3 }
 0x82b   : > { %v4565_v11 = vadd.f32 %v4500_v44, %v9278_v39 }
 0x82c   : > { %v4544_v23 = vpop.f32.mrf.mxu0 }
 0x82d   : > { %v4568_v63 = vadd.f32 %v4544_v23, %v4353_v33  ;;  %v4588_v13 = vadd.f32 %v9409_v52, %v4565_v11 }
 0x82f   : > { %v4591_v39 = vadd.f32 %v9401_v55, %v4568_v63  ;;  %v4604_v3 = vmax.f32 %v4588_v13, 0.0 }
 0x831   : > { %v4607_v49 = vmax.f32 %v4591_v39, 0.0 }
 0x832   : > { %v4503_v56 = vpop.f32.mrf.mxu3 }
 0x833   : > { %v4567_v5 = vadd.f32 %v4503_v56, %v9290_v26 }
 0x834   : > { %v4547_v2 = vpop.f32.mrf.mxu0 }
 0x835   : > { %v4570_v9 = vadd.f32 %v4547_v2, %v4355_v41  ;;  %v4590_v30 = vadd.f32 %v9409_v52, %v4567_v5  ;;  %v4357_v2 = vadd.f32 %v4335_v61, %v9318_v6  ;;  %v4784_v41 = vld [vmem:[#allocation5 + $0xe8] sm:$0xff]  ;;  %v4632_v5 = vld [vmem:[#allocation2] sm:$0xff] }
 0x837   : > { %v4593_v8 = vadd.f32 %v9401_v55, %v4570_v9  ;;  %v4606_v19 = vmax.f32 %v4590_v30, 0.0  ;;  %v4633_v9 = vld [vmem:[#allocation2 + $0x8] sm:$0xff] }
 0x838   : > { %v4680_v30 = vld [vmem:[#allocation5 + $0x8] sm:$0xff] }
 0x839   : > { %v4609_v62 = vmax.f32 %v4593_v8, 0.0  ;;  %v4783_v8 = vld [vmem:[#allocation5 + $0xe0] sm:$0xff] }
 0x83a   : > { %v4506_v35 = vpop.f32.mrf.mxu3 }
 0x83b   : > { %v4569_v20 = vadd.f32 %v4506_v35, %v9320_v18  ;;  %v4149_v35 = vadd.f32 %v9394_v24, %v3893_v38  ;;  %v4746_v38 = vld [vmem:[#allocation5 + $0x80] sm:$0xff] }
 0x83c   : > { %v4550_v29 = vpop.f32.mrf.mxu0 }
 0x83d   : > { %v4364_v63 = vadd.f32 %v9396_v0, %v4149_v35  ;;  %v4752_v0 = vld [vmem:[#allocation5 + $0xb0] sm:$0xff]  ;;  %v4821_v35 = vld [vmem:[%s9574_s7 + $0x48] sm:$0xff] }
 0x842   : > { %v9403_v58 = vpop.f32.mrf.mxu3 }
 0x843   : > { %v4571_v42 = vadd.f32 %v9403_v58, %v9352_v37  ;;  %v4786_v58 = vld [vmem:[#allocation5 + $0xf8] sm:$0xff] }
 0x844   : > { %v4553_v17 = vpop.f32.mrf.mxu0  ;;  %4798 = vmatpush.msrb.mxu3 %v4786_v58  ;;  %v4678_v58 = vld [vmem:[#allocation7 + $0x2] ss:$0 sm:$0xff] }
 0x845   : > { %v4574_v15 = vadd.f32 %v4553_v17, %v4359_v34  ;;  %v4365_v17 = vadd.f32 %v4347_v40, %v9374_v46  ;;  %v4594_v24 = vadd.f32 %v9409_v52, %v4571_v42  ;;  %v4715_v40 = vld [vmem:[#allocation5 + $0x50] sm:$0xff]  ;;  %v4819_v42 = vld [vmem:[%s9574_s7 + $0x38] sm:$0xff] }
 0x847   : > { %v4597_v32 = vadd.f32 %v9401_v55, %v4574_v15  ;;  %v4592_v15 = vadd.f32 %v9409_v52, %v4569_v20  ;;  %v4610_v45 = vmax.f32 %v4594_v24, 0.0  ;;  %v4782_v20 = vld [vmem:[#allocation5 + $0xd8] sm:$0xff]  ;;  %v4863_v24 = vld [vmem:[%s9575_s8 + $0x50] sm:$0xf] }
 0x849   : > { %v4613_v21 = vmax.f32 %v4597_v32, 0.0 }
 0x84a   : > { %v4512_v47 = vpop.f32.mrf.mxu3 }
 0x84b   : > { %v9414_v60 = vmax.f32 %v4605_v16, %v4613_v21  ;;  %v4573_v7 = vadd.f32 %v4512_v47, %v9360_v12  ;;  %v4608_v16 = vmax.f32 %v4592_v15, 0.0  ;;  %v4825_v15 = vld [vmem:[%s9574_s7 + $0x68] sm:$0xff] }
 0x84c   : > { %v4556_v54 = vpop.f32.mrf.mxu0 }
 0x84d   : > { %v4596_v4 = vadd.f32 %v9409_v52, %v4573_v7  ;;  %v4576_v50 = vadd.f32 %v4556_v54, %v4361_v25 }
 0x84f   : > { %v4612_v1 = vmax.f32 %v4596_v4, 0.0  ;;  %v4599_v48 = vadd.f32 %v9401_v55, %v4576_v50  ;;  %v4753_v50 = vld [vmem:[#allocation5 + $0xb8] sm:$0xff] }
 0x850   : > { %4765 = vmatpush.msra.mxu1 %v4753_v50 }
 0x851   : > { %v9422_v57 = vmax.f32 %v4604_v3, %v4612_v1  ;;  %v4615_v12 = vmax.f32 %v4599_v48, 0.0  ;;  %v4751_v3 = vld [vmem:[#allocation5 + $0xa8] sm:$0xff]  ;;  %v4685_v1 = vld [vmem:[#allocation5 + $0x30] sm:$0xff] }
 0x852   : > { %v4515_v59 = vpop.f32.mrf.mxu3  ;;  %4766 = vmatpush.msra.mxu1 %v4752_v0  ;;  %v4684_v48 = vld [vmem:[#allocation5 + $0x28] sm:$0xff] }
 0x853   : > { %v4623_v10 = vmax.f32 %v4607_v49, %v4615_v12  ;;  %v4575_v44 = vadd.f32 %v4515_v59, %v9368_v27  ;;  %v4628_v14 = vmax.f32 %v9422_v57, %v9414_v60  ;;  %v4572_v27 = vadd.f32 %v4550_v29, %v4357_v2  ;;  %v4683_v49 = vld [vmem:[#allocation5 + $0x20] sm:$0xff]  ;;  %v4682_v57 = vld [vmem:[#allocation5 + $0x18] sm:$0xff]  ;;  %v4634_v12 = vld [vmem:[#allocation2 + $0x10] sm:$0xff] }
 0x854   : > { %v4559_v26 = vpop.f32.mrf.mxu0  ;;  %4767 = vmatpush.msra.mxu1 %v4751_v3  ;;  %v4681_v59 = vld [vmem:[#allocation5 + $0x10] sm:$0xff]  ;;  %v4716_v2 = vld [vmem:[#allocation5 + $0x58] sm:$0xff] }
 0x855   : > { %v4598_v23 = vadd.f32 %v9409_v52, %v4575_v44  ;;  %v4578_v56 = vadd.f32 %v4559_v26, %v4363_v51  ;;  %v4595_v11 = vadd.f32 %v9401_v55, %v4572_v27  ;;  %v4635_v51 = vld [vmem:[#allocation2 + $0x18] sm:$0xff]  ;;  %v4718_v26 = vld [vmem:[#allocation5 + $0x68] sm:$0xff] }
 0x856   : > { %v4720_v44 = vld [vmem:[#allocation5 + $0x78] sm:$0xff]  ;;  %v4747_v27 = vld [vmem:[#allocation5 + $0x88] sm:$0xff] }
 0x857   : > { %v4614_v31 = vmax.f32 %v4598_v23, 0.0  ;;  %v4601_v53 = vadd.f32 %v9401_v55, %v4578_v56  ;;  %v4611_v21 = vmax.f32 %v4595_v11, 0.0  ;;  %v4750_v23 = vld [vmem:[#allocation5 + $0xa0] sm:$0xff] }
 0x858   : > { %v4717_v56 = vld [vmem:[#allocation5 + $0x60] sm:$0xff]  ;;  %4768 = vmatpush.msra.mxu1 %v4750_v23 }
 0x859   : > { %v4622_v22 = vmax.f32 %v4606_v19, %v4614_v31  ;;  %v4617_v34 = vmax.f32 %v4601_v53, 0.0  ;;  %v4714_v19 = vld [vmem:[#allocation5 + $0x48] sm:$0xff]  ;;  %v4749_v31 = vld [vmem:[#allocation5 + $0x98] sm:$0xff]  ;;  %v4713_v53 = vld [vmem:[#allocation5 + $0x40] sm:$0xff] }
 0x85a   : > { %v4518_v43 = vpop.f32.mrf.mxu3  ;;  %4769 = vmatpush.msra.mxu1 %v4749_v31  ;;  %v4820_v11 = vld [vmem:[%s9574_s7 + $0x40] sm:$0xff] }
 0x85b   : > { %v4625_v6 = vmax.f32 %v4609_v62, %v4617_v34  ;;  %v4577_v61 = vadd.f32 %v4518_v43, %v9376_v36  ;;  %v4629_v33 = vmax.f32 %v4622_v22, %v4623_v10  ;;  %v4679_v10 = vld [vmem:[#allocation5] sm:$0xff]  ;;  %v4748_v62 = vld [vmem:[#allocation5 + $0x90] sm:$0xff]  ;;  %v4780_v34 = vld [vmem:[#allocation5 + $0xc8] sm:$0xff] }
 0x85c   : > { %v4562_v18 = vpop.f32.mrf.mxu0  ;;  %4770 = vmatpush.msra.mxu1 %v4748_v62  ;;  %v4781_v22 = vld [vmem:[#allocation5 + $0xd0] sm:$0xff] }
 0x85d   : > { %v4600_v29 = vadd.f32 %v9409_v52, %v4577_v61  ;;  %v4580_v32 = vadd.f32 %v4562_v18, %v4365_v17  ;;  %v4779_v17 = vld [vmem:[#allocation5 + $0xc0] sm:$0xff]  ;;  %v4826_v43 = vld [vmem:[%s9574_s7 + $0x70] sm:$0xff]  ;;  %v4823_v61 = vld [vmem:[%s9574_s7 + $0x58] sm:$0xff] }
 0x85e   : > { %4771 = vmatpush.msra.mxu1 %v4747_v27  ;;  %4833 = vmatpush.msrb.mxu0 %v4826_v43 }
 0x85f   : > { %v4616_v28 = vmax.f32 %v4600_v29, 0.0  ;;  %v4603_v46 = vadd.f32 %v9401_v55, %v4580_v32  ;;  %v4785_v55 = vld [vmem:[#allocation5 + $0xf0] sm:$0xff] }
 0x860   : > { %4799 = vmatpush.msrb.mxu3 %v4785_v55  ;;  %4772 = vmatpush.msra.mxu1 %v4746_v38 }
 0x861   : > { %v4624_v36 = vmax.f32 %v4608_v16, %v4616_v28  ;;  %v4619_v47 = vmax.f32 %v4603_v46, 0.0  ;;  %4834 = vmatpush.msrb.mxu0 %v4825_v15  ;;  %v4818_v28 = vld [vmem:[%s9574_s7 + $0x30] sm:$0xff]  ;;  %v4817_v46 = vld [vmem:[%s9574_s7 + $0x28] sm:$0xff] }
 0x862   : > { %v4521_v25 = vpop.f32.mrf.mxu3  ;;  %4800 = vmatpush.msrb.mxu3 %v4784_v41 }
 0x863   : > { %v4627_v13 = vmax.f32 %v4611_v21, %v4619_v47  ;;  %v4579_v60 = vadd.f32 %v4521_v25, %v4364_v63  ;;  %v4630_v7 = vmax.f32 %v4624_v36, %v4625_v6  ;;  %v4824_v6 = vld [vmem:[%s9574_s7 + $0x60] sm:$0xff]  ;;  %v4815_v21 = vld [vmem:[%s9574_s7 + $0x18] sm:$0xff]  ;;  %v4814_v36 = vld [vmem:[%s9574_s7 + $0x10] sm:$0xff] }
 0x864   : > { %4801 = vmatpush.msrb.mxu3 %v4783_v8  ;;  %4835 = vmatpush.msrb.mxu0 %v4824_v6  ;;  %v4816_v63 = vld [vmem:[%s9574_s7 + $0x20] sm:$0xff]  ;;  %v4813_v47 = vld [vmem:[%s9574_s7 + $0x8] sm:$0xff] }
 0x865   : > { %v4602_v54 = vadd.f32 %v9409_v52, %v4579_v60  ;;  %v4686_v52 = vld [vmem:[#allocation5 + $0x38] sm:$0xff]  ;;  %v4812_v25 = vld [vmem:[%s9574_s7] sm:$0xff] }
 0x866   : > { %4802 = vmatpush.msrb.mxu3 %v4782_v20  ;;  %4836 = vmatpush.msrb.mxu0 %v4823_v61  ;;  %v4861_v60 = vld [vmem:[%s9575_s8 + $0x40] sm:$0xff] }
 0x867   : > { %v4618_v39 = vmax.f32 %v4602_v54, 0.0  ;;  %v4859_v54 = vld [vmem:[%s9575_s8 + $0x30] sm:$0xff] }
 0x868   : > { %4803 = vmatpush.msrb.mxu3 %v4781_v22 }
 0x869   : > { %v4626_v4 = vmax.f32 %v4610_v45, %v4618_v39  ;;  %v4858_v45 = vld [vmem:[%s9575_s8 + $0x28] sm:$0xff] }
 0x86a   : > { %4804 = vmatpush.msrb.mxu3 %v4780_v34 }
 0x86b   : > { %v4631_v37 = vmax.f32 %v4626_v4, %v4627_v13  ;;  %v4862_v13 = vld [vmem:[%s9575_s8 + $0x48] sm:$0xff]  ;;  %v4857_v4 = vld [vmem:[%s9575_s8 + $0x20] sm:$0xff] }
 0x86c   : > { %4805 = vmatpush.msrb.mxu3 %v4779_v17 }
 0x86d   : > { %4661 = vmatpush.msra.mxu2 %v4631_v37  ;;  %v4856_v37 = vld [vmem:[%s9575_s8 + $0x18] sm:$0xff] }
 0x86f   : > { %4662 = vmatpush.msra.mxu2 %v4630_v7  ;;  %v4860_v7 = vld [vmem:[%s9575_s8 + $0x38] sm:$0xff] }
 0x871   : > { %4663 = vmatpush.msra.mxu2 %v4629_v33  ;;  %v4822_v33 = vld [vmem:[%s9574_s7 + $0x50] sm:$0xff] }
 0x872   : > { %4837 = vmatpush.msrb.mxu0 %v4822_v33 }
 0x873   : > { %4664 = vmatpush.msra.mxu2 %v4628_v14  ;;  %v4719_v14 = vld [vmem:[#allocation5 + $0x70] sm:$0xff] }
 0x874   : > { %5829 = vmatmul.msk.f32.vlgmr.msra.gmra.mxu2 %vm4636_vm4, %v4632_v5  ;;  %4838 = vmatpush.msrb.mxu0 %v4821_v35 }
 0x875   : > { %4699 = vmatpush.msrb.mxu2 %v4686_v52 }
 0x876   : > { %4839 = vmatpush.msrb.mxu0 %v4820_v11 }
 0x877   : > { %4700 = vmatpush.msrb.mxu2 %v4685_v1 }
 0x878   : > { %4840 = vmatpush.msrb.mxu0 %v4819_v42 }
 0x879   : > { %4701 = vmatpush.msrb.mxu2 %v4684_v48  ;;  %v4855_v48 = vld [vmem:[%s9575_s8 + $0x10] sm:$0xff] }
 0x87a   : > { %4841 = vmatpush.msrb.mxu0 %v4818_v28 }
 0x87b   : > { %4702 = vmatpush.msrb.mxu2 %v4683_v49  ;;  %v4854_v49 = vld [vmem:[%s9575_s8 + $0x8] sm:$0xff] }
 0x87c   : > { %5830 = vmatmul.msk.f32.gmra.mxu2 %vm4636_vm4, %v4633_v9  ;;  %4842 = vmatpush.msrb.mxu0 %v4817_v46  ;;  %v4853_v9 = vld [vmem:[%s9575_s8] sm:$0xff] }
 0x87d   : > { %4703 = vmatpush.msrb.mxu2 %v4682_v57  ;;  %v4827_v57 = vld [vmem:[#allocation7 + $0x3] ss:$0 sm:$0xff] }
 0x87e   : > { %4843 = vmatpush.msrb.mxu0 %v4816_v63 }
 0x87f   : > { %4704 = vmatpush.msrb.mxu2 %v4681_v59 }
 0x880   : > { %4844 = vmatpush.msrb.mxu0 %v4815_v21 }
 0x881   : > { %4705 = vmatpush.msrb.mxu2 %v4680_v30  ;;  %v4864_v30 = vld [vmem:[#allocation7 + $0x4] ss:$0 sm:$0xff] }
 0x882   : > { %4845 = vmatpush.msrb.mxu0 %v4814_v36 }
 0x883   : > { %4706 = vmatpush.msrb.mxu2 %v4679_v10 }
 0x884   : > { %5831 = vmatmul.msk.f32.gmra.mxu2 %vm4636_vm4, %v4634_v12  ;;  %4846 = vmatpush.msrb.mxu0 %v4813_v47 }
 0x885   : > { %4732 = vmatpush.msra.mxu2 %v4720_v44 }
 0x886   : > { %4847 = vmatpush.msrb.mxu0 %v4812_v25 }
 0x887   : > { %4733 = vmatpush.msra.mxu2 %v4719_v14 }
 0x889   : > { %4734 = vmatpush.msra.mxu2 %v4718_v26 }
 0x88b   : > { %4735 = vmatpush.msra.mxu2 %v4717_v56 }
 0x88c   : > { %5832 = vmatmul.msk.f32.gmra.mxu2 %vm4636_vm4, %v4635_v51 }
 0x88d   : > { %4736 = vmatpush.msra.mxu2 %v4716_v2 }
 0x88f   : > { %4737 = vmatpush.msra.mxu2 %v4715_v40 }
 0x891   : > { %4738 = vmatpush.msra.mxu2 %v4714_v19 }
 0x893   : > { %4739 = vmatpush.msra.mxu2 %v4713_v53 }
 0x8f7   : > { %v4666_v18 = vpop.f32.mrf.mxu2 }
 0x8f8   : > { %5833 = vmatmul.msk.f32.vlgmr.msrb.gmra.mxu2 %vm4687_vm5, %v4666_v18 }
 0x8f9   : > { %5838 = vmatpush.msk.msrb.mxu2 %vm1124_vm1, %v4863_v24 }
 0x8fb   : > { %4878 = vmatpush.msrb.mxu2 %v4862_v13 }
 0x8fd   : > { %4879 = vmatpush.msrb.mxu2 %v4861_v60 }
 0x8ff   : > { %v4669_v29 = vpop.f32.mrf.mxu2  ;;  %4880 = vmatpush.msrb.mxu2 %v4860_v7 }
 0x900   : > { %5834 = vmatmul.msk.f32.vlgmr.msra.gmra.mxu2 %vm4687_vm5, %v4669_v29 }
 0x901   : > { %4881 = vmatpush.msrb.mxu2 %v4859_v54 }
 0x903   : > { %4882 = vmatpush.msrb.mxu2 %v4858_v45 }
 0x905   : > { %4883 = vmatpush.msrb.mxu2 %v4857_v4 }
 0x907   : > { %v4672_v32 = vpop.f32.mrf.mxu2  ;;  %4884 = vmatpush.msrb.mxu2 %v4856_v37 }
 0x908   : > { %5835 = vmatmul.msk.f32.vlgmr.msra.gmra.mxu1 %vm4687_vm5, %v4672_v32 }
 0x909   : > { %4885 = vmatpush.msrb.mxu2 %v4855_v48 }
 0x90b   : > { %4886 = vmatpush.msrb.mxu2 %v4854_v49 }
 0x90d   : > { %4887 = vmatpush.msrb.mxu2 %v4853_v9 }
 0x90f   : > { %v4675_v16 = vpop.f32.mrf.mxu2 }
 0x910   : > { %5836 = vmatmul.msk.f32.vlgmr.msrb.gmra.mxu3 %vm4687_vm5, %v4675_v16 }
 0x97b   : > { %v4708_v39 = vpop.f32.mrf.mxu2 }
 0x97c   : > { %v4711_v55 = vadd.f32 %v4708_v39, %v4678_v58 }
 0x983   : > { %v4741_v50 = vpop.f32.mrf.mxu2 }
 0x984   : > { %v4744_v0 = vadd.f32 %v4741_v50, %v4711_v55 }
 0x985   : > { %v4774_v41 = vpop.f32.mrf.mxu1 }
 0x986   : > { %v4777_v3 = vadd.f32 %v4774_v41, %v4744_v0 }
 0x993   : > { %v4807_v5 = vpop.f32.mrf.mxu3 }
 0x994   : > { %v4810_v52 = vadd.f32 %v4807_v5, %v4777_v3 }
 0x996   : > { %v4811_v1 = vmax.f32 %v4810_v52, 0.0 }
 0x998   : > { %5837 = vmatmul.msk.f32.vlgmr.msrb.gmra.mxu0 %vm4828_vm6, %v4811_v1 }
 0xa15   : > { %v4849_v12 = vpop.f32.mrf.mxu0 }
 0xa16   : > { %v4850_v51 = vadd.f32 %v4849_v12, %v4827_v57 }
 0xa18   : > { %v4852_v59 = vmax.f32 %v4850_v51, 0.0 }
 0xa1a   : > { %5839 = vmatmul.msk.f32.vlgmr.msrb.gmra.mxu2 %vm4865_vm7, %v4852_v59 }
 0xa9d   : > { %v4889_v10 = vpop.f32.mrf.mxu2 }
 0xa9e   : > { %v4890_v44 = vadd.f32 %v4889_v10, %v4864_v30 }
 0xaa0   : > { %4892 = vst [vmem:[%s401_s25] sm:$0xff] %v4890_v44 }
 0xaa1   : > { %6077 = shalt.err (!%p6074_p8)
}
 0xaa2   : > { %5872 = dma.vmem_to_hbm [thread:$0]  (%p6220_p5), %s4907_s6, 128, %s4909_s5, %s4894_s15  }
 0xaa3 PF: > { %p5894_p9 = scmp.ge.s32.totalorder %s6120_s16, 2  ;;  %s4920_s20 = sand.u32 1, %s6108_s13  }
 0xaa4   : > { %s4921_s26 = scalar_lea.sflag [#allocation4], %s4920_s20 }
 0xaa5   : > { %p5885_p10 = pnand %p5894_p9, %p6224_p6 }
 0xaa7   : > { %p5886_p11 = pneg %p5885_p10 }
 0xaa9   : > { %6103 = dma.done.wait (%p5886_p11), %s4921_s26, 128  }
 0xaaa   : > { %6105 = vsyncadd (%p5886_p11), %s4921_s26, 4294967168  ;;  %s9824_s27 = sld [smem:[#allocation12_spill]]  ;;  %p22_p12 = scmp.ge.s32.totalorder %s6207_s19, 4  }
 0xaab   : > { %s9825_s15 = sld [smem:[#allocation13_spill]]  ;;  %s9826_s13 = smov %s6112_s14 }
 0xaac   : > { %s9828_s16 = smov %s6207_s19  ;;  %24 = sbr.rel (!%p22_p12) target bundleno = 8 (0x8), region = 128 }
 0xab0   : > { %s9827_s14 = smov %s9824_s27 }
 0xab1   :  { %4927 = vsyncpa [#allocation3], 1 }
 0xab2   :  { %4929 = vsyncpa [#allocation3 + $0x1], 1 }
 0xab3   :  { %4930 = vsyncpa [#allocation6], 1 }
 0xab4   :  { %4931 = vsyncpa [#allocation4], 1 }
 0xab5   :  { %4933 = vsyncpa [#allocation4 + $0x1], 1 }

</bundles_post_ra>
